<compile_context>
chip_gen: v6e
topology: v6e:2x2x1
jax: 0.10.0
libtpu: 0.0.40
codegen_flags: <defaults>
</compile_context>

<pallas_src>
import jax
import jax.numpy as jnp
from jax.experimental import pallas as pl
from jax.experimental.pallas import tpu as pltpu

H, W = 72, 48            # spatial size implied by nn.Linear(1 * 72 * 48, 300)
KH, KW = 5, 5
PAD = 2
D_IN = H * W             # 3456 = 27 * 128 (lane aligned)
HIDDEN = 300
HIDDEN_PAD = 384         # 3 * 128 lane-dense hidden width (zero padded)
NUM_CLASSES = 10
C_PAD = 128              # pad logits to one full lane group
MAX_TM = 1024            # max batch tile (x tile in bf16: 1024*3456*2 ~ 6.75 MiB)
VMEM_LIMIT_BYTES = 48 * 1024 * 1024   # < v7x 64 MiB physical, leaves headroom

_HIGH = jax.lax.Precision.HIGHEST     # keep f32 reference math actually f32


def _round_up(x, m):
    return (x + m - 1) // m * m


# ---------------------------------------------------------------------------
# Fused MLP kernel: matmul -> tanh -> matmul -> log_softmax.
# Grid: one 'parallel' axis over batch tiles. Weights are resident across the
# grid (constant index_map, single-buffered). First matmul is bf16 on the MXU
# with f32 accumulation; everything downstream is f32 (v5e has no bf16
# VPU/EUP). Class axis is padded to 128 lanes; padded lanes are exactly zero
# logits (finite), masked out of max / sum-exp, and zeroed in the output.
# ---------------------------------------------------------------------------
def mlp_kernel(x_ref, w1_ref, b1_ref, w2_ref, b2_ref, o_ref):
    x = x_ref[...].astype(jnp.bfloat16)                        # (TM, 3456)
    h = jnp.dot(x, w1_ref[...], preferred_element_type=jnp.float32)
    h = jnp.tanh(h + b1_ref[...])                              # (TM, 384) f32
    logits = jnp.dot(h, w2_ref[...], preferred_element_type=jnp.float32)
    logits = logits + b2_ref[...]                              # (TM, 128) f32

    lane = jax.lax.broadcasted_iota(jnp.int32, logits.shape, 1)
    valid = lane < NUM_CLASSES
    masked = jnp.where(valid, logits, -jnp.inf)
    m = jnp.max(masked, axis=-1, keepdims=True)
    z = logits - m
    sum_exp = jnp.sum(jnp.where(valid, jnp.exp(z), 0.0), axis=-1, keepdims=True)
    lse = jnp.log(sum_exp)
    o_ref[...] = jnp.where(valid, z - lse, 0.0)


def _select_batch_tile(n):
    """Pick (tm, n_pad).

    Prefers a tile that (a) needs no jnp.pad (divides n, 8-aligned, or equals
    the full batch so the block == full array dim), and (b) gives >= 2 grid
    steps when n >= 16 so v7x's two TensorCores both get work.
    """
    if n <= 8:
        return n, n                                   # single full-dim tile
    divs = [d for d in range(8, min(MAX_TM, n) + 1, 8) if n % d == 0]
    if divs:
        multi = [d for d in divs if n // d >= 2]
        cand = multi if (n >= 16 and multi) else divs
        return max(cand), n
    if n <= MAX_TM:
        return n, n                                   # single full-dim tile
    # Fallback for huge batches with no 8-aligned divisor <= MAX_TM: pad.
    return MAX_TM, _round_up(n, MAX_TM)


def thai_ocr_forward(image, folded):
    """image: (N, 1, H, W) float32 or bfloat16 -> (N, NUM_CLASSES) log-probs.

    Feeding bf16 images halves the dominant HBM stream (the weights are
    resident); f32 images also work and are cast inside the kernel.
    """
    n = image.shape[0]
    x = image.reshape(n, D_IN)                    # nn.Flatten (C == 1), layout-free

    tm, n_pad = _select_batch_tile(n)
    if n_pad != n:
        x = jnp.pad(x, ((0, n_pad - n), (0, 0)))  # rare fallback path only

    itemsize = jnp.dtype(x.dtype).itemsize
    cost = pl.CostEstimate(
        flops=int(2 * n_pad * (D_IN * HIDDEN_PAD + HIDDEN_PAD * C_PAD)),
        transcendentals=int(n_pad * (HIDDEN_PAD + C_PAD)),
        bytes_accessed=int(n_pad * D_IN * itemsize
                           + D_IN * HIDDEN_PAD * 2        # W1' bf16
                           + HIDDEN_PAD * C_PAD * 4       # W2 f32
                           + (HIDDEN_PAD + C_PAD) * 4     # biases
                           + n_pad * C_PAD * 4),          # output
    )
    single = pl.Buffered(1)   # grid-invariant blocks need no double buffer

    out = pl.pallas_call(
        mlp_kernel,
        out_shape=jax.ShapeDtypeStruct((n_pad, C_PAD), jnp.float32),
        grid=(n_pad // tm,),
        in_specs=[
            pl.BlockSpec((tm, D_IN), lambda i: (i, 0)),                # x tile
            pl.BlockSpec((D_IN, HIDDEN_PAD), lambda i: (0, 0),
                         pipeline_mode=single),                        # W1' (bf16)
            pl.BlockSpec((1, HIDDEN_PAD), lambda i: (0, 0),
                         pipeline_mode=single),                        # b1'
            pl.BlockSpec((HIDDEN_PAD, C_PAD), lambda i: (0, 0),
                         pipeline_mode=single),                        # W2
            pl.BlockSpec((1, C_PAD), lambda i: (0, 0),
                         pipeline_mode=single),                        # b2
        ],
        out_specs=pl.BlockSpec((tm, C_PAD), lambda i: (i, 0)),
        compiler_params=pltpu.CompilerParams(
            dimension_semantics=("parallel",),
            vmem_limit_bytes=VMEM_LIMIT_BYTES,
        ),
        cost_estimate=cost,
    )(x, folded["w1"], folded["b1"], folded["w2"], folded["b2"])
    return out[:n, :NUM_CLASSES]


# ---------------------------------------------------------------------------
# Parameter construction + offline folding
# ---------------------------------------------------------------------------
def make_params(key):
    ks = jax.random.split(key, 6)
    return {
        # nn.Conv2d(1, 1, (5, 5), padding=2): weight (1,1,5,5) -> (5,5), bias (1,)
        "conv_w": jax.random.normal(ks[0], (KH, KW), jnp.float32) * 0.1,
        "conv_b": jax.random.normal(ks[1], (1, 1), jnp.float32) * 0.1,
        # nn.Linear(3456, 300): stored pre-transposed as (3456, 300)
        "w1": jax.random.normal(ks[2], (D_IN, HIDDEN), jnp.float32) * 0.02,
        "b1": jax.random.normal(ks[3], (1, HIDDEN), jnp.float32) * 0.02,
        # nn.Linear(300, num_classes): stored pre-transposed as (300, C)
        "w2": jax.random.normal(ks[4], (HIDDEN, NUM_CLASSES), jnp.float32) * 0.02,
        "b2": jax.random.normal(ks[5], (1, NUM_CLASSES), jnp.float32) * 0.02,
    }


def _conv_same(img, conv_w):
    """5x5 cross-correlation with 'same' zero padding (== nn.Conv2d, no bias)."""
    y = jax.lax.conv_general_dilated(
        img[None, None], conv_w[None, None],
        window_strides=(1, 1), padding=((PAD, PAD), (PAD, PAD)),
        dimension_numbers=("NCHW", "OIHW", "NCHW"), precision=_HIGH)
    return y[0, 0]


def fold_params(params, use_bf16=True):
    """Offline weight prep: fold the conv into linear1, lane-pad everything.

    Conv(1->1) + Flatten + Linear1 is a single linear map:
        h = (C x + conv_b * 1) @ W1 + b1
          =  x @ (C^T W1) + (b1 + conv_b * 1^T W1)
    Hidden padded 300 -> 384 and classes 10 -> 128 with zeros; tanh(0) = 0 and
    zero W2 rows/cols keep the padded logits exactly 0 (finite, maskable).
    """
    conv_w = params["conv_w"]
    conv_b = params["conv_b"][0, 0]
    w1, b1 = params["w1"], params["b1"]
    w2, b2 = params["w2"], params["b2"]

    lin = lambda v: _conv_same(v.reshape(H, W), conv_w).reshape(D_IN)
    adjoint = jax.linear_transpose(lin, jnp.zeros((D_IN,), jnp.float32))
    w1_folded = jax.vmap(lambda col: adjoint(col)[0], in_axes=1, out_axes=1)(w1)
    b1_folded = b1 + conv_b * jnp.sum(w1, axis=0, keepdims=True)

    w1_pad = jnp.zeros((D_IN, HIDDEN_PAD), jnp.float32).at[:, :HIDDEN].set(w1_folded)
    b1_pad = jnp.zeros((1, HIDDEN_PAD), jnp.float32).at[:, :HIDDEN].set(b1_folded)
    w2_pad = jnp.zeros((HIDDEN_PAD, C_PAD), jnp.float32).at[:HIDDEN, :NUM_CLASSES].set(w2)
    b2_pad = jnp.zeros((1, C_PAD), jnp.float32).at[:, :NUM_CLASSES].set(b2)

    return {
        "w1": w1_pad.astype(jnp.bfloat16) if use_bf16 else w1_pad,
        "b1": b1_pad,
        "w2": w2_pad,
        "b2": b2_pad,
    }


# ---------------------------------------------------------------------------
# Pure-JAX references for verification
# ---------------------------------------------------------------------------
def reference_forward(image, params):
    """Mirrors the PyTorch forward in f32: conv -> flatten -> lin1 -> tanh -> lin2 -> log_softmax."""
    conv = jax.lax.conv_general_dilated(
        image, params["conv_w"][None, None],
        window_strides=(1, 1), padding=((PAD, PAD), (PAD, PAD)),
        dimension_numbers=("NCHW", "OIHW", "NCHW"), precision=_HIGH,
    ) + params["conv_b"][0, 0]
    flat = conv.reshape(image.shape[0], -1)
    h = jnp.tanh(jnp.matmul(flat, params["w1"], precision=_HIGH) + params["b1"])
    logits = jnp.matmul(h, params["w2"], precision=_HIGH) + params["b2"]
    return jax.nn.log_softmax(logits, axis=1)


def folded_reference_forward(image, folded_f32):
    """Pure-JAX forward on the folded f32 weights (checks the fold is exact)."""
    x = image.reshape(image.shape[0], D_IN)
    h = jnp.tanh(jnp.matmul(x, folded_f32["w1"], precision=_HIGH) + folded_f32["b1"])
    logits = (jnp.matmul(h, folded_f32["w2"][:, :NUM_CLASSES], precision=_HIGH)
              + folded_f32["b2"][:, :NUM_CLASSES])
    return jax.nn.log_softmax(logits, axis=1)


if __name__ == "__main__":
    key = jax.random.PRNGKey(0)
    pkey, xkey = jax.random.split(key)
    params = make_params(pkey)
    image_f32 = jax.random.normal(xkey, (2, 1, H, W), jnp.float32)

    # 1) Conv->Linear1 fold (+ lane padding) is exact in f32.
    ref_f32 = reference_forward(image_f32, params)
    folded_f32 = fold_params(params, use_bf16=False)
    fold_check = folded_reference_forward(image_f32, folded_f32)
    assert jnp.allclose(fold_check, ref_f32, atol=1e-4, rtol=1e-4), "conv fold mismatch"

    # 2) Pallas kernel matches the f32 reference on bf16-quantized inputs.
    #    The image is fed in bf16 at the source (the optimized HBM path) and
    #    W1' is stored in bf16; the reference is evaluated in f32 on the same
    #    quantized image so the comparison isolates kernel error (~1e-3 abs).
    image_bf16 = image_f32.astype(jnp.bfloat16)
    ref = reference_forward(image_bf16.astype(jnp.float32), params)

    folded = fold_params(params, use_bf16=True)
    out = jax.block_until_ready(thai_ocr_forward(image_bf16, folded))
    assert out.shape == (2, NUM_CLASSES)
    assert jnp.allclose(out, ref, atol=3e-2, rtol=0.0), float(
        jnp.max(jnp.abs(out - ref)))

    print("KERNEL_OK")
</pallas_src>

<mosaic_0001>
module attributes {stable_mosaic.version = 11 : i64} {
  func.func @mlp_kernel(%arg0: i32, %arg1: memref<2x3456xbf16, #tpu.memory_space<vmem>>, %arg2: memref<3456x384xbf16, #tpu.memory_space<vmem>>, %arg3: memref<1x384xf32, #tpu.memory_space<vmem>>, %arg4: memref<384x128xf32, #tpu.memory_space<vmem>>, %arg5: memref<1x128xf32, #tpu.memory_space<vmem>>, %arg6: memref<2x128xf32, #tpu.memory_space<vmem>>) attributes {dimension_semantics = [#tpu.dimension_semantics<parallel>], iteration_bounds = array<i64: 1>, scalar_prefetch = 0 : i64, scratch_operands = 0 : i64, tpu.core_type = #tpu.core_type<tc>, window_params = [{transform_indices = @transform_0, window_bounds = array<i64: 2, 3456>}, {pipeline_mode = #tpu.pipeline_mode<synchronous>, transform_indices = @transform_1, window_bounds = array<i64: 3456, 384>}, {pipeline_mode = #tpu.pipeline_mode<synchronous>, transform_indices = @transform_2, window_bounds = array<i64: 1, 384>}, {pipeline_mode = #tpu.pipeline_mode<synchronous>, transform_indices = @transform_3, window_bounds = array<i64: 384, 128>}, {pipeline_mode = #tpu.pipeline_mode<synchronous>, transform_indices = @transform_4, window_bounds = array<i64: 1, 128>}, {transform_indices = @transform_5, window_bounds = array<i64: 2, 128>}]} {
    %c0 = arith.constant 0 : index
    %c0_0 = arith.constant 0 : index
    %0 = vector.load %arg1[%c0, %c0_0] : memref<2x3456xbf16, #tpu.memory_space<vmem>>, vector<2x3456xbf16>
    %c0_1 = arith.constant 0 : index
    %c0_2 = arith.constant 0 : index
    %1 = vector.load %arg2[%c0_1, %c0_2] : memref<3456x384xbf16, #tpu.memory_space<vmem>>, vector<3456x384xbf16>
    %cst = arith.constant dense<0.000000e+00> : vector<2x384xf32>
    %2 = tpu.matmul %0, %1, %cst {dimension_numbers = #tpu.dot_dimension_numbers<[1], [0], [0], [1], [0, 0, 1, 1], [], []>} : vector<2x3456xbf16>, vector<3456x384xbf16>, vector<2x384xf32> -> vector<2x384xf32>
    %c0_3 = arith.constant 0 : index
    %c0_4 = arith.constant 0 : index
    %3 = vector.load %arg3[%c0_3, %c0_4] : memref<1x384xf32, #tpu.memory_space<vmem>>, vector<1x384xf32>
    %4 = vector.broadcast %3 : vector<1x384xf32> to vector<2x384xf32>
    %5 = arith.addf %2, %4 : vector<2x384xf32>
    %6 = math.tanh %5 : vector<2x384xf32>
    %c0_5 = arith.constant 0 : index
    %c0_6 = arith.constant 0 : index
    %7 = vector.load %arg4[%c0_5, %c0_6] : memref<384x128xf32, #tpu.memory_space<vmem>>, vector<384x128xf32>
    %cst_7 = arith.constant dense<0.000000e+00> : vector<2x128xf32>
    %8 = tpu.matmul %6, %7, %cst_7 {dimension_numbers = #tpu.dot_dimension_numbers<[1], [0], [0], [1], [0, 0, 1, 1], [], []>} : vector<2x384xf32>, vector<384x128xf32>, vector<2x128xf32> -> vector<2x128xf32>
    %c0_8 = arith.constant 0 : index
    %c0_9 = arith.constant 0 : index
    %9 = vector.load %arg5[%c0_8, %c0_9] : memref<1x128xf32, #tpu.memory_space<vmem>>, vector<1x128xf32>
    %10 = vector.broadcast %9 : vector<1x128xf32> to vector<2x128xf32>
    %11 = arith.addf %8, %10 : vector<2x128xf32>
    %12 = tpu.iota {dimensions = array<i32: 1>} : vector<2x128xi32>
    %c10_i32 = arith.constant 10 : i32
    %13 = vector.broadcast %c10_i32 : i32 to vector<2x128xi32>
    %14 = arith.cmpi slt, %12, %13 : vector<2x128xi32>
    %cst_10 = arith.constant 0xFF800000 : f32
    %15 = vector.broadcast %cst_10 : f32 to vector<2x128xf32>
    %16 = arith.select %14, %11, %15 : vector<2x128xi1>, vector<2x128xf32>
    %cst_11 = arith.constant dense<0xFF800000> : vector<2xf32>
    %17 = vector.multi_reduction <maximumf>, %16, %cst_11 [1] : vector<2x128xf32> to vector<2xf32>
    %18 = vector.shape_cast %17 : vector<2xf32> to vector<2x1xf32>
    %19 = vector.broadcast %18 : vector<2x1xf32> to vector<2x128xf32>
    %20 = arith.subf %11, %19 : vector<2x128xf32>
    %21 = math.exp %20 : vector<2x128xf32>
    %cst_12 = arith.constant 0.000000e+00 : f32
    %22 = vector.broadcast %cst_12 : f32 to vector<2x128xf32>
    %23 = arith.select %14, %21, %22 : vector<2x128xi1>, vector<2x128xf32>
    %cst_13 = arith.constant dense<0.000000e+00> : vector<2xf32>
    %24 = vector.multi_reduction <add>, %23, %cst_13 [1] : vector<2x128xf32> to vector<2xf32>
    %25 = vector.shape_cast %24 : vector<2xf32> to vector<2x1xf32>
    %26 = math.log %25 : vector<2x1xf32>
    %27 = vector.broadcast %26 : vector<2x1xf32> to vector<2x128xf32>
    %28 = arith.subf %20, %27 : vector<2x128xf32>
    %cst_14 = arith.constant 0.000000e+00 : f32
    %29 = vector.broadcast %cst_14 : f32 to vector<2x128xf32>
    %30 = arith.select %14, %28, %29 : vector<2x128xi1>, vector<2x128xf32>
    %c0_15 = arith.constant 0 : index
    %c0_16 = arith.constant 0 : index
    %31 = vector.load %arg6[%c0_15, %c0_16] : memref<2x128xf32, #tpu.memory_space<vmem>>, vector<2x128xf32>
    tpu.vector_store %arg6[%c0_15, %c0_16], %30 {strides = array<i32>} : memref<2x128xf32, #tpu.memory_space<vmem>>, vector<2x128xf32>,
    return
  }
  func.func @transform_0(%arg0: i32) -> (i32, i32) {
    %c0_i32 = arith.constant 0 : i32
    %c0_i32_0 = arith.constant 0 : i32
    return %arg0, %c0_i32 : i32, i32
  }
  func.func @transform_1(%arg0: i32) -> (i32, i32) {
    %c0_i32 = arith.constant 0 : i32
    %c0_i32_0 = arith.constant 0 : i32
    %c0_i32_1 = arith.constant 0 : i32
    return %c0_i32, %c0_i32_0 : i32, i32
  }
  func.func @transform_2(%arg0: i32) -> (i32, i32) {
    %c0_i32 = arith.constant 0 : i32
    %c0_i32_0 = arith.constant 0 : i32
    %c0_i32_1 = arith.constant 0 : i32
    return %c0_i32, %c0_i32_0 : i32, i32
  }
  func.func @transform_3(%arg0: i32) -> (i32, i32) {
    %c0_i32 = arith.constant 0 : i32
    %c0_i32_0 = arith.constant 0 : i32
    %c0_i32_1 = arith.constant 0 : i32
    return %c0_i32, %c0_i32_0 : i32, i32
  }
  func.func @transform_4(%arg0: i32) -> (i32, i32) {
    %c0_i32 = arith.constant 0 : i32
    %c0_i32_0 = arith.constant 0 : i32
    %c0_i32_1 = arith.constant 0 : i32
    return %c0_i32, %c0_i32_0 : i32, i32
  }
  func.func @transform_5(%arg0: i32) -> (i32, i32) {
    %c0_i32 = arith.constant 0 : i32
    %c0_i32_0 = arith.constant 0 : i32
    return %arg0, %c0_i32 : i32, i32
  }
}

</mosaic_0001>

<bundles_post_ra>
// kernel: tpu_custom_call.1
= control target key start
LH: loop header
LB: loop body
LE: loop exit
PB: predicated region body
PF: predicated region fallthrough
CT: control target
= control target key end

     0   :  { %10 = vsyncpa [#allocation3], 0  ;;  %s8412_s0 = inlined_call_operand.hbm [shape: bf16[2,3456], index: 0, kind: input, shape index: {}]   ;;  %s8413_s1 = inlined_call_operand.hbm [shape: bf16[3456,384], index: 1, kind: input, shape index: {}]   ;;  %s8414_s2 = inlined_call_operand.hbm [shape: f32[1,384], index: 2, kind: input, shape index: {}]   ;;  %s8415_s3 = inlined_call_operand.hbm [shape: f32[384,128], index: 3, kind: input, shape index: {}]   ;;  %s8416_s4 = inlined_call_operand.hbm [shape: f32[1,128], index: 4, kind: input, shape index: {}]   ;;  %s8417_s5 = inlined_call_operand.hbm [shape: f32[2,128], index: 5, kind: output, shape index: {}]  }
   0x1   :  { %11 = vsyncpa [#allocation6], 0 }
   0x2   :  { %12 = vsyncpa [#allocation9], 0 }
   0x3   :  { %13 = vsyncpa [#allocation4], 0  ;;  %s8067_s18 = smov [#allocation5]  }
   0x4   :  { %s29_s19 = sshll.u32 %s8067_s18, 4  ;;  %s30_s19 = int_to_ptr.vmem [resolvable:$true] %s29_s19 }
   0x5   :  { %s7947_s20 = scalar_lea.vmem %s30_s19, 82944  ;;  %p7952_p1 = scmp.lt.s32.totalorder %s30_s19, %s30_s19 }
   0x6   :  { %p7948_p0 = scmp.ne.s32.totalorder %s30_s19, %s7947_s20  ;;  %p7953_p2 = scmp.lt.s32.totalorder %s7947_s20, %s7947_s20 }
   0x8   :  { %p7954_p3 = por %p7953_p2, %p7952_p1 }
   0xa   :  { %p7955_p4 = pnand %p7954_p3, %p7948_p0 }
   0xc   :  { %7958 = shalt.err (!%p7955_p4)
}
   0xd   :  { %s8068_s21 = smov 192   ;;  %s8069_s22 = smov 12  }
   0xe   :  { %35 = dma.hbm_to_vmem [thread:$0]  %s8413_s1, 82944, %s30_s19, [#allocation6], %s8068_s21, %s8068_s21, %s8069_s22  }
   0xf   :  { %s8070_s25 = smov [#allocation8]  }
  0x10   :  { %s51_s26 = sshll.u32 %s8070_s25, 4  ;;  %s52_s26 = int_to_ptr.vmem [resolvable:$true] %s51_s26 }
  0x11   :  { %s7967_s27 = scalar_lea.vmem %s52_s26, 6144  ;;  %p7972_p6 = scmp.lt.s32.totalorder %s52_s26, %s52_s26 }
  0x12   :  { %p7968_p5 = scmp.ne.s32.totalorder %s52_s26, %s7967_s27  ;;  %p7973_p7 = scmp.lt.s32.totalorder %s7967_s27, %s7967_s27 }
  0x14   :  { %p7974_p8 = por %p7973_p7, %p7972_p6 }
  0x16   :  { %p7975_p9 = pnand %p7974_p8, %p7968_p5 }
  0x18   :  { %7978 = shalt.err (!%p7975_p9)
}
  0x19   :  { %s8071_s28 = smov 128   ;;  %s8072_s29 = smov 8  }
  0x1a   :  { %57 = dma.hbm_to_vmem [thread:$0]  %s8415_s3, 6144, %s52_s26, [#allocation9], %s8071_s28, %s8071_s28, %s8072_s29  }
  0x1b   :  { %s8073_s7 = smov [#allocation2]   ;;  %s8074_s9 = smov [#allocation7]  }
  0x1c   :  { %s20_s8 = sshll.u32 %s8073_s7, 4  ;;  %s42_s1 = sshll.u32 %s8074_s9, 4  ;;  %s21_s8 = int_to_ptr.vmem [resolvable:$true] %s20_s8  ;;  %s43_s1 = int_to_ptr.vmem [resolvable:$true] %s42_s1 }
  0x1d   :  { %s7987_s10 = scalar_lea.vmem %s21_s8, 432  ;;  %s7991_s11 = scalar_lea.vmem %s21_s8, 448 }
  0x1e   :  { %p7988_p10 = scmp.ne.s32.totalorder %s21_s8, %s7987_s10  ;;  %p7992_p11 = scmp.lt.s32.totalorder %s21_s8, %s21_s8 }
  0x1f   :  { %p7993_p12 = scmp.lt.s32.totalorder %s7991_s11, %s7987_s10 }
  0x21   :  { %p7994_p13 = por %p7993_p12, %p7992_p11 }
  0x23   :  { %p7995_p0 = pnand %p7994_p13, %p7988_p10 }
  0x25   :  { %7998 = shalt.err (!%p7995_p0)
}
  0x26   :  { %23 = dma.hbm_to_vmem [thread:$0]  %s8412_s0, 432, %s21_s8, [#allocation3]  }
  0x27   :  { %s8007_s14 = scalar_lea.vmem %s43_s1, 48  ;;  %s8011_s3 = scalar_lea.vmem %s43_s1, 64 }
  0x28   :  { %p8008_p1 = scmp.ne.s32.totalorder %s43_s1, %s8007_s14  ;;  %p8012_p2 = scmp.lt.s32.totalorder %s43_s1, %s43_s1 }
  0x29   :  { %p8013_p3 = scmp.lt.s32.totalorder %s8011_s3, %s8007_s14 }
  0x2b   :  { %p8014_p4 = por %p8013_p3, %p8012_p2 }
  0x2d   :  { %p8015_p5 = pnand %p8014_p4, %p8008_p1 }
  0x2f   :  { %8018 = shalt.err (!%p8015_p5)
}
  0x30   :  { %45 = dma.hbm_to_vmem [thread:$0]  %s8414_s2, 48, %s43_s1, [#allocation6]  }
  0x31   :  { %s8075_s17 = smov [#allocation10]  }
  0x32   :  { %s64_s18 = sshll.u32 %s8075_s17, 4  ;;  %s65_s18 = int_to_ptr.vmem [resolvable:$true] %s64_s18 }
  0x33   :  { %s8027_s19 = scalar_lea.vmem %s65_s18, 16  ;;  %s8031_s20 = scalar_lea.vmem %s65_s18, 32 }
  0x34   :  { %p8028_p6 = scmp.ne.s32.totalorder %s65_s18, %s8027_s19  ;;  %p8032_p7 = scmp.lt.s32.totalorder %s65_s18, %s65_s18 }
  0x35   :  { %p8033_p8 = scmp.lt.s32.totalorder %s8031_s20, %s8027_s19 }
  0x37   :  { %p8034_p9 = por %p8033_p8, %p8032_p7 }
  0x39   :  { %p8035_p10 = pnand %p8034_p9, %p8028_p6 }
  0x3b   :  { %8038 = shalt.err (!%p8035_p10)
}
  0x3c   :  { %67 = dma.hbm_to_vmem [thread:$0]  %s8416_s4, 16, %s65_s18, [#allocation9]  }
  0x3d   :  { %8059 = dma.done.wait [#allocation3], 432  }
  0x3e   :  { %8060 = vsyncadd [#allocation3], 4294966864 }
  0x3f   :  { %8061 = dma.done.wait [#allocation6], 82992  }
  0x40   :  { %8062 = vsyncadd [#allocation6], 4294884304 }
  0x41   :  { %8063 = dma.done.wait [#allocation9], 6160  }
  0x42   :  { %8064 = vsyncadd [#allocation9], 4294961136  ;;  %v7061_v0 = vld [vmem:[#allocation5 + $0xac] ss:$12 sps:$4 sm:$0xff]   ;;  %v7065_v2 = vld [vmem:[#allocation5 + $0xa8] ss:$12 sps:$4 sm:$0xff]   ;;  %v954_v36 = vlaneseq }
  0x43   :  { %v7063_v1 = vld [vmem:[#allocation5 + $0x22c] ss:$12 sps:$4 sm:$0xff]   ;;  %4626 = vmatprep.subr.bf16.mxu0 %v7061_v0  ;;  %v7066_v3 = vld [vmem:[#allocation5 + $0x228] ss:$12 sps:$4 sm:$0xff]   ;;  %v7071_v6 = vld [vmem:[#allocation5 + $0x90] ss:$12 sps:$4 sm:$0xff]  }
  0x44   :  { %4667 = vmatprep.subr.bf16.mxu1 %v7063_v1  ;;  %v7067_v4 = vld [vmem:[#allocation5 + $0x94] ss:$12 sps:$4 sm:$0xff]   ;;  %4627 = vmatpush1.bf16.msra.mxu0 %v7065_v2  ;;  %v7072_v7 = vld [vmem:[#allocation5 + $0x210] ss:$12 sps:$4 sm:$0xff]   ;;  %v7077_v10 = vld [vmem:[#allocation5 + $0x78] ss:$12 sps:$4 sm:$0xff]  }
  0x45   :  { %4668 = vmatpush1.bf16.msra.mxu1 %v7066_v3  ;;  %v7069_v5 = vld [vmem:[#allocation5 + $0x214] ss:$12 sps:$4 sm:$0xff]   ;;  %4628 = vmatprep.subr.bf16.mxu0 %v7067_v4  ;;  %v7073_v8 = vld [vmem:[#allocation5 + $0x7c] ss:$12 sps:$4 sm:$0xff]   ;;  %v7078_v11 = vld [vmem:[#allocation5 + $0x1f8] ss:$12 sps:$4 sm:$0xff]  }
  0x46   :  { %4669 = vmatprep.subr.bf16.mxu1 %v7069_v5  ;;  %v7075_v9 = vld [vmem:[#allocation5 + $0x1fc] ss:$12 sps:$4 sm:$0xff]   ;;  %v7079_v12 = vld [vmem:[#allocation5 + $0x64] ss:$12 sps:$4 sm:$0xff]   ;;  %v7083_v14 = vld [vmem:[#allocation5 + $0x60] ss:$12 sps:$4 sm:$0xff]  }
  0x47   :  { %v7081_v13 = vld [vmem:[#allocation5 + $0x1e4] ss:$12 sps:$4 sm:$0xff]   ;;  %v7084_v15 = vld [vmem:[#allocation5 + $0x1e0] ss:$12 sps:$4 sm:$0xff]   ;;  %v7089_v18 = vld [vmem:[#allocation5 + $0x48] ss:$12 sps:$4 sm:$0xff]  }
  0x48   :  { %4629 = vmatpush1.bf16.msra.mxu0 %v7071_v6  ;;  %v7085_v16 = vld [vmem:[#allocation5 + $0x4c] ss:$12 sps:$4 sm:$0xff]   ;;  %v7090_v19 = vld [vmem:[#allocation5 + $0x1c8] ss:$12 sps:$4 sm:$0xff]   ;;  %v7095_v22 = vld [vmem:[#allocation5 + $0x30] ss:$12 sps:$4 sm:$0xff]  }
  0x49   :  { %4670 = vmatpush1.bf16.msra.mxu1 %v7072_v7  ;;  %4630 = vmatprep.subr.bf16.mxu0 %v7073_v8  ;;  %v7087_v17 = vld [vmem:[#allocation5 + $0x1cc] ss:$12 sps:$4 sm:$0xff]   ;;  %v7091_v20 = vld [vmem:[#allocation5 + $0x34] ss:$12 sps:$4 sm:$0xff]   ;;  %v7096_v23 = vld [vmem:[#allocation5 + $0x1b0] ss:$12 sps:$4 sm:$0xff]  }
  0x4a   :  { %4671 = vmatprep.subr.bf16.mxu1 %v7075_v9  ;;  %v7093_v21 = vld [vmem:[#allocation5 + $0x1b4] ss:$12 sps:$4 sm:$0xff]   ;;  %v7097_v24 = vld [vmem:[#allocation5 + $0x1c] ss:$12 sps:$4 sm:$0xff]   ;;  %v7101_v26 = vld [vmem:[#allocation5 + $0x18] ss:$12 sps:$4 sm:$0xff]  }
  0x4b   :  { %v7099_v25 = vld [vmem:[#allocation5 + $0x19c] ss:$12 sps:$4 sm:$0xff]   ;;  %v7102_v27 = vld [vmem:[#allocation5 + $0x198] ss:$12 sps:$4 sm:$0xff]   ;;  %v7107_v30 = vld [vmem:[#allocation5] ss:$12 sps:$4 sm:$0xff]  }
  0x4c   :  { %4631 = vmatpush1.bf16.msra.mxu0 %v7077_v10  ;;  %v7103_v28 = vld [vmem:[#allocation5 + $0x4] ss:$12 sps:$4 sm:$0xff]   ;;  %v7108_v31 = vld [vmem:[#allocation5 + $0x180] ss:$12 sps:$4 sm:$0xff]   ;;  %v7113_v34 = vld [vmem:[#allocation5 + $0x168] ss:$12 sps:$4 sm:$0xff]  }
  0x4d   :  { %4672 = vmatpush1.bf16.msra.mxu1 %v7078_v11  ;;  %4632 = vmatprep.subr.bf16.mxu0 %v7079_v12  ;;  %v7105_v29 = vld [vmem:[#allocation5 + $0x184] ss:$12 sps:$4 sm:$0xff]   ;;  %v7109_v32 = vld [vmem:[#allocation5 + $0x16c] ss:$12 sps:$4 sm:$0xff]   ;;  %v7114_v35 = vld [vmem:[#allocation5 + $0x2e8] ss:$12 sps:$4 sm:$0xff]  }
  0x4e   :  { %4673 = vmatprep.subr.bf16.mxu1 %v7081_v13  ;;  %v7111_v33 = vld [vmem:[#allocation5 + $0x2ec] ss:$12 sps:$4 sm:$0xff]   ;;  %v8076_v37 = vmov 1966171168   ;;  %v7115_v39 = vld [vmem:[#allocation5 + $0x154] ss:$12 sps:$4 sm:$0xff]  }
  0x4f   :  { %v975_v38 = vunpack.c.l.s4 %v8076_v37  ;;  %v7117_v40 = vld [vmem:[#allocation5 + $0x2d4] ss:$12 sps:$4 sm:$0xff]   ;;  %v7119_v41 = vld [vmem:[#allocation5 + $0x150] ss:$12 sps:$4 sm:$0xff]   ;;  %v8127_v42 = vshrl.u32 %v954_v36, 7  ;;  %v84_v52 = vld [vmem:[#allocation2] sm:$0xff] }
  0x50   :  { %4633 = vmatpush1.bf16.msra.mxu0 %v7083_v14  ;;  %v7120_v44 = vld [vmem:[#allocation5 + $0x2d0] ss:$12 sps:$4 sm:$0xff]   ;;  %v7125_v47 = vld [vmem:[#allocation5 + $0x138] ss:$12 sps:$4 sm:$0xff]   ;;  %v7131_v53 = vld [vmem:[#allocation5 + $0x120] ss:$12 sps:$4 sm:$0xff]   ;;  %v973_v1 = vcombine.high %v84_v52, %v84_v52 }
  0x51   :  { %4674 = vmatpush1.bf16.msra.mxu1 %v7084_v15  ;;  %4634 = vmatprep.subr.bf16.mxu0 %v7085_v16  ;;  %v976_v43 = vunpack.c.0.s8 %v975_v38  ;;  %v7121_v45 = vld [vmem:[#allocation5 + $0x13c] ss:$12 sps:$4 sm:$0xff]   ;;  %v7126_v48 = vld [vmem:[#allocation5 + $0x2b8] ss:$12 sps:$4 sm:$0xff]   ;;  %v7132_v55 = vld [vmem:[#allocation5 + $0x2a0] ss:$12 sps:$4 sm:$0xff]  }
  0x52   :  { %4675 = vmatprep.subr.bf16.mxu1 %v7087_v17  ;;  %v7123_v46 = vld [vmem:[#allocation5 + $0x2bc] ss:$12 sps:$4 sm:$0xff]   ;;  %v7127_v50 = vld [vmem:[#allocation5 + $0x124] ss:$12 sps:$4 sm:$0xff]   ;;  %v7133_v56 = vld [vmem:[#allocation5 + $0x10c] ss:$12 sps:$4 sm:$0xff]  }
  0x53   :  { %v8130_v49 = vsub.s32 %v976_v43, %v8127_v42  ;;  %v7129_v51 = vld [vmem:[#allocation5 + $0x2a4] ss:$12 sps:$4 sm:$0xff]   ;;  %v7135_v57 = vld [vmem:[#allocation5 + $0x28c] ss:$12 sps:$4 sm:$0xff]   ;;  %v7137_v59 = vld [vmem:[#allocation5 + $0x108] ss:$12 sps:$4 sm:$0xff]  }
  0x54   :  { %4635 = vmatpush1.bf16.msra.mxu0 %v7089_v18  ;;  %v7138_v61 = vld [vmem:[#allocation5 + $0x288] ss:$12 sps:$4 sm:$0xff]   ;;  %v7143_v2 = vld [vmem:[#allocation5 + $0xf0] ss:$12 sps:$4 sm:$0xff]   ;;  %v7149_v7 = vld [vmem:[#allocation5 + $0xd8] ss:$12 sps:$4 sm:$0xff]  }
  0x55   :  { %4676 = vmatpush1.bf16.msra.mxu1 %v7090_v19  ;;  %4636 = vmatprep.subr.bf16.mxu0 %v7091_v20  ;;  %v980_v54 = vrot.slane %v84_v52, %v8130_v49  ;;  %v7139_v62 = vld [vmem:[#allocation5 + $0xf4] ss:$12 sps:$4 sm:$0xff]   ;;  %v7144_v3 = vld [vmem:[#allocation5 + $0x270] ss:$12 sps:$4 sm:$0xff]   ;;  %v8143_v6 = vrot.slane %v973_v1, %v8130_v49  ;;  %v7150_v8 = vld [vmem:[#allocation5 + $0x258] ss:$12 sps:$4 sm:$0xff]  }
  0x56   :  { %4677 = vmatprep.subr.bf16.mxu1 %v7093_v21  ;;  %v7141_v63 = vld [vmem:[#allocation5 + $0x274] ss:$12 sps:$4 sm:$0xff]   ;;  %v7145_v4 = vld [vmem:[#allocation5 + $0xdc] ss:$12 sps:$4 sm:$0xff]   ;;  %v7151_v9 = vld [vmem:[#allocation5 + $0xc4] ss:$12 sps:$4 sm:$0xff]  }
  0x57   :  { %v988_v58 = vcombine.high %v980_v54, %v980_v54  ;;  %v7147_v5 = vld [vmem:[#allocation5 + $0x25c] ss:$12 sps:$4 sm:$0xff]   ;;  %v7153_v10 = vld [vmem:[#allocation5 + $0x244] ss:$12 sps:$4 sm:$0xff]   ;;  %v989_v11 = vcombine.high %v8143_v6, %v8143_v6  ;;  %v7155_v12 = vld [vmem:[#allocation5 + $0xc0] ss:$12 sps:$4 sm:$0xff]   ;;  %v8148_v13 = vrot.slane %v980_v54, %v8130_v49 }
  0x58   :  { %4637 = vmatpush1.bf16.msra.mxu0 %v7095_v22  ;;  %v7156_v14 = vld [vmem:[#allocation5 + $0x240] ss:$12 sps:$4 sm:$0xff]   ;;  %v7157_v18 = vld [vmem:[#allocation5 + $0x3a8] ss:$12 sps:$4 sm:$0xff]   ;;  %v7190_v43 = vld [vmem:[#allocation5 + $0x4b0] ss:$12 sps:$4 sm:$0xff]  }
  0x59   :  { %4678 = vmatpush1.bf16.msra.mxu1 %v7096_v23  ;;  %4638 = vmatprep.subr.bf16.mxu0 %v7097_v24  ;;  %v8134_v60 = vrot.slane %v988_v58, %v8130_v49  ;;  %v7159_v15 = vld [vmem:[#allocation5 + $0x3ac] ss:$12 sps:$4 sm:$0xff]   ;;  %v8151_v17 = vrot.slane %v989_v11, %v8130_v49  ;;  %v8155_v19 = vcombine.high %v8148_v13, %v8148_v13  ;;  %v7160_v20 = vld [vmem:[#allocation5 + $0x528] ss:$12 sps:$4 sm:$0xff]   ;;  %v7163_v24 = vld [vmem:[#allocation5 + $0x390] ss:$12 sps:$4 sm:$0xff]  }
  0x5a   :  { %4679 = vmatprep.subr.bf16.mxu1 %v7099_v25  ;;  %v7162_v16 = vld [vmem:[#allocation5 + $0x52c] ss:$12 sps:$4 sm:$0xff]   ;;  %v7165_v21 = vld [vmem:[#allocation5 + $0x394] ss:$12 sps:$4 sm:$0xff]   ;;  %v7166_v25 = vld [vmem:[#allocation5 + $0x510] ss:$12 sps:$4 sm:$0xff]  }
  0x5b   :  { %v8138_v0 = vcombine.high %v8134_v60, %v8134_v60  ;;  %4658 = vmatprep.mubr.bf16.mxu0 %v8134_v60  ;;  %v7168_v22 = vld [vmem:[#allocation5 + $0x514] ss:$12 sps:$4 sm:$0xff]   ;;  %v8159_v23 = vcombine.high %v8151_v17, %v8151_v17  ;;  %v7210_v54 = vld [vmem:[#allocation5 + $0x5ec] ss:$12 sps:$4 sm:$0xff]   ;;  %vm8079_vm0 = vmmov 0   ;;  %vm5962_vm2 = vcmask 1041408  }
  0x5c   :  { %4639 = vmatpush1.bf16.msra.mxu0 %v7101_v26  ;;  %v7171_v26 = vld [vmem:[#allocation5 + $0x37c] ss:$12 sps:$4 sm:$0xff]   ;;  %v7202_v52 = vld [vmem:[#allocation5 + $0x480] ss:$12 sps:$4 sm:$0xff]   ;;  %v7217_v1 = vld [vmem:[#allocation5 + $0x438] ss:$12 sps:$4 sm:$0xff]  }
  0x5d   :  { %4680 = vmatpush1.bf16.msra.mxu1 %v7102_v27  ;;  %4640 = vmatprep.subr.bf16.mxu0 %v7103_v28  ;;  %v7174_v27 = vld [vmem:[#allocation5 + $0x4fc] ss:$12 sps:$4 sm:$0xff]   ;;  %v7169_v28 = vld [vmem:[#allocation5 + $0x378] ss:$12 sps:$4 sm:$0xff]   ;;  %v7216_v58 = vld [vmem:[#allocation5 + $0x5d4] ss:$12 sps:$4 sm:$0xff]  }
  0x5e   :  { %4681 = vmatprep.subr.bf16.mxu1 %v7105_v29  ;;  %4699 = vmatprep.mubr.bf16.mxu1 %v8138_v0  ;;  %v7172_v29 = vld [vmem:[#allocation5 + $0x4f8] ss:$12 sps:$4 sm:$0xff]   ;;  %v7181_v37 = vld [vmem:[#allocation5 + $0x348] ss:$12 sps:$4 sm:$0xff]   ;;  %s8080_s2 = smov [#allocation11]  }
  0x5f   :  { %v7184_v38 = vld [vmem:[#allocation5 + $0x4c8] ss:$12 sps:$4 sm:$0xff]   ;;  %s5984_s4 = sshll.u32 %s8080_s2, 4  ;;  %s5985_s4 = int_to_ptr.vmem [resolvable:$true] %s5984_s4 }
  0x60   :  { %4641 = vmatpush1.bf16.msra.mxu0 %v7107_v30  ;;  %v7177_v30 = vld [vmem:[#allocation5 + $0x364] ss:$12 sps:$4 sm:$0xff]   ;;  %v7232_v11 = vld [vmem:[#allocation5 + $0x588] ss:$12 sps:$4 sm:$0xff]   ;;  %s8039_s22 = scalar_lea.vmem %s5985_s4, 32  ;;  %p8044_p12 = scmp.lt.s32.totalorder %s5985_s4, %s5985_s4 }
  0x61   :  { %4682 = vmatpush1.bf16.msra.mxu1 %v7108_v31  ;;  %4642 = vmatprep.subr.bf16.mxu0 %v7109_v32  ;;  %v7180_v31 = vld [vmem:[#allocation5 + $0x4e4] ss:$12 sps:$4 sm:$0xff]   ;;  %v7175_v32 = vld [vmem:[#allocation5 + $0x360] ss:$12 sps:$4 sm:$0xff]   ;;  %p8040_p11 = scmp.ne.s32.totalorder %s5985_s4, %s8039_s22  ;;  %p8045_p13 = scmp.lt.s32.totalorder %s8039_s22, %s8039_s22 }
  0x62   :  { %4683 = vmatprep.subr.bf16.mxu1 %v7111_v33  ;;  %v7178_v33 = vld [vmem:[#allocation5 + $0x4e0] ss:$12 sps:$4 sm:$0xff]  }
  0x63   :  { %p8046_p0 = por %p8045_p13, %p8044_p12 }
  0x64   :  { %4643 = vmatpush2.bf16.msra.mxu0 %v7113_v34  ;;  %v7183_v34 = vld [vmem:[#allocation5 + $0x34c] ss:$12 sps:$4 sm:$0xff]  }
  0x65   :  { %4684 = vmatpush2.bf16.msra.mxu1 %v7114_v35  ;;  %4644 = vmatprep.subr.bf16.mxu0 %v7115_v39  ;;  %v7186_v35 = vld [vmem:[#allocation5 + $0x4cc] ss:$12 sps:$4 sm:$0xff]   ;;  %v7189_v39 = vld [vmem:[#allocation5 + $0x334] ss:$12 sps:$4 sm:$0xff]   ;;  %p8047_p1 = pnand %p8046_p0, %p8040_p11 }
  0x66   :  { %4685 = vmatprep.subr.bf16.mxu1 %v7117_v40  ;;  %v7192_v40 = vld [vmem:[#allocation5 + $0x4b4] ss:$12 sps:$4 sm:$0xff]  }
  0x68   :  { %4645 = vmatpush2.bf16.msra.mxu0 %v7119_v41  ;;  %v7187_v41 = vld [vmem:[#allocation5 + $0x330] ss:$12 sps:$4 sm:$0xff]  }
  0x69   :  { %4686 = vmatpush2.bf16.msra.mxu1 %v7120_v44  ;;  %4646 = vmatprep.subr.bf16.mxu0 %v7121_v45  ;;  %v7195_v44 = vld [vmem:[#allocation5 + $0x31c] ss:$12 sps:$4 sm:$0xff]  }
  0x6a   :  { %4687 = vmatprep.subr.bf16.mxu1 %v7123_v46  ;;  %v7198_v45 = vld [vmem:[#allocation5 + $0x49c] ss:$12 sps:$4 sm:$0xff]   ;;  %v7193_v46 = vld [vmem:[#allocation5 + $0x318] ss:$12 sps:$4 sm:$0xff]  }
  0x6c   :  { %4647 = vmatpush2.bf16.msra.mxu0 %v7125_v47  ;;  %v7196_v47 = vld [vmem:[#allocation5 + $0x498] ss:$12 sps:$4 sm:$0xff]  }
  0x6d   :  { %4688 = vmatpush2.bf16.msra.mxu1 %v7126_v48  ;;  %4648 = vmatprep.subr.bf16.mxu0 %v7127_v50  ;;  %v7201_v48 = vld [vmem:[#allocation5 + $0x304] ss:$12 sps:$4 sm:$0xff]  }
  0x6e   :  { %4689 = vmatprep.subr.bf16.mxu1 %v7129_v51  ;;  %v7204_v50 = vld [vmem:[#allocation5 + $0x484] ss:$12 sps:$4 sm:$0xff]   ;;  %v7199_v51 = vld [vmem:[#allocation5 + $0x300] ss:$12 sps:$4 sm:$0xff]  }
  0x70   :  { %4649 = vmatpush2.bf16.msra.mxu0 %v7131_v53  ;;  %v7207_v53 = vld [vmem:[#allocation5 + $0x46c] ss:$12 sps:$4 sm:$0xff]  }
  0x71   :  { %4690 = vmatpush2.bf16.msra.mxu1 %v7132_v55  ;;  %4650 = vmatprep.subr.bf16.mxu0 %v7133_v56  ;;  %v7205_v55 = vld [vmem:[#allocation5 + $0x468] ss:$12 sps:$4 sm:$0xff]  }
  0x72   :  { %4691 = vmatprep.subr.bf16.mxu1 %v7135_v57  ;;  %v7208_v56 = vld [vmem:[#allocation5 + $0x5e8] ss:$12 sps:$4 sm:$0xff]  }
  0x73   :  { %v7213_v57 = vld [vmem:[#allocation5 + $0x454] ss:$12 sps:$4 sm:$0xff]  }
  0x74   :  { %4651 = vmatpush2.bf16.msra.mxu0 %v7137_v59  ;;  %v7211_v59 = vld [vmem:[#allocation5 + $0x450] ss:$12 sps:$4 sm:$0xff]  }
  0x75   :  { %4692 = vmatpush2.bf16.msra.mxu1 %v7138_v61  ;;  %4652 = vmatprep.subr.bf16.mxu0 %v7139_v62  ;;  %v7214_v61 = vld [vmem:[#allocation5 + $0x5d0] ss:$12 sps:$4 sm:$0xff]  }
  0x76   :  { %4693 = vmatprep.subr.bf16.mxu1 %v7141_v63  ;;  %v7219_v62 = vld [vmem:[#allocation5 + $0x43c] ss:$12 sps:$4 sm:$0xff]  }
  0x77   :  { %v7222_v63 = vld [vmem:[#allocation5 + $0x5bc] ss:$12 sps:$4 sm:$0xff]  }
  0x78   :  { %4653 = vmatpush2.bf16.msra.mxu0 %v7143_v2  ;;  %v7220_v2 = vld [vmem:[#allocation5 + $0x5b8] ss:$12 sps:$4 sm:$0xff]  }
  0x79   :  { %4694 = vmatpush2.bf16.msra.mxu1 %v7144_v3  ;;  %4654 = vmatprep.subr.bf16.mxu0 %v7145_v4  ;;  %v7225_v3 = vld [vmem:[#allocation5 + $0x424] ss:$12 sps:$4 sm:$0xff]  }
  0x7a   :  { %4695 = vmatprep.subr.bf16.mxu1 %v7147_v5  ;;  %v7228_v4 = vld [vmem:[#allocation5 + $0x5a4] ss:$12 sps:$4 sm:$0xff]   ;;  %v7223_v5 = vld [vmem:[#allocation5 + $0x420] ss:$12 sps:$4 sm:$0xff]  }
  0x7c   :  { %4655 = vmatpush2.bf16.msra.mxu0 %v7149_v7  ;;  %v7226_v7 = vld [vmem:[#allocation5 + $0x5a0] ss:$12 sps:$4 sm:$0xff]  }
  0x7d   :  { %4696 = vmatpush2.bf16.msra.mxu1 %v7150_v8  ;;  %4656 = vmatprep.subr.bf16.mxu0 %v7151_v9  ;;  %v7231_v8 = vld [vmem:[#allocation5 + $0x40c] ss:$12 sps:$4 sm:$0xff]  }
  0x7e   :  { %4697 = vmatprep.subr.bf16.mxu1 %v7153_v10  ;;  %v7234_v9 = vld [vmem:[#allocation5 + $0x58c] ss:$12 sps:$4 sm:$0xff]   ;;  %v7229_v10 = vld [vmem:[#allocation5 + $0x408] ss:$12 sps:$4 sm:$0xff]  }
  0x80   :  { %4657 = vmatpush2.bf16.msra.mxu0 %v7155_v12  ;;  %v7237_v12 = vld [vmem:[#allocation5 + $0x3f4] ss:$12 sps:$4 sm:$0xff]  }
  0x81   :  { %4698 = vmatpush2.bf16.msra.mxu1 %v7156_v14  ;;  %4708 = vmatprep.subr.bf16.mxu0 %v7159_v15  ;;  %v7240_v14 = vld [vmem:[#allocation5 + $0x574] ss:$12 sps:$4 sm:$0xff]   ;;  %v7235_v15 = vld [vmem:[#allocation5 + $0x3f0] ss:$12 sps:$4 sm:$0xff]  }
  0x82   :  { %4749 = vmatprep.subr.bf16.mxu1 %v7162_v16  ;;  %v7238_v16 = vld [vmem:[#allocation5 + $0x570] ss:$12 sps:$4 sm:$0xff]  }
  0x83   :  { %4659 = vmatmul.mubr.bf16.vlgmr.msra.gmra.mxu0 %v8148_v13 }
  0x84   :  { %4700 = vmatmul.mubr.bf16.vlgmr.msra.gmra.mxu1 %v8155_v19  ;;  %4709 = vmatpush1.bf16.msra.mxu0 %v7157_v18  ;;  %v7243_v18 = vld [vmem:[#allocation5 + $0x3dc] ss:$12 sps:$4 sm:$0xff]  }
  0x85   :  { %4750 = vmatpush1.bf16.msra.mxu1 %v7160_v20  ;;  %4710 = vmatprep.subr.bf16.mxu0 %v7165_v21  ;;  %v7246_v20 = vld [vmem:[#allocation5 + $0x55c] ss:$12 sps:$4 sm:$0xff]   ;;  %v7241_v21 = vld [vmem:[#allocation5 + $0x3d8] ss:$12 sps:$4 sm:$0xff]  }
  0x86   :  { %4751 = vmatprep.subr.bf16.mxu1 %v7168_v22  ;;  %4740 = vmatprep.mubr.bf16.mxu0 %v8151_v17  ;;  %v7244_v22 = vld [vmem:[#allocation5 + $0x558] ss:$12 sps:$4 sm:$0xff]  }
  0x87   :  { %4781 = vmatprep.mubr.bf16.mxu1 %v8159_v23 }
  0x88   :  { %4711 = vmatpush1.bf16.msra.mxu0 %v7163_v24  ;;  %v7249_v24 = vld [vmem:[#allocation5 + $0x3c4] ss:$12 sps:$4 sm:$0xff]  }
  0x89   :  { %4752 = vmatpush1.bf16.msra.mxu1 %v7166_v25  ;;  %4712 = vmatprep.subr.bf16.mxu0 %v7171_v26  ;;  %v7252_v25 = vld [vmem:[#allocation5 + $0x544] ss:$12 sps:$4 sm:$0xff]   ;;  %v7247_v26 = vld [vmem:[#allocation5 + $0x3c0] ss:$12 sps:$4 sm:$0xff]  }
  0x8a   :  { %4753 = vmatprep.subr.bf16.mxu1 %v7174_v27  ;;  %v8167_v27 = vrot.slane %v8143_v6, %v8130_v49  ;;  %v7262_v6 = vld [vmem:[#allocation5 + $0x694] ss:$12 sps:$4 sm:$0xff]  }
  0x8c   :  { %4713 = vmatpush1.bf16.msra.mxu0 %v7169_v28  ;;  %v7250_v28 = vld [vmem:[#allocation5 + $0x540] ss:$12 sps:$4 sm:$0xff]  }
  0x8d   :  { %4754 = vmatpush1.bf16.msra.mxu1 %v7172_v29  ;;  %4714 = vmatprep.subr.bf16.mxu0 %v7177_v30  ;;  %v7256_v29 = vld [vmem:[#allocation5 + $0x6ac] ss:$12 sps:$4 sm:$0xff]  }
  0x8e   :  { %4755 = vmatprep.subr.bf16.mxu1 %v7180_v31  ;;  %v7259_v30 = vld [vmem:[#allocation5 + $0x82c] ss:$12 sps:$4 sm:$0xff]   ;;  %v7254_v31 = vld [vmem:[#allocation5 + $0x6a8] ss:$12 sps:$4 sm:$0xff]  }
  0x90   :  { %4715 = vmatpush1.bf16.msra.mxu0 %v7175_v32  ;;  %v8171_v32 = vcombine.high %v8167_v27, %v8167_v27 }
  0x91   :  { %4756 = vmatpush1.bf16.msra.mxu1 %v7178_v33  ;;  %4716 = vmatprep.subr.bf16.mxu0 %v7183_v34  ;;  %v7257_v33 = vld [vmem:[#allocation5 + $0x828] ss:$12 sps:$4 sm:$0xff]   ;;  %v8173_v34 = vld [vmem:[#allocation2 + $0x8] sm:$0xff] }
  0x92   :  { %4757 = vmatprep.subr.bf16.mxu1 %v7186_v35  ;;  %v7265_v35 = vld [vmem:[#allocation5 + $0x814] ss:$12 sps:$4 sm:$0xff]  }
  0x94   :  { %4717 = vmatpush1.bf16.msra.mxu0 %v7181_v37  ;;  %v8177_v37 = vrot.slane %v8173_v34, %v8130_v49 }
  0x95   :  { %4758 = vmatpush1.bf16.msra.mxu1 %v7184_v38  ;;  %4718 = vmatprep.subr.bf16.mxu0 %v7189_v39  ;;  %v7260_v39 = vld [vmem:[#allocation5 + $0x690] ss:$12 sps:$4 sm:$0xff]  }
  0x96   :  { %4759 = vmatprep.subr.bf16.mxu1 %v7192_v40  ;;  %v1037_v38 = vcombine.high %v8177_v37, %v8177_v37  ;;  %v7263_v40 = vld [vmem:[#allocation5 + $0x810] ss:$12 sps:$4 sm:$0xff]  }
  0x98   :  { %4719 = vmatpush1.bf16.msra.mxu0 %v7187_v41  ;;  %v7268_v41 = vld [vmem:[#allocation5 + $0x67c] ss:$12 sps:$4 sm:$0xff]  }
  0x99   :  { %4760 = vmatpush1.bf16.msra.mxu1 %v7190_v43  ;;  %4720 = vmatprep.subr.bf16.mxu0 %v7195_v44  ;;  %v7271_v43 = vld [vmem:[#allocation5 + $0x7fc] ss:$12 sps:$4 sm:$0xff]   ;;  %v8184_v44 = vrot.slane %v1037_v38, %v8130_v49  ;;  %v1022_v38 = vcombine.high %v8173_v34, %v8173_v34 }
  0x9a   :  { %4761 = vmatprep.subr.bf16.mxu1 %v7198_v45 }
  0x9b   :  { %v8189_v45 = vcombine.high %v8184_v44, %v8184_v44 }
  0x9c   :  { %4721 = vmatpush1.bf16.msra.mxu0 %v7193_v46  ;;  %v7266_v46 = vld [vmem:[#allocation5 + $0x678] ss:$12 sps:$4 sm:$0xff]  }
  0x9d   :  { %4762 = vmatpush1.bf16.msra.mxu1 %v7196_v47  ;;  %4722 = vmatprep.subr.bf16.mxu0 %v7201_v48  ;;  %v7269_v47 = vld [vmem:[#allocation5 + $0x7f8] ss:$12 sps:$4 sm:$0xff]  }
  0x9e   :  { %4763 = vmatprep.subr.bf16.mxu1 %v7204_v50  ;;  %v7274_v48 = vld [vmem:[#allocation5 + $0x664] ss:$12 sps:$4 sm:$0xff]  }
  0x9f   :  { %v7277_v50 = vld [vmem:[#allocation5 + $0x7e4] ss:$12 sps:$4 sm:$0xff]  }
  0xa0   :  { %4723 = vmatpush1.bf16.msra.mxu0 %v7199_v51  ;;  %v7272_v51 = vld [vmem:[#allocation5 + $0x660] ss:$12 sps:$4 sm:$0xff]  }
  0xa1   :  { %4764 = vmatpush1.bf16.msra.mxu1 %v7202_v52  ;;  %4724 = vmatprep.subr.bf16.mxu0 %v7207_v53  ;;  %v7275_v52 = vld [vmem:[#allocation5 + $0x7e0] ss:$12 sps:$4 sm:$0xff]  }
  0xa2   :  { %4765 = vmatprep.subr.bf16.mxu1 %v7210_v54  ;;  %v7280_v53 = vld [vmem:[#allocation5 + $0x64c] ss:$12 sps:$4 sm:$0xff]  }
  0xa3   :  { %v7283_v54 = vld [vmem:[#allocation5 + $0x7cc] ss:$12 sps:$4 sm:$0xff]  }
  0xa4   :  { %4725 = vmatpush2.bf16.msra.mxu0 %v7205_v55  ;;  %v7278_v55 = vld [vmem:[#allocation5 + $0x648] ss:$12 sps:$4 sm:$0xff]  }
  0xa5   :  { %4766 = vmatpush2.bf16.msra.mxu1 %v7208_v56  ;;  %4726 = vmatprep.subr.bf16.mxu0 %v7213_v57  ;;  %v7281_v56 = vld [vmem:[#allocation5 + $0x7c8] ss:$12 sps:$4 sm:$0xff]  }
  0xa6   :  { %4767 = vmatprep.subr.bf16.mxu1 %v7216_v58  ;;  %v7286_v57 = vld [vmem:[#allocation5 + $0x634] ss:$12 sps:$4 sm:$0xff]  }
  0xa7   :  { %v7289_v58 = vld [vmem:[#allocation5 + $0x7b4] ss:$12 sps:$4 sm:$0xff]  }
  0xa8   :  { %4727 = vmatpush2.bf16.msra.mxu0 %v7211_v59  ;;  %v7284_v59 = vld [vmem:[#allocation5 + $0x630] ss:$12 sps:$4 sm:$0xff]  }
  0xa9   :  { %4768 = vmatpush2.bf16.msra.mxu1 %v7214_v61  ;;  %4728 = vmatprep.subr.bf16.mxu0 %v7219_v62  ;;  %v7287_v61 = vld [vmem:[#allocation5 + $0x7b0] ss:$12 sps:$4 sm:$0xff]  }
  0xaa   :  { %4769 = vmatprep.subr.bf16.mxu1 %v7222_v63  ;;  %v7292_v62 = vld [vmem:[#allocation5 + $0x61c] ss:$12 sps:$4 sm:$0xff]  }
  0xab   :  { %v7295_v63 = vld [vmem:[#allocation5 + $0x79c] ss:$12 sps:$4 sm:$0xff]  }
  0xac   :  { %4729 = vmatpush2.bf16.msra.mxu0 %v7217_v1  ;;  %v7290_v1 = vld [vmem:[#allocation5 + $0x618] ss:$12 sps:$4 sm:$0xff]  }
  0xad   :  { %4770 = vmatpush2.bf16.msra.mxu1 %v7220_v2  ;;  %4730 = vmatprep.subr.bf16.mxu0 %v7225_v3  ;;  %v7293_v2 = vld [vmem:[#allocation5 + $0x798] ss:$12 sps:$4 sm:$0xff]  }
  0xae   :  { %4771 = vmatprep.subr.bf16.mxu1 %v7228_v4  ;;  %v7298_v3 = vld [vmem:[#allocation5 + $0x604] ss:$12 sps:$4 sm:$0xff]  }
  0xaf   :  { %v7301_v4 = vld [vmem:[#allocation5 + $0x784] ss:$12 sps:$4 sm:$0xff]  }
  0xb0   :  { %4731 = vmatpush2.bf16.msra.mxu0 %v7223_v5  ;;  %v7296_v5 = vld [vmem:[#allocation5 + $0x600] ss:$12 sps:$4 sm:$0xff]  }
  0xb1   :  { %4772 = vmatpush2.bf16.msra.mxu1 %v7226_v7  ;;  %4732 = vmatprep.subr.bf16.mxu0 %v7231_v8  ;;  %v7299_v7 = vld [vmem:[#allocation5 + $0x780] ss:$12 sps:$4 sm:$0xff]  }
  0xb2   :  { %4773 = vmatprep.subr.bf16.mxu1 %v7234_v9  ;;  %v7304_v8 = vld [vmem:[#allocation5 + $0x76c] ss:$12 sps:$4 sm:$0xff]  }
  0xb3   :  { %v7307_v9 = vld [vmem:[#allocation5 + $0x8ec] ss:$12 sps:$4 sm:$0xff]  }
  0xb4   :  { %4733 = vmatpush2.bf16.msra.mxu0 %v7229_v10  ;;  %v7302_v10 = vld [vmem:[#allocation5 + $0x768] ss:$12 sps:$4 sm:$0xff]  }
  0xb5   :  { %4774 = vmatpush2.bf16.msra.mxu1 %v7232_v11  ;;  %4734 = vmatprep.subr.bf16.mxu0 %v7237_v12  ;;  %v7305_v11 = vld [vmem:[#allocation5 + $0x8e8] ss:$12 sps:$4 sm:$0xff]  }
  0xb6   :  { %4775 = vmatprep.subr.bf16.mxu1 %v7240_v14  ;;  %v7310_v12 = vld [vmem:[#allocation5 + $0x754] ss:$12 sps:$4 sm:$0xff]  }
  0xb7   :  { %v7313_v14 = vld [vmem:[#allocation5 + $0x8d4] ss:$12 sps:$4 sm:$0xff]  }
  0xb8   :  { %4735 = vmatpush2.bf16.msra.mxu0 %v7235_v15  ;;  %v7308_v15 = vld [vmem:[#allocation5 + $0x750] ss:$12 sps:$4 sm:$0xff]  }
  0xb9   :  { %4776 = vmatpush2.bf16.msra.mxu1 %v7238_v16  ;;  %4736 = vmatprep.subr.bf16.mxu0 %v7243_v18  ;;  %v7311_v16 = vld [vmem:[#allocation5 + $0x8d0] ss:$12 sps:$4 sm:$0xff]  }
  0xba   :  { %4777 = vmatprep.subr.bf16.mxu1 %v7246_v20  ;;  %v7316_v18 = vld [vmem:[#allocation5 + $0x73c] ss:$12 sps:$4 sm:$0xff]  }
  0xbb   :  { %v7319_v20 = vld [vmem:[#allocation5 + $0x8bc] ss:$12 sps:$4 sm:$0xff]  }
  0xbc   :  { %4737 = vmatpush2.bf16.msra.mxu0 %v7241_v21  ;;  %v7314_v21 = vld [vmem:[#allocation5 + $0x738] ss:$12 sps:$4 sm:$0xff]  }
  0xbd   :  { %4778 = vmatpush2.bf16.msra.mxu1 %v7244_v22  ;;  %4738 = vmatprep.subr.bf16.mxu0 %v7249_v24  ;;  %v7317_v22 = vld [vmem:[#allocation5 + $0x8b8] ss:$12 sps:$4 sm:$0xff]  }
  0xbe   :  { %4779 = vmatprep.subr.bf16.mxu1 %v7252_v25  ;;  %v7322_v24 = vld [vmem:[#allocation5 + $0x724] ss:$12 sps:$4 sm:$0xff]  }
  0xbf   :  { %v7325_v25 = vld [vmem:[#allocation5 + $0x8a4] ss:$12 sps:$4 sm:$0xff]  }
  0xc0   :  { %4739 = vmatpush2.bf16.msra.mxu0 %v7247_v26  ;;  %v7320_v26 = vld [vmem:[#allocation5 + $0x720] ss:$12 sps:$4 sm:$0xff]  }
  0xc1   :  { %4780 = vmatpush2.bf16.msra.mxu1 %v7250_v28  ;;  %4790 = vmatprep.subr.bf16.mxu0 %v7256_v29  ;;  %v7323_v28 = vld [vmem:[#allocation5 + $0x8a0] ss:$12 sps:$4 sm:$0xff]  }
  0xc2   :  { %4831 = vmatprep.subr.bf16.mxu1 %v7259_v30  ;;  %v7328_v29 = vld [vmem:[#allocation5 + $0x70c] ss:$12 sps:$4 sm:$0xff]  }
  0xc3   :  { %4741 = vmatmul.mubr.bf16.vlgmr.msra.gmra.mxu0 %v8167_v27  ;;  %v7331_v30 = vld [vmem:[#allocation5 + $0x88c] ss:$12 sps:$4 sm:$0xff]  }
  0xc4   :  { %4782 = vmatmul.mubr.bf16.vlgmr.msra.gmra.mxu1 %v8171_v32  ;;  %4791 = vmatpush1.bf16.msra.mxu0 %v7254_v31  ;;  %v7326_v31 = vld [vmem:[#allocation5 + $0x708] ss:$12 sps:$4 sm:$0xff]  }
  0xc5   :  { %4832 = vmatpush1.bf16.msra.mxu1 %v7257_v33  ;;  %4792 = vmatprep.subr.bf16.mxu0 %v7262_v6  ;;  %v7329_v33 = vld [vmem:[#allocation5 + $0x888] ss:$12 sps:$4 sm:$0xff]  }
  0xc6   :  { %4833 = vmatprep.subr.bf16.mxu1 %v7265_v35  ;;  %4822 = vmatprep.mubr.bf16.mxu0 %v8184_v44  ;;  %v7334_v6 = vld [vmem:[#allocation5 + $0x6f4] ss:$12 sps:$4 sm:$0xff]  }
  0xc7   :  { %4863 = vmatprep.mubr.bf16.mxu1 %v8189_v45  ;;  %v7337_v35 = vld [vmem:[#allocation5 + $0x874] ss:$12 sps:$4 sm:$0xff]  }
  0xc8   :  { %4793 = vmatpush1.bf16.msra.mxu0 %v7260_v39  ;;  %v7332_v39 = vld [vmem:[#allocation5 + $0x6f0] ss:$12 sps:$4 sm:$0xff]  }
  0xc9   :  { %4834 = vmatpush1.bf16.msra.mxu1 %v7263_v40  ;;  %4794 = vmatprep.subr.bf16.mxu0 %v7268_v41  ;;  %v7335_v40 = vld [vmem:[#allocation5 + $0x870] ss:$12 sps:$4 sm:$0xff]  }
  0xca   :  { %4835 = vmatprep.subr.bf16.mxu1 %v7271_v43  ;;  %v7340_v41 = vld [vmem:[#allocation5 + $0x6dc] ss:$12 sps:$4 sm:$0xff]  }
  0xcb   :  { %v7343_v43 = vld [vmem:[#allocation5 + $0x85c] ss:$12 sps:$4 sm:$0xff]  }
  0xcc   :  { %4795 = vmatpush1.bf16.msra.mxu0 %v7266_v46  ;;  %v8195_v46 = vrot.slane %v1022_v38, %v8130_v49  ;;  %v7398_v38 = vld [vmem:[#allocation5 + $0xa68] ss:$12 sps:$4 sm:$0xff]  }
  0xcd   :  { %4836 = vmatpush1.bf16.msra.mxu1 %v7269_v47  ;;  %4796 = vmatprep.subr.bf16.mxu0 %v7274_v48  ;;  %v7338_v47 = vld [vmem:[#allocation5 + $0x6d8] ss:$12 sps:$4 sm:$0xff]  }
  0xce   :  { %4837 = vmatprep.subr.bf16.mxu1 %v7277_v50  ;;  %v7341_v48 = vld [vmem:[#allocation5 + $0x858] ss:$12 sps:$4 sm:$0xff]   ;;  %v1038_v34 = vcombine.high %v8195_v46, %v8195_v46 }
  0xcf   :  { %v7346_v50 = vld [vmem:[#allocation5 + $0x6c4] ss:$12 sps:$4 sm:$0xff]  }
  0xd0   :  { %4797 = vmatpush1.bf16.msra.mxu0 %v7272_v51  ;;  %v7349_v51 = vld [vmem:[#allocation5 + $0x844] ss:$12 sps:$4 sm:$0xff]  }
  0xd1   :  { %4838 = vmatpush1.bf16.msra.mxu1 %v7275_v52  ;;  %4798 = vmatprep.subr.bf16.mxu0 %v7280_v53  ;;  %v7344_v52 = vld [vmem:[#allocation5 + $0x6c0] ss:$12 sps:$4 sm:$0xff]   ;;  %v8201_v53 = vrot.slane %v8177_v37, %v8130_v49 }
  0xd2   :  { %4839 = vmatprep.subr.bf16.mxu1 %v7283_v54  ;;  %v7347_v54 = vld [vmem:[#allocation5 + $0x840] ss:$12 sps:$4 sm:$0xff]  }
  0xd3   :  { %v7358_v37 = vld [vmem:[#allocation5 + $0x994] ss:$12 sps:$4 sm:$0xff]  }
  0xd4   :  { %4799 = vmatpush1.bf16.msra.mxu0 %v7278_v55  ;;  %v7352_v55 = vld [vmem:[#allocation5 + $0x9ac] ss:$12 sps:$4 sm:$0xff]  }
  0xd5   :  { %4840 = vmatpush1.bf16.msra.mxu1 %v7281_v56  ;;  %4800 = vmatprep.subr.bf16.mxu0 %v7286_v57  ;;  %v7355_v56 = vld [vmem:[#allocation5 + $0xb2c] ss:$12 sps:$4 sm:$0xff]   ;;  %v8204_v57 = vrot.slane %v1038_v34, %v8130_v49 }
  0xd6   :  { %4841 = vmatprep.subr.bf16.mxu1 %v7289_v58  ;;  %v7350_v58 = vld [vmem:[#allocation5 + $0x9a8] ss:$12 sps:$4 sm:$0xff]   ;;  %v7413_v34 = vld [vmem:[#allocation5 + $0xbb8] ss:$12 sps:$4 sm:$0xff]  }
  0xd8   :  { %4801 = vmatpush1.bf16.msra.mxu0 %v7284_v59  ;;  %v8208_v59 = vcombine.high %v8201_v53, %v8201_v53 }
  0xd9   :  { %4842 = vmatpush1.bf16.msra.mxu1 %v7287_v61  ;;  %4802 = vmatprep.subr.bf16.mxu0 %v7292_v62  ;;  %v7353_v61 = vld [vmem:[#allocation5 + $0xb28] ss:$12 sps:$4 sm:$0xff]  }
  0xda   :  { %4843 = vmatprep.subr.bf16.mxu1 %v7295_v63  ;;  %v7361_v62 = vld [vmem:[#allocation5 + $0xb14] ss:$12 sps:$4 sm:$0xff]   ;;  %v8212_v63 = vcombine.high %v8204_v57, %v8204_v57 }
  0xdc   :  { %4803 = vmatpush1.bf16.msra.mxu0 %v7290_v1  ;;  %v7356_v1 = vld [vmem:[#allocation5 + $0x990] ss:$12 sps:$4 sm:$0xff]  }
  0xdd   :  { %4844 = vmatpush1.bf16.msra.mxu1 %v7293_v2  ;;  %4804 = vmatprep.subr.bf16.mxu0 %v7298_v3  ;;  %v7359_v2 = vld [vmem:[#allocation5 + $0xb10] ss:$12 sps:$4 sm:$0xff]  }
  0xde   :  { %4845 = vmatprep.subr.bf16.mxu1 %v7301_v4  ;;  %v7364_v3 = vld [vmem:[#allocation5 + $0x97c] ss:$12 sps:$4 sm:$0xff]  }
  0xdf   :  { %v7367_v4 = vld [vmem:[#allocation5 + $0xafc] ss:$12 sps:$4 sm:$0xff]  }
  0xe0   :  { %4805 = vmatpush1.bf16.msra.mxu0 %v7296_v5  ;;  %v7362_v5 = vld [vmem:[#allocation5 + $0x978] ss:$12 sps:$4 sm:$0xff]  }
  0xe1   :  { %4846 = vmatpush1.bf16.msra.mxu1 %v7299_v7  ;;  %4806 = vmatprep.subr.bf16.mxu0 %v7304_v8  ;;  %v7365_v7 = vld [vmem:[#allocation5 + $0xaf8] ss:$12 sps:$4 sm:$0xff]  }
  0xe2   :  { %4847 = vmatprep.subr.bf16.mxu1 %v7307_v9  ;;  %v7370_v8 = vld [vmem:[#allocation5 + $0x964] ss:$12 sps:$4 sm:$0xff]  }
  0xe3   :  { %v7373_v9 = vld [vmem:[#allocation5 + $0xae4] ss:$12 sps:$4 sm:$0xff]  }
  0xe4   :  { %4807 = vmatpush2.bf16.msra.mxu0 %v7302_v10  ;;  %v7368_v10 = vld [vmem:[#allocation5 + $0x960] ss:$12 sps:$4 sm:$0xff]  }
  0xe5   :  { %4848 = vmatpush2.bf16.msra.mxu1 %v7305_v11  ;;  %4808 = vmatprep.subr.bf16.mxu0 %v7310_v12  ;;  %v7371_v11 = vld [vmem:[#allocation5 + $0xae0] ss:$12 sps:$4 sm:$0xff]  }
  0xe6   :  { %4849 = vmatprep.subr.bf16.mxu1 %v7313_v14  ;;  %v7376_v12 = vld [vmem:[#allocation5 + $0x94c] ss:$12 sps:$4 sm:$0xff]  }
  0xe7   :  { %v7379_v14 = vld [vmem:[#allocation5 + $0xacc] ss:$12 sps:$4 sm:$0xff]  }
  0xe8   :  { %4809 = vmatpush2.bf16.msra.mxu0 %v7308_v15  ;;  %v7374_v15 = vld [vmem:[#allocation5 + $0x948] ss:$12 sps:$4 sm:$0xff]  }
  0xe9   :  { %4850 = vmatpush2.bf16.msra.mxu1 %v7311_v16  ;;  %4810 = vmatprep.subr.bf16.mxu0 %v7316_v18  ;;  %v7377_v16 = vld [vmem:[#allocation5 + $0xac8] ss:$12 sps:$4 sm:$0xff]  }
  0xea   :  { %4851 = vmatprep.subr.bf16.mxu1 %v7319_v20  ;;  %v7382_v18 = vld [vmem:[#allocation5 + $0x934] ss:$12 sps:$4 sm:$0xff]  }
  0xeb   :  { %v7385_v20 = vld [vmem:[#allocation5 + $0xab4] ss:$12 sps:$4 sm:$0xff]  }
  0xec   :  { %4811 = vmatpush2.bf16.msra.mxu0 %v7314_v21  ;;  %v7380_v21 = vld [vmem:[#allocation5 + $0x930] ss:$12 sps:$4 sm:$0xff]  }
  0xed   :  { %4852 = vmatpush2.bf16.msra.mxu1 %v7317_v22  ;;  %4812 = vmatprep.subr.bf16.mxu0 %v7322_v24  ;;  %v7383_v22 = vld [vmem:[#allocation5 + $0xab0] ss:$12 sps:$4 sm:$0xff]  }
  0xee   :  { %4853 = vmatprep.subr.bf16.mxu1 %v7325_v25  ;;  %v7388_v24 = vld [vmem:[#allocation5 + $0x91c] ss:$12 sps:$4 sm:$0xff]  }
  0xef   :  { %v7391_v25 = vld [vmem:[#allocation5 + $0xa9c] ss:$12 sps:$4 sm:$0xff]  }
  0xf0   :  { %4813 = vmatpush2.bf16.msra.mxu0 %v7320_v26  ;;  %v7386_v26 = vld [vmem:[#allocation5 + $0x918] ss:$12 sps:$4 sm:$0xff]  }
  0xf1   :  { %4854 = vmatpush2.bf16.msra.mxu1 %v7323_v28  ;;  %4814 = vmatprep.subr.bf16.mxu0 %v7328_v29  ;;  %v7389_v28 = vld [vmem:[#allocation5 + $0xa98] ss:$12 sps:$4 sm:$0xff]  }
  0xf2   :  { %4855 = vmatprep.subr.bf16.mxu1 %v7331_v30  ;;  %v7394_v29 = vld [vmem:[#allocation5 + $0x904] ss:$12 sps:$4 sm:$0xff]  }
  0xf3   :  { %v7397_v30 = vld [vmem:[#allocation5 + $0xa84] ss:$12 sps:$4 sm:$0xff]  }
  0xf4   :  { %4815 = vmatpush2.bf16.msra.mxu0 %v7326_v31  ;;  %v7392_v31 = vld [vmem:[#allocation5 + $0x900] ss:$12 sps:$4 sm:$0xff]  }
  0xf5   :  { %4856 = vmatpush2.bf16.msra.mxu1 %v7329_v33  ;;  %4816 = vmatprep.subr.bf16.mxu0 %v7334_v6  ;;  %v7395_v33 = vld [vmem:[#allocation5 + $0xa80] ss:$12 sps:$4 sm:$0xff]  }
  0xf6   :  { %4857 = vmatprep.subr.bf16.mxu1 %v7337_v35  ;;  %v7400_v6 = vld [vmem:[#allocation5 + $0xa6c] ss:$12 sps:$4 sm:$0xff]  }
  0xf7   :  { %v7403_v35 = vld [vmem:[#allocation5 + $0xbec] ss:$12 sps:$4 sm:$0xff]  }
  0xf8   :  { %4817 = vmatpush2.bf16.msra.mxu0 %v7332_v39  ;;  %v7401_v39 = vld [vmem:[#allocation5 + $0xbe8] ss:$12 sps:$4 sm:$0xff]  }
  0xf9   :  { %4858 = vmatpush2.bf16.msra.mxu1 %v7335_v40  ;;  %4818 = vmatprep.subr.bf16.mxu0 %v7340_v41  ;;  %v7406_v40 = vld [vmem:[#allocation5 + $0xa54] ss:$12 sps:$4 sm:$0xff]  }
  0xfa   :  { %4859 = vmatprep.subr.bf16.mxu1 %v7343_v43  ;;  %v7409_v41 = vld [vmem:[#allocation5 + $0xbd4] ss:$12 sps:$4 sm:$0xff]   ;;  %v7404_v43 = vld [vmem:[#allocation5 + $0xa50] ss:$12 sps:$4 sm:$0xff]  }
  0xfc   :  { %4819 = vmatpush2.bf16.msra.mxu0 %v7338_v47  ;;  %v7407_v47 = vld [vmem:[#allocation5 + $0xbd0] ss:$12 sps:$4 sm:$0xff]  }
  0xfd   :  { %4860 = vmatpush2.bf16.msra.mxu1 %v7341_v48  ;;  %4820 = vmatprep.subr.bf16.mxu0 %v7346_v50  ;;  %v7412_v48 = vld [vmem:[#allocation5 + $0xa3c] ss:$12 sps:$4 sm:$0xff]  }
  0xfe   :  { %4861 = vmatprep.subr.bf16.mxu1 %v7349_v51  ;;  %v7415_v50 = vld [vmem:[#allocation5 + $0xbbc] ss:$12 sps:$4 sm:$0xff]   ;;  %v7410_v51 = vld [vmem:[#allocation5 + $0xa38] ss:$12 sps:$4 sm:$0xff]  }
 0x100   :  { %4821 = vmatpush2.bf16.msra.mxu0 %v7344_v52  ;;  %v7418_v52 = vld [vmem:[#allocation5 + $0xa24] ss:$12 sps:$4 sm:$0xff]  }
 0x101   :  { %4862 = vmatpush2.bf16.msra.mxu1 %v7347_v54  ;;  %4872 = vmatprep.subr.bf16.mxu0 %v7352_v55  ;;  %v7421_v54 = vld [vmem:[#allocation5 + $0xba4] ss:$12 sps:$4 sm:$0xff]   ;;  %v7416_v55 = vld [vmem:[#allocation5 + $0xa20] ss:$12 sps:$4 sm:$0xff]  }
 0x102   :  { %4913 = vmatprep.subr.bf16.mxu1 %v7355_v56  ;;  %v7419_v56 = vld [vmem:[#allocation5 + $0xba0] ss:$12 sps:$4 sm:$0xff]  }
 0x103   :  { %4823 = vmatmul.mubr.bf16.vlgmr.msra.gmra.mxu0 %v8201_v53 }
 0x104   :  { %4864 = vmatmul.mubr.bf16.vlgmr.msra.gmra.mxu1 %v8208_v59  ;;  %4873 = vmatpush1.bf16.msra.mxu0 %v7350_v58  ;;  %v7424_v58 = vld [vmem:[#allocation5 + $0xa0c] ss:$12 sps:$4 sm:$0xff]  }
 0x105   :  { %4914 = vmatpush1.bf16.msra.mxu1 %v7353_v61  ;;  %4874 = vmatprep.subr.bf16.mxu0 %v7358_v37  ;;  %v7427_v61 = vld [vmem:[#allocation5 + $0xb8c] ss:$12 sps:$4 sm:$0xff]   ;;  %v7422_v37 = vld [vmem:[#allocation5 + $0xa08] ss:$12 sps:$4 sm:$0xff]  }
 0x106   :  { %4915 = vmatprep.subr.bf16.mxu1 %v7361_v62  ;;  %4904 = vmatprep.mubr.bf16.mxu0 %v8204_v57  ;;  %v7425_v62 = vld [vmem:[#allocation5 + $0xb88] ss:$12 sps:$4 sm:$0xff]  }
 0x107   :  { %4945 = vmatprep.mubr.bf16.mxu1 %v8212_v63 }
 0x108   :  { %4875 = vmatpush1.bf16.msra.mxu0 %v7356_v1  ;;  %v7430_v1 = vld [vmem:[#allocation5 + $0x9f4] ss:$12 sps:$4 sm:$0xff]  }
 0x109   :  { %4916 = vmatpush1.bf16.msra.mxu1 %v7359_v2  ;;  %4876 = vmatprep.subr.bf16.mxu0 %v7364_v3  ;;  %v7433_v2 = vld [vmem:[#allocation5 + $0xb74] ss:$12 sps:$4 sm:$0xff]   ;;  %v7428_v3 = vld [vmem:[#allocation5 + $0x9f0] ss:$12 sps:$4 sm:$0xff]  }
 0x10a   :  { %4917 = vmatprep.subr.bf16.mxu1 %v7367_v4  ;;  %v7431_v4 = vld [vmem:[#allocation5 + $0xb70] ss:$12 sps:$4 sm:$0xff]  }
 0x10c   :  { %4877 = vmatpush1.bf16.msra.mxu0 %v7362_v5  ;;  %v8218_v5 = vld [vmem:[#allocation2 + $0x10] sm:$0xff] }
 0x10d   :  { %4918 = vmatpush1.bf16.msra.mxu1 %v7365_v7  ;;  %4878 = vmatprep.subr.bf16.mxu0 %v7370_v8  ;;  %v7436_v7 = vld [vmem:[#allocation5 + $0x9dc] ss:$12 sps:$4 sm:$0xff]  }
 0x10e   :  { %4919 = vmatprep.subr.bf16.mxu1 %v7373_v9  ;;  %v7439_v8 = vld [vmem:[#allocation5 + $0xb5c] ss:$12 sps:$4 sm:$0xff]   ;;  %v8222_v9 = vrot.slane %v8218_v5, %v8130_v49 }
 0x110   :  { %4879 = vmatpush1.bf16.msra.mxu0 %v7368_v10  ;;  %v7434_v10 = vld [vmem:[#allocation5 + $0x9d8] ss:$12 sps:$4 sm:$0xff]  }
 0x111   :  { %4920 = vmatpush1.bf16.msra.mxu1 %v7371_v11  ;;  %4880 = vmatprep.subr.bf16.mxu0 %v7376_v12  ;;  %v7437_v11 = vld [vmem:[#allocation5 + $0xb58] ss:$12 sps:$4 sm:$0xff]  }
 0x112   :  { %4921 = vmatprep.subr.bf16.mxu1 %v7379_v14  ;;  %v7442_v12 = vld [vmem:[#allocation5 + $0x9c4] ss:$12 sps:$4 sm:$0xff]  }
 0x113   :  { %v7445_v14 = vld [vmem:[#allocation5 + $0xb44] ss:$12 sps:$4 sm:$0xff]  }
 0x114   :  { %4881 = vmatpush1.bf16.msra.mxu0 %v7374_v15  ;;  %v7440_v15 = vld [vmem:[#allocation5 + $0x9c0] ss:$12 sps:$4 sm:$0xff]  }
 0x115   :  { %4922 = vmatpush1.bf16.msra.mxu1 %v7377_v16  ;;  %4882 = vmatprep.subr.bf16.mxu0 %v7382_v18  ;;  %v1086_v16 = vcombine.high %v8222_v9, %v8222_v9  ;;  %v7443_v18 = vld [vmem:[#allocation5 + $0xb40] ss:$12 sps:$4 sm:$0xff]  }
 0x116   :  { %4923 = vmatprep.subr.bf16.mxu1 %v7385_v20  ;;  %v952_v20 = vld [vmem:[#allocation7] sm:$0x7] }
 0x118   :  { %4883 = vmatpush1.bf16.msra.mxu0 %v7380_v21  ;;  %v8228_v21 = vrot.slane %v8195_v46, %v8130_v49 }
 0x119   :  { %4924 = vmatpush1.bf16.msra.mxu1 %v7383_v22  ;;  %4884 = vmatprep.subr.bf16.mxu0 %v7388_v24  ;;  %v956_v22 = vsub.s32 0, %v8127_v42  ;;  %v7449_v24 = vld [vmem:[#allocation5 + $0xcac] ss:$12 sps:$4 sm:$0xff]  }
 0x11a   :  { %4925 = vmatprep.subr.bf16.mxu1 %v7391_v25  ;;  %v7452_v25 = vld [vmem:[#allocation5 + $0xe2c] ss:$12 sps:$4 sm:$0xff]  }
 0x11b   :  { %v957_v46 = vrot.slane %v952_v20, %v956_v22  ;;  %v7488_v22 = vld [vmem:[#allocation5 + $0xd9c] ss:$12 sps:$4 sm:$0xff]  }
 0x11c   :  { %4885 = vmatpush1.bf16.msra.mxu0 %v7386_v26  ;;  %v960_v26 = vsub.s32 1, %v8127_v42 }
 0x11d   :  { %4926 = vmatpush1.bf16.msra.mxu1 %v7389_v28  ;;  %4886 = vmatprep.subr.bf16.mxu0 %v7394_v29  ;;  %v8233_v28 = vrot.slane %v1086_v16, %v8130_v49  ;;  %v7447_v29 = vld [vmem:[#allocation5 + $0xca8] ss:$12 sps:$4 sm:$0xff]   ;;  %v7477_v16 = vld [vmem:[#allocation5 + $0xc30] ss:$12 sps:$4 sm:$0xff]  }
 0x11e   :  { %4927 = vmatprep.subr.bf16.mxu1 %v7397_v30  ;;  %v7450_v30 = vld [vmem:[#allocation5 + $0xe28] ss:$12 sps:$4 sm:$0xff]  }
 0x120   :  { %4887 = vmatpush1.bf16.msra.mxu0 %v7392_v31  ;;  %v8237_v31 = vcombine.high %v8228_v21, %v8228_v21 }
 0x121   :  { %4928 = vmatpush1.bf16.msra.mxu1 %v7395_v33  ;;  %4888 = vmatprep.subr.bf16.mxu0 %v7400_v6  ;;  %v7455_v33 = vld [vmem:[#allocation5 + $0xc94] ss:$12 sps:$4 sm:$0xff]  }
 0x122   :  { %4929 = vmatprep.subr.bf16.mxu1 %v7403_v35  ;;  %v7458_v6 = vld [vmem:[#allocation5 + $0xe14] ss:$12 sps:$4 sm:$0xff]   ;;  %v961_v35 = vrot.slane %v952_v20, %v960_v26  ;;  %v7485_v20 = vld [vmem:[#allocation5 + $0xc1c] ss:$12 sps:$4 sm:$0xff]   ;;  %v7491_v26 = vld [vmem:[#allocation5 + $0xc04] ss:$12 sps:$4 sm:$0xff]  }
 0x124   :  { %4889 = vmatpush2.bf16.msra.mxu0 %v7398_v38  ;;  %v8241_v38 = vcombine.high %v8233_v28, %v8233_v28 }
 0x125   :  { %4930 = vmatpush2.bf16.msra.mxu1 %v7401_v39  ;;  %4890 = vmatprep.subr.bf16.mxu0 %v7406_v40 }
 0x126   :  { %4931 = vmatprep.subr.bf16.mxu1 %v7409_v41  ;;  %v7453_v41 = vld [vmem:[#allocation5 + $0xc90] ss:$12 sps:$4 sm:$0xff]  }
 0x128   :  { %4891 = vmatpush2.bf16.msra.mxu0 %v7404_v43  ;;  %v7456_v43 = vld [vmem:[#allocation5 + $0xe10] ss:$12 sps:$4 sm:$0xff]  }
 0x129   :  { %4932 = vmatpush2.bf16.msra.mxu1 %v7407_v47  ;;  %4892 = vmatprep.subr.bf16.mxu0 %v7412_v48 }
 0x12a   :  { %4933 = vmatprep.subr.bf16.mxu1 %v7415_v50 }
 0x12c   :  { %4893 = vmatpush2.bf16.msra.mxu0 %v7410_v51  ;;  %v7461_v51 = vld [vmem:[#allocation5 + $0xc7c] ss:$12 sps:$4 sm:$0xff]  }
 0x12d   :  { %4934 = vmatpush2.bf16.msra.mxu1 %v7413_v34  ;;  %4894 = vmatprep.subr.bf16.mxu0 %v7418_v52  ;;  %v7464_v34 = vld [vmem:[#allocation5 + $0xdfc] ss:$12 sps:$4 sm:$0xff]  }
 0x12e   :  { %4935 = vmatprep.subr.bf16.mxu1 %v7421_v54 }
 0x130   :  { %4895 = vmatpush2.bf16.msra.mxu0 %v7416_v55  ;;  %v7459_v55 = vld [vmem:[#allocation5 + $0xc78] ss:$12 sps:$4 sm:$0xff]  }
 0x131   :  { %4936 = vmatpush2.bf16.msra.mxu1 %v7419_v56  ;;  %4896 = vmatprep.subr.bf16.mxu0 %v7424_v58  ;;  %v7462_v56 = vld [vmem:[#allocation5 + $0xdf8] ss:$12 sps:$4 sm:$0xff]  }
 0x132   :  { %4937 = vmatprep.subr.bf16.mxu1 %v7427_v61 }
 0x134   :  { %4897 = vmatpush2.bf16.msra.mxu0 %v7422_v37 }
 0x135   :  { %4938 = vmatpush2.bf16.msra.mxu1 %v7425_v62  ;;  %4898 = vmatprep.subr.bf16.mxu0 %v7430_v1  ;;  %v7467_v1 = vld [vmem:[#allocation5 + $0xc64] ss:$12 sps:$4 sm:$0xff]  }
 0x136   :  { %4939 = vmatprep.subr.bf16.mxu1 %v7433_v2  ;;  %v7470_v2 = vld [vmem:[#allocation5 + $0xde4] ss:$12 sps:$4 sm:$0xff]  }
 0x138   :  { %4899 = vmatpush2.bf16.msra.mxu0 %v7428_v3 }
 0x139   :  { %4940 = vmatpush2.bf16.msra.mxu1 %v7431_v4  ;;  %4900 = vmatprep.subr.bf16.mxu0 %v7436_v7  ;;  %v7465_v4 = vld [vmem:[#allocation5 + $0xc60] ss:$12 sps:$4 sm:$0xff]  }
 0x13a   :  { %4941 = vmatprep.subr.bf16.mxu1 %v7439_v8  ;;  %v7468_v7 = vld [vmem:[#allocation5 + $0xde0] ss:$12 sps:$4 sm:$0xff]  }
 0x13b   :  { %v7473_v8 = vld [vmem:[#allocation5 + $0xc4c] ss:$12 sps:$4 sm:$0xff]  }
 0x13c   :  { %4901 = vmatpush2.bf16.msra.mxu0 %v7434_v10  ;;  %v7476_v10 = vld [vmem:[#allocation5 + $0xdcc] ss:$12 sps:$4 sm:$0xff]  }
 0x13d   :  { %4942 = vmatpush2.bf16.msra.mxu1 %v7437_v11  ;;  %4902 = vmatprep.subr.bf16.mxu0 %v7442_v12  ;;  %v7471_v11 = vld [vmem:[#allocation5 + $0xc48] ss:$12 sps:$4 sm:$0xff]  }
 0x13e   :  { %4943 = vmatprep.subr.bf16.mxu1 %v7445_v14  ;;  %v7474_v12 = vld [vmem:[#allocation5 + $0xdc8] ss:$12 sps:$4 sm:$0xff]  }
 0x13f   :  { %v7479_v14 = vld [vmem:[#allocation5 + $0xc34] ss:$12 sps:$4 sm:$0xff]  }
 0x140   :  { %4903 = vmatpush2.bf16.msra.mxu0 %v7440_v15  ;;  %v7482_v15 = vld [vmem:[#allocation5 + $0xdb4] ss:$12 sps:$4 sm:$0xff]  }
 0x141   :  { %4944 = vmatpush2.bf16.msra.mxu1 %v7443_v18  ;;  %4954 = vmatprep.subr.bf16.mxu0 %v7449_v24  ;;  %v7480_v18 = vld [vmem:[#allocation5 + $0xdb0] ss:$12 sps:$4 sm:$0xff]   ;;  %v7483_v24 = vld [vmem:[#allocation5 + $0xc18] ss:$12 sps:$4 sm:$0xff]  }
 0x142   :  { %4995 = vmatprep.subr.bf16.mxu1 %v7452_v25  ;;  %v7486_v25 = vld [vmem:[#allocation5 + $0xd98] ss:$12 sps:$4 sm:$0xff]  }
 0x143   :  { %v4660_v39 = vpop.f32.mrf.mxu0  ;;  %4905 = vmatmul.mubr.bf16.vlgmr.msra.gmra.mxu0 %v8228_v21 }
 0x144   :  { %4946 = vmatmul.mubr.bf16.vlgmr.msra.gmra.mxu1 %v8237_v31  ;;  %v4701_v40 = vpop.f32.mrf.mxu1  ;;  %v4661_v47 = vadd.f32 %v4660_v39, %v957_v46  ;;  %4955 = vmatpush1.bf16.msra.mxu0 %v7447_v29  ;;  %v7494_v29 = vld [vmem:[#allocation5 + $0xd84] ss:$12 sps:$4 sm:$0xff]   ;;  %v7492_v46 = vld [vmem:[#allocation5 + $0xd80] ss:$12 sps:$4 sm:$0xff]   ;;  %v7498_v39 = vld [vmem:[#allocation5 + $0xee8] ss:$12 sps:$4 sm:$0xff]  }
 0x145   :  { %4996 = vmatpush1.bf16.msra.mxu1 %v7450_v30  ;;  %v4662_v48 = vpop.f32.mrf.mxu0  ;;  %4956 = vmatprep.subr.bf16.mxu0 %v7455_v33  ;;  %v7489_v30 = vld [vmem:[#allocation5 + $0xc00] ss:$12 sps:$4 sm:$0xff]  }
 0x146   :  { %v4703_v50 = vpop.f32.mrf.mxu1  ;;  %4997 = vmatprep.subr.bf16.mxu1 %v7458_v6  ;;  %v4663_v52 = vadd.f32 %v4662_v48, %v961_v35  ;;  %v8245_v54 = vadd.f32 %v4701_v40, %v4661_v47  ;;  %4986 = vmatprep.mubr.bf16.mxu0 %v8233_v28  ;;  %v7497_v33 = vld [vmem:[#allocation5 + $0xd6c] ss:$12 sps:$4 sm:$0xff]   ;;  %v7495_v35 = vld [vmem:[#allocation5 + $0xd68] ss:$12 sps:$4 sm:$0xff]   ;;  %v7504_v47 = vld [vmem:[#allocation5 + $0xed0] ss:$12 sps:$4 sm:$0xff]  }
 0x147   :  { %5027 = vmatprep.mubr.bf16.mxu1 %v8241_v38  ;;  %v4664_v58 = vpop.f32.mrf.mxu0  ;;  %v7500_v6 = vld [vmem:[#allocation5 + $0xeec] ss:$12 sps:$4 sm:$0xff]   ;;  %v7503_v40 = vld [vmem:[#allocation5 + $0xd54] ss:$12 sps:$4 sm:$0xff]   ;;  %v7509_v48 = vld [vmem:[#allocation5 + $0xd3c] ss:$12 sps:$4 sm:$0xff]  }
 0x148   :  { %v4705_v61 = vpop.f32.mrf.mxu1  ;;  %v8249_v37 = vadd.f32 %v4703_v50, %v4663_v52  ;;  %4957 = vmatpush1.bf16.msra.mxu0 %v7453_v41  ;;  %v7506_v41 = vld [vmem:[#allocation5 + $0xed4] ss:$12 sps:$4 sm:$0xff]   ;;  %v7512_v50 = vld [vmem:[#allocation5 + $0xebc] ss:$12 sps:$4 sm:$0xff]   ;;  %v7515_v52 = vld [vmem:[#allocation5 + $0xd24] ss:$12 sps:$4 sm:$0xff]  }
 0x149   :  { %4998 = vmatpush1.bf16.msra.mxu1 %v7456_v43  ;;  %v4665_v62 = vpop.f32.mrf.mxu0  ;;  %4958 = vmatprep.subr.bf16.mxu0 %v7461_v51  ;;  %v7501_v43 = vld [vmem:[#allocation5 + $0xd50] ss:$12 sps:$4 sm:$0xff]   ;;  %v7507_v51 = vld [vmem:[#allocation5 + $0xd38] ss:$12 sps:$4 sm:$0xff]   ;;  %v7516_v58 = vld [vmem:[#allocation5 + $0xea0] ss:$12 sps:$4 sm:$0xff]  }
 0x14a   :  { %4999 = vmatprep.subr.bf16.mxu1 %v7464_v34  ;;  %v4706_v3 = vpop.f32.mrf.mxu1  ;;  %v7510_v34 = vld [vmem:[#allocation5 + $0xeb8] ss:$12 sps:$4 sm:$0xff]  }
 0x14b   :  { %v7521_v61 = vld [vmem:[#allocation5 + $0xd0c] ss:$12 sps:$4 sm:$0xff]   ;;  %v7527_v3 = vld [vmem:[#allocation5 + $0xcf4] ss:$12 sps:$4 sm:$0xff]  }
 0x14c   :  { %4959 = vmatpush1.bf16.msra.mxu0 %v7459_v55  ;;  %v7518_v55 = vld [vmem:[#allocation5 + $0xea4] ss:$12 sps:$4 sm:$0xff]   ;;  %v7524_v62 = vld [vmem:[#allocation5 + $0xe8c] ss:$12 sps:$4 sm:$0xff]  }
 0x14d   :  { %5000 = vmatpush1.bf16.msra.mxu1 %v7462_v56  ;;  %4960 = vmatprep.subr.bf16.mxu0 %v7467_v1  ;;  %v7513_v56 = vld [vmem:[#allocation5 + $0xd20] ss:$12 sps:$4 sm:$0xff]   ;;  %v7519_v1 = vld [vmem:[#allocation5 + $0xd08] ss:$12 sps:$4 sm:$0xff]  }
 0x14e   :  { %5001 = vmatprep.subr.bf16.mxu1 %v7470_v2  ;;  %v7522_v2 = vld [vmem:[#allocation5 + $0xe88] ss:$12 sps:$4 sm:$0xff]  }
 0x150   :  { %4961 = vmatpush1.bf16.msra.mxu0 %v7465_v4  ;;  %v7530_v4 = vld [vmem:[#allocation5 + $0xe74] ss:$12 sps:$4 sm:$0xff]  }
 0x151   :  { %5002 = vmatpush1.bf16.msra.mxu1 %v7468_v7  ;;  %4962 = vmatprep.subr.bf16.mxu0 %v7473_v8  ;;  %v7525_v7 = vld [vmem:[#allocation5 + $0xcf0] ss:$12 sps:$4 sm:$0xff]   ;;  %v1071_v8 = vcombine.high %v8218_v5, %v8218_v5 }
 0x152   :  { %5003 = vmatprep.subr.bf16.mxu1 %v7476_v10  ;;  %v7528_v10 = vld [vmem:[#allocation5 + $0xe70] ss:$12 sps:$4 sm:$0xff]  }
 0x154   :  { %4963 = vmatpush1.bf16.msra.mxu0 %v7471_v11  ;;  %v7533_v11 = vld [vmem:[#allocation5 + $0xcdc] ss:$12 sps:$4 sm:$0xff]  }
 0x155   :  { %5004 = vmatpush1.bf16.msra.mxu1 %v7474_v12  ;;  %4964 = vmatprep.subr.bf16.mxu0 %v7479_v14  ;;  %v7536_v12 = vld [vmem:[#allocation5 + $0xe5c] ss:$12 sps:$4 sm:$0xff]   ;;  %v7531_v14 = vld [vmem:[#allocation5 + $0xcd8] ss:$12 sps:$4 sm:$0xff]  }
 0x156   :  { %5005 = vmatprep.subr.bf16.mxu1 %v7482_v15  ;;  %v8254_v15 = vrot.slane %v1071_v8, %v8130_v49  ;;  %v7564_v8 = vld [vmem:[#allocation5 + $0x10e0] ss:$12 sps:$4 sm:$0xff]  }
 0x158   :  { %4965 = vmatpush1.bf16.msra.mxu0 %v7477_v16  ;;  %v7534_v16 = vld [vmem:[#allocation5 + $0xe58] ss:$12 sps:$4 sm:$0xff]   ;;  %v1087_v5 = vcombine.high %v8254_v15, %v8254_v15 }
 0x159   :  { %5006 = vmatpush1.bf16.msra.mxu1 %v7480_v18  ;;  %4966 = vmatprep.subr.bf16.mxu0 %v7485_v20  ;;  %v7539_v18 = vld [vmem:[#allocation5 + $0xcc4] ss:$12 sps:$4 sm:$0xff]  }
 0x15a   :  { %5007 = vmatprep.subr.bf16.mxu1 %v7488_v22  ;;  %v7542_v20 = vld [vmem:[#allocation5 + $0xe44] ss:$12 sps:$4 sm:$0xff]   ;;  %v7537_v22 = vld [vmem:[#allocation5 + $0xcc0] ss:$12 sps:$4 sm:$0xff]  }
 0x15c   :  { %4967 = vmatpush1.bf16.msra.mxu0 %v7483_v24  ;;  %v8260_v24 = vrot.slane %v8222_v9, %v8130_v49  ;;  %v7551_v9 = vld [vmem:[#allocation5 + $0xf94] ss:$12 sps:$4 sm:$0xff]  }
 0x15d   :  { %5008 = vmatpush1.bf16.msra.mxu1 %v7486_v25  ;;  %4968 = vmatprep.subr.bf16.mxu0 %v7491_v26  ;;  %v7540_v25 = vld [vmem:[#allocation5 + $0xe40] ss:$12 sps:$4 sm:$0xff]  }
 0x15e   :  { %5009 = vmatprep.subr.bf16.mxu1 %v7494_v29  ;;  %v7545_v26 = vld [vmem:[#allocation5 + $0xfac] ss:$12 sps:$4 sm:$0xff]  }
 0x15f   :  { %v7548_v29 = vld [vmem:[#allocation5 + $0x112c] ss:$12 sps:$4 sm:$0xff]  }
 0x160   :  { %4969 = vmatpush1.bf16.msra.mxu0 %v7489_v30  ;;  %v7543_v30 = vld [vmem:[#allocation5 + $0xfa8] ss:$12 sps:$4 sm:$0xff]  }
 0x161   :  { %5010 = vmatpush1.bf16.msra.mxu1 %v7492_v46  ;;  %4970 = vmatprep.subr.bf16.mxu0 %v7497_v33  ;;  %v7546_v46 = vld [vmem:[#allocation5 + $0x1128] ss:$12 sps:$4 sm:$0xff]   ;;  %v8263_v33 = vrot.slane %v1087_v5, %v8130_v49 }
 0x162   :  { %5011 = vmatprep.subr.bf16.mxu1 %v7500_v6  ;;  %v8267_v6 = vcombine.high %v8260_v24, %v8260_v24  ;;  %v7581_v5 = vld [vmem:[#allocation5 + $0xf1c] ss:$12 sps:$4 sm:$0xff]  }
 0x164   :  { %4971 = vmatpush2.bf16.msra.mxu0 %v7495_v35  ;;  %v7554_v35 = vld [vmem:[#allocation5 + $0x1114] ss:$12 sps:$4 sm:$0xff]  }
 0x165   :  { %5012 = vmatpush2.bf16.msra.mxu1 %v7498_v39  ;;  %4972 = vmatprep.subr.bf16.mxu0 %v7503_v40  ;;  %v7549_v39 = vld [vmem:[#allocation5 + $0xf90] ss:$12 sps:$4 sm:$0xff]  }
 0x166   :  { %5013 = vmatprep.subr.bf16.mxu1 %v7506_v41  ;;  %v7552_v40 = vld [vmem:[#allocation5 + $0x1110] ss:$12 sps:$4 sm:$0xff]   ;;  %v8271_v41 = vcombine.high %v8263_v33, %v8263_v33 }
 0x168   :  { %4973 = vmatpush2.bf16.msra.mxu0 %v7501_v43 }
 0x169   :  { %5014 = vmatpush2.bf16.msra.mxu1 %v7504_v47  ;;  %4974 = vmatprep.subr.bf16.mxu0 %v7509_v48 }
 0x16a   :  { %5015 = vmatprep.subr.bf16.mxu1 %v7512_v50 }
 0x16c   :  { %4975 = vmatpush2.bf16.msra.mxu0 %v7507_v51 }
 0x16d   :  { %5016 = vmatpush2.bf16.msra.mxu1 %v7510_v34  ;;  %4976 = vmatprep.subr.bf16.mxu0 %v7515_v52  ;;  %v7557_v34 = vld [vmem:[#allocation5 + $0xf7c] ss:$12 sps:$4 sm:$0xff]  }
 0x16e   :  { %5017 = vmatprep.subr.bf16.mxu1 %v7518_v55  ;;  %v7560_v52 = vld [vmem:[#allocation5 + $0x10fc] ss:$12 sps:$4 sm:$0xff]  }
 0x170   :  { %4977 = vmatpush2.bf16.msra.mxu0 %v7513_v56 }
 0x171   :  { %5018 = vmatpush2.bf16.msra.mxu1 %v7516_v58  ;;  %4978 = vmatprep.subr.bf16.mxu0 %v7521_v61  ;;  %v7555_v58 = vld [vmem:[#allocation5 + $0xf78] ss:$12 sps:$4 sm:$0xff]  }
 0x172   :  { %5019 = vmatprep.subr.bf16.mxu1 %v7524_v62  ;;  %v7558_v61 = vld [vmem:[#allocation5 + $0x10f8] ss:$12 sps:$4 sm:$0xff]  }
 0x174   :  { %4979 = vmatpush2.bf16.msra.mxu0 %v7519_v1 }
 0x175   :  { %5020 = vmatpush2.bf16.msra.mxu1 %v7522_v2  ;;  %4980 = vmatprep.subr.bf16.mxu0 %v7527_v3  ;;  %v7563_v3 = vld [vmem:[#allocation5 + $0xf64] ss:$12 sps:$4 sm:$0xff]  }
 0x176   :  { %5021 = vmatprep.subr.bf16.mxu1 %v7530_v4  ;;  %v7566_v4 = vld [vmem:[#allocation5 + $0x10e4] ss:$12 sps:$4 sm:$0xff]  }
 0x178   :  { %4981 = vmatpush2.bf16.msra.mxu0 %v7525_v7  ;;  %v7561_v7 = vld [vmem:[#allocation5 + $0xf60] ss:$12 sps:$4 sm:$0xff]  }
 0x179   :  { %5022 = vmatpush2.bf16.msra.mxu1 %v7528_v10  ;;  %4982 = vmatprep.subr.bf16.mxu0 %v7533_v11  ;;  %v7569_v10 = vld [vmem:[#allocation5 + $0xf4c] ss:$12 sps:$4 sm:$0xff]  }
 0x17a   :  { %5023 = vmatprep.subr.bf16.mxu1 %v7536_v12  ;;  %v7572_v11 = vld [vmem:[#allocation5 + $0x10cc] ss:$12 sps:$4 sm:$0xff]   ;;  %v7567_v12 = vld [vmem:[#allocation5 + $0xf48] ss:$12 sps:$4 sm:$0xff]  }
 0x17c   :  { %4983 = vmatpush2.bf16.msra.mxu0 %v7531_v14  ;;  %v7570_v14 = vld [vmem:[#allocation5 + $0x10c8] ss:$12 sps:$4 sm:$0xff]  }
 0x17d   :  { %5024 = vmatpush2.bf16.msra.mxu1 %v7534_v16  ;;  %4984 = vmatprep.subr.bf16.mxu0 %v7539_v18  ;;  %v7575_v16 = vld [vmem:[#allocation5 + $0xf34] ss:$12 sps:$4 sm:$0xff]  }
 0x17e   :  { %5025 = vmatprep.subr.bf16.mxu1 %v7542_v20  ;;  %v7578_v18 = vld [vmem:[#allocation5 + $0x10b4] ss:$12 sps:$4 sm:$0xff]   ;;  %v7573_v20 = vld [vmem:[#allocation5 + $0xf30] ss:$12 sps:$4 sm:$0xff]  }
 0x180   :  { %4985 = vmatpush2.bf16.msra.mxu0 %v7537_v22  ;;  %v7576_v22 = vld [vmem:[#allocation5 + $0x10b0] ss:$12 sps:$4 sm:$0xff]  }
 0x181   :  { %5026 = vmatpush2.bf16.msra.mxu1 %v7540_v25  ;;  %5036 = vmatprep.subr.bf16.mxu0 %v7545_v26  ;;  %v7584_v25 = vld [vmem:[#allocation5 + $0x109c] ss:$12 sps:$4 sm:$0xff]   ;;  %v7579_v26 = vld [vmem:[#allocation5 + $0xf18] ss:$12 sps:$4 sm:$0xff]  }
 0x182   :  { %5077 = vmatprep.subr.bf16.mxu1 %v7548_v29  ;;  %v7582_v29 = vld [vmem:[#allocation5 + $0x1098] ss:$12 sps:$4 sm:$0xff]  }
 0x183   :  { %v4742_v43 = vpop.f32.mrf.mxu0  ;;  %4987 = vmatmul.mubr.bf16.vlgmr.msra.gmra.mxu0 %v8260_v24 }
 0x184   :  { %5028 = vmatmul.mubr.bf16.vlgmr.msra.gmra.mxu1 %v8267_v6  ;;  %v4783_v47 = vpop.f32.mrf.mxu1  ;;  %v4743_v48 = vadd.f32 %v4742_v43, %v8245_v54  ;;  %5037 = vmatpush1.bf16.msra.mxu0 %v7543_v30  ;;  %v7587_v30 = vld [vmem:[#allocation5 + $0xf04] ss:$12 sps:$4 sm:$0xff]   ;;  %v7591_v43 = vld [vmem:[#allocation5 + $0x1068] ss:$12 sps:$4 sm:$0xff]  }
 0x185   :  { %5078 = vmatpush1.bf16.msra.mxu1 %v7546_v46  ;;  %v4744_v50 = vpop.f32.mrf.mxu0  ;;  %5038 = vmatprep.subr.bf16.mxu0 %v7551_v9  ;;  %v7590_v46 = vld [vmem:[#allocation5 + $0x1084] ss:$12 sps:$4 sm:$0xff]   ;;  %v7585_v9 = vld [vmem:[#allocation5 + $0xf00] ss:$12 sps:$4 sm:$0xff]  }
 0x186   :  { %v4785_v51 = vpop.f32.mrf.mxu1  ;;  %5079 = vmatprep.subr.bf16.mxu1 %v7554_v35  ;;  %v4745_v55 = vadd.f32 %v4744_v50, %v8249_v37  ;;  %v8277_v56 = vadd.f32 %v4783_v47, %v4743_v48  ;;  %5068 = vmatprep.mubr.bf16.mxu0 %v8263_v33  ;;  %v7588_v35 = vld [vmem:[#allocation5 + $0x1080] ss:$12 sps:$4 sm:$0xff]   ;;  %v7594_v47 = vld [vmem:[#allocation5 + $0x11e8] ss:$12 sps:$4 sm:$0xff]  }
 0x187   :  { %5109 = vmatprep.mubr.bf16.mxu1 %v8271_v41  ;;  %v4746_v62 = vpop.f32.mrf.mxu0  ;;  %v7599_v48 = vld [vmem:[#allocation5 + $0x1054] ss:$12 sps:$4 sm:$0xff]  }
 0x188   :  { %v4787_v54 = vpop.f32.mrf.mxu1  ;;  %v8281_v1 = vadd.f32 %v4785_v51, %v4745_v55  ;;  %5039 = vmatpush1.bf16.msra.mxu0 %v7549_v39  ;;  %v7593_v39 = vld [vmem:[#allocation5 + $0x106c] ss:$12 sps:$4 sm:$0xff]   ;;  %v7602_v50 = vld [vmem:[#allocation5 + $0x11d4] ss:$12 sps:$4 sm:$0xff]   ;;  %v7597_v51 = vld [vmem:[#allocation5 + $0x1050] ss:$12 sps:$4 sm:$0xff]  }
 0x189   :  { %5080 = vmatpush1.bf16.msra.mxu1 %v7552_v40  ;;  %v4747_v2 = vpop.f32.mrf.mxu0  ;;  %5040 = vmatprep.subr.bf16.mxu0 %v7557_v34  ;;  %v7596_v40 = vld [vmem:[#allocation5 + $0x11ec] ss:$12 sps:$4 sm:$0xff]   ;;  %v7600_v34 = vld [vmem:[#allocation5 + $0x11d0] ss:$12 sps:$4 sm:$0xff]  }
 0x18a   :  { %5081 = vmatprep.subr.bf16.mxu1 %v7560_v52  ;;  %v4788_v37 = vpop.f32.mrf.mxu1  ;;  %v7605_v52 = vld [vmem:[#allocation5 + $0x103c] ss:$12 sps:$4 sm:$0xff]   ;;  %v7611_v62 = vld [vmem:[#allocation5 + $0x1024] ss:$12 sps:$4 sm:$0xff]   ;;  %v7609_v2 = vld [vmem:[#allocation5 + $0x1020] ss:$12 sps:$4 sm:$0xff]  }
 0x18b   :  { %v7608_v55 = vld [vmem:[#allocation5 + $0x11bc] ss:$12 sps:$4 sm:$0xff]   ;;  %v7614_v54 = vld [vmem:[#allocation5 + $0x11a4] ss:$12 sps:$4 sm:$0xff]   ;;  %v7620_v37 = vld [vmem:[#allocation5 + $0x118c] ss:$12 sps:$4 sm:$0xff]  }
 0x18c   :  { %5041 = vmatpush1.bf16.msra.mxu0 %v7555_v58  ;;  %v7603_v58 = vld [vmem:[#allocation5 + $0x1038] ss:$12 sps:$4 sm:$0xff]  }
 0x18d   :  { %5082 = vmatpush1.bf16.msra.mxu1 %v7558_v61  ;;  %5042 = vmatprep.subr.bf16.mxu0 %v7563_v3  ;;  %v7606_v61 = vld [vmem:[#allocation5 + $0x11b8] ss:$12 sps:$4 sm:$0xff]   ;;  %v7612_v3 = vld [vmem:[#allocation5 + $0x11a0] ss:$12 sps:$4 sm:$0xff]  }
 0x18e   :  { %5083 = vmatprep.subr.bf16.mxu1 %v7566_v4  ;;  %v7617_v4 = vld [vmem:[#allocation5 + $0x100c] ss:$12 sps:$4 sm:$0xff]  }
 0x190   :  { %5043 = vmatpush1.bf16.msra.mxu0 %v7561_v7  ;;  %v7615_v7 = vld [vmem:[#allocation5 + $0x1008] ss:$12 sps:$4 sm:$0xff]  }
 0x191   :  { %5084 = vmatpush1.bf16.msra.mxu1 %v7564_v8  ;;  %5044 = vmatprep.subr.bf16.mxu0 %v7569_v10  ;;  %v7618_v8 = vld [vmem:[#allocation5 + $0x1188] ss:$12 sps:$4 sm:$0xff]  }
 0x192   :  { %5085 = vmatprep.subr.bf16.mxu1 %v7572_v11  ;;  %v7623_v10 = vld [vmem:[#allocation5 + $0xff4] ss:$12 sps:$4 sm:$0xff]  }
 0x193   :  { %v7626_v11 = vld [vmem:[#allocation5 + $0x1174] ss:$12 sps:$4 sm:$0xff]  }
 0x194   :  { %5045 = vmatpush1.bf16.msra.mxu0 %v7567_v12  ;;  %v7621_v12 = vld [vmem:[#allocation5 + $0xff0] ss:$12 sps:$4 sm:$0xff]  }
 0x195   :  { %5086 = vmatpush1.bf16.msra.mxu1 %v7570_v14  ;;  %5046 = vmatprep.subr.bf16.mxu0 %v7575_v16  ;;  %v7624_v14 = vld [vmem:[#allocation5 + $0x1170] ss:$12 sps:$4 sm:$0xff]  }
 0x196   :  { %5087 = vmatprep.subr.bf16.mxu1 %v7578_v18  ;;  %v7629_v16 = vld [vmem:[#allocation5 + $0xfdc] ss:$12 sps:$4 sm:$0xff]  }
 0x197   :  { %v7632_v18 = vld [vmem:[#allocation5 + $0x115c] ss:$12 sps:$4 sm:$0xff]  }
 0x198   :  { %5047 = vmatpush1.bf16.msra.mxu0 %v7573_v20  ;;  %v7627_v20 = vld [vmem:[#allocation5 + $0xfd8] ss:$12 sps:$4 sm:$0xff]  }
 0x199   :  { %5088 = vmatpush1.bf16.msra.mxu1 %v7576_v22  ;;  %5048 = vmatprep.subr.bf16.mxu0 %v7581_v5  ;;  %v7630_v22 = vld [vmem:[#allocation5 + $0x1158] ss:$12 sps:$4 sm:$0xff]  }
 0x19a   :  { %5089 = vmatprep.subr.bf16.mxu1 %v7584_v25  ;;  %v7635_v5 = vld [vmem:[#allocation5 + $0xfc4] ss:$12 sps:$4 sm:$0xff]  }
 0x19b   :  { %v7638_v25 = vld [vmem:[#allocation5 + $0x1144] ss:$12 sps:$4 sm:$0xff]  }
 0x19c   :  { %5049 = vmatpush1.bf16.msra.mxu0 %v7579_v26  ;;  %v7633_v26 = vld [vmem:[#allocation5 + $0xfc0] ss:$12 sps:$4 sm:$0xff]  }
 0x19d   :  { %5090 = vmatpush1.bf16.msra.mxu1 %v7582_v29  ;;  %5050 = vmatprep.subr.bf16.mxu0 %v7587_v30  ;;  %v7636_v29 = vld [vmem:[#allocation5 + $0x1140] ss:$12 sps:$4 sm:$0xff]   ;;  %v8285_v30 = vrot.slane %v8254_v15, %v8130_v49 }
 0x19e   :  { %5091 = vmatprep.subr.bf16.mxu1 %v7590_v46  ;;  %v7642_v46 = vld [vmem:[#allocation5 + $0x12ac] ss:$12 sps:$4 sm:$0xff]   ;;  %v7648_v15 = vld [vmem:[#allocation5 + $0x1294] ss:$12 sps:$4 sm:$0xff]  }
 0x1a0   :  { %5051 = vmatpush1.bf16.msra.mxu0 %v7585_v9  ;;  %v7645_v9 = vld [vmem:[#allocation5 + $0x142c] ss:$12 sps:$4 sm:$0xff]  }
 0x1a1   :  { %5092 = vmatpush1.bf16.msra.mxu1 %v7588_v35  ;;  %5052 = vmatprep.subr.bf16.mxu0 %v7593_v39  ;;  %v8287_v35 = vld.sshfl [vmem:[#allocation2 + $0x18] sm:$0x13 pattern:$0x75316420]  ;;  %v7640_v39 = vld [vmem:[#allocation5 + $0x12a8] ss:$12 sps:$4 sm:$0xff]  }
 0x1a2   :  { %5093 = vmatprep.subr.bf16.mxu1 %v7596_v40  ;;  %v7643_v40 = vld [vmem:[#allocation5 + $0x1428] ss:$12 sps:$4 sm:$0xff]  }
 0x1a4   :  { %5053 = vmatpush2.bf16.msra.mxu0 %v7591_v43  ;;  %v1127_v43 = vcombine.high %v8287_v35, %v8287_v35 }
 0x1a5   :  { %5094 = vmatpush2.bf16.msra.mxu1 %v7594_v47  ;;  %5054 = vmatprep.subr.bf16.mxu0 %v7599_v48  ;;  %v8293_v47 = vcombine.high %v8285_v30, %v8285_v30  ;;  %v7651_v48 = vld [vmem:[#allocation5 + $0x1414] ss:$12 sps:$4 sm:$0xff]  }
 0x1a6   :  { %5095 = vmatprep.subr.bf16.mxu1 %v7602_v50  ;;  %v7646_v50 = vld [vmem:[#allocation5 + $0x1290] ss:$12 sps:$4 sm:$0xff]  }
 0x1a8   :  { %5055 = vmatpush2.bf16.msra.mxu0 %v7597_v51  ;;  %v7649_v51 = vld [vmem:[#allocation5 + $0x1410] ss:$12 sps:$4 sm:$0xff]  }
 0x1a9   :  { %5096 = vmatpush2.bf16.msra.mxu1 %v7600_v34  ;;  %5056 = vmatprep.subr.bf16.mxu0 %v7605_v52  ;;  %v8296_v34 = vrot.slane %v1127_v43, %v8130_v49  ;;  %v7681_v43 = vld [vmem:[#allocation5 + $0x139c] ss:$12 sps:$4 sm:$0xff]  }
 0x1aa   :  { %5097 = vmatprep.subr.bf16.mxu1 %v7608_v55 }
 0x1ac   :  { %5057 = vmatpush2.bf16.msra.mxu0 %v7603_v58 }
 0x1ad   :  { %5098 = vmatpush2.bf16.msra.mxu1 %v7606_v61  ;;  %5058 = vmatprep.subr.bf16.mxu0 %v7611_v62 }
 0x1ae   :  { %5099 = vmatprep.subr.bf16.mxu1 %v7614_v54  ;;  %v7654_v54 = vld [vmem:[#allocation5 + $0x127c] ss:$12 sps:$4 sm:$0xff]  }
 0x1b0   :  { %5059 = vmatpush2.bf16.msra.mxu0 %v7609_v2  ;;  %v7657_v2 = vld [vmem:[#allocation5 + $0x13fc] ss:$12 sps:$4 sm:$0xff]  }
 0x1b1   :  { %5100 = vmatpush2.bf16.msra.mxu1 %v7612_v3  ;;  %5060 = vmatprep.subr.bf16.mxu0 %v7617_v4 }
 0x1b2   :  { %5101 = vmatprep.subr.bf16.mxu1 %v7620_v37  ;;  %v7652_v37 = vld [vmem:[#allocation5 + $0x1278] ss:$12 sps:$4 sm:$0xff]  }
 0x1b4   :  { %5061 = vmatpush2.bf16.msra.mxu0 %v7615_v7  ;;  %v7655_v7 = vld [vmem:[#allocation5 + $0x13f8] ss:$12 sps:$4 sm:$0xff]  }
 0x1b5   :  { %5102 = vmatpush2.bf16.msra.mxu1 %v7618_v8  ;;  %5062 = vmatprep.subr.bf16.mxu0 %v7623_v10  ;;  %v8077_v8 = vmov 0  }
 0x1b6   :  { %5103 = vmatprep.subr.bf16.mxu1 %v7626_v11 }
 0x1b8   :  { %5063 = vmatpush2.bf16.msra.mxu0 %v7621_v12 }
 0x1b9   :  { %5104 = vmatpush2.bf16.msra.mxu1 %v7624_v14  ;;  %5064 = vmatprep.subr.bf16.mxu0 %v7629_v16  ;;  %v7660_v14 = vld [vmem:[#allocation5 + $0x1264] ss:$12 sps:$4 sm:$0xff]  }
 0x1ba   :  { %5105 = vmatprep.subr.bf16.mxu1 %v7632_v18  ;;  %v7663_v16 = vld [vmem:[#allocation5 + $0x13e4] ss:$12 sps:$4 sm:$0xff]   ;;  %v7658_v18 = vld [vmem:[#allocation5 + $0x1260] ss:$12 sps:$4 sm:$0xff]  }
 0x1bc   :  { %5065 = vmatpush2.bf16.msra.mxu0 %v7627_v20  ;;  %v7661_v20 = vld [vmem:[#allocation5 + $0x13e0] ss:$12 sps:$4 sm:$0xff]  }
 0x1bd   :  { %5106 = vmatpush2.bf16.msra.mxu1 %v7630_v22  ;;  %5066 = vmatprep.subr.bf16.mxu0 %v7635_v5  ;;  %v7666_v22 = vld [vmem:[#allocation5 + $0x124c] ss:$12 sps:$4 sm:$0xff]  }
 0x1be   :  { %5107 = vmatprep.subr.bf16.mxu1 %v7638_v25  ;;  %v7669_v5 = vld [vmem:[#allocation5 + $0x13cc] ss:$12 sps:$4 sm:$0xff]   ;;  %v7664_v25 = vld [vmem:[#allocation5 + $0x1248] ss:$12 sps:$4 sm:$0xff]  }
 0x1c0   :  { %5067 = vmatpush2.bf16.msra.mxu0 %v7633_v26  ;;  %v7667_v26 = vld [vmem:[#allocation5 + $0x13c8] ss:$12 sps:$4 sm:$0xff]  }
 0x1c1   :  { %5108 = vmatpush2.bf16.msra.mxu1 %v7636_v29  ;;  %5118 = vmatprep.subr.bf16.mxu0 %v7642_v46  ;;  %v7672_v29 = vld [vmem:[#allocation5 + $0x1234] ss:$12 sps:$4 sm:$0xff]  }
 0x1c2   :  { %5159 = vmatprep.subr.bf16.mxu1 %v7645_v9  ;;  %v7675_v46 = vld [vmem:[#allocation5 + $0x13b4] ss:$12 sps:$4 sm:$0xff]   ;;  %v7670_v9 = vld [vmem:[#allocation5 + $0x1230] ss:$12 sps:$4 sm:$0xff]  }
 0x1c3   :  { %v4824_v52 = vpop.f32.mrf.mxu0  ;;  %5069 = vmatmul.mubr.bf16.vlgmr.msra.gmra.mxu0 %v8285_v30 }
 0x1c4   :  { %5110 = vmatmul.mubr.bf16.vlgmr.msra.gmra.mxu1 %v8293_v47  ;;  %v4865_v55 = vpop.f32.mrf.mxu1  ;;  %v4825_v58 = vadd.f32 %v4824_v52, %v8277_v56  ;;  %5119 = vmatpush1.bf16.msra.mxu0 %v7640_v39  ;;  %v7673_v39 = vld [vmem:[#allocation5 + $0x13b0] ss:$12 sps:$4 sm:$0xff]   ;;  %v7682_v52 = vld [vmem:[#allocation5 + $0x1200] ss:$12 sps:$4 sm:$0xff]  }
 0x1c5   :  { %5160 = vmatpush1.bf16.msra.mxu1 %v7643_v40  ;;  %v4826_v61 = vpop.f32.mrf.mxu0  ;;  %5120 = vmatprep.subr.bf16.mxu0 %v7648_v15  ;;  %v7678_v40 = vld [vmem:[#allocation5 + $0x121c] ss:$12 sps:$4 sm:$0xff]   ;;  %v7676_v15 = vld [vmem:[#allocation5 + $0x1218] ss:$12 sps:$4 sm:$0xff]  }
 0x1c6   :  { %v4867_v62 = vpop.f32.mrf.mxu1  ;;  %5161 = vmatprep.subr.bf16.mxu1 %v7651_v48  ;;  %v4827_v3 = vadd.f32 %v4826_v61, %v8281_v1  ;;  %v8302_v4 = vadd.f32 %v4865_v55, %v4825_v58  ;;  %5191 = vmatprep.mubr.bf16.mxu1 %v8077_v8  ;;  %v7679_v48 = vld [vmem:[#allocation5 + $0x1398] ss:$12 sps:$4 sm:$0xff]   ;;  %v8309_v55 = vrot.slane %v8287_v35, %v8130_v49  ;;  %v7685_v58 = vld [vmem:[#allocation5 + $0x1380] ss:$12 sps:$4 sm:$0xff]   ;;  %v7693_v35 = vld [vmem:[#allocation5 + $0x1350] ss:$12 sps:$4 sm:$0xff]  }
 0x1c7   :  { %5150 = vmatprep.mubr.bf16.mxu0 %v8296_v34  ;;  %v4828_v10 = vpop.f32.mrf.mxu0  ;;  %v7690_v61 = vld [vmem:[#allocation5 + $0x136c] ss:$12 sps:$4 sm:$0xff]   ;;  %v7700_v8 = vld [vmem:[#allocation5 + $0x133c] ss:$12 sps:$4 sm:$0xff]  }
 0x1c8   :  { %v4869_v56 = vpop.f32.mrf.mxu1  ;;  %v8305_v11 = vadd.f32 %v4867_v62, %v4827_v3  ;;  %5121 = vmatpush1.bf16.msra.mxu0 %v7646_v50  ;;  %v7684_v50 = vld [vmem:[#allocation5 + $0x1204] ss:$12 sps:$4 sm:$0xff]   ;;  %v8313_v3 = vcombine.high %v8309_v55, %v8309_v55  ;;  %v7701_v10 = vld [vmem:[#allocation5 + $0x140] ss:$12 sps:$4 sm:$0xff]  }
 0x1c9   :  { %5162 = vmatpush1.bf16.msra.mxu1 %v7649_v51  ;;  %v4829_v12 = vpop.f32.mrf.mxu0  ;;  %5122 = vmatprep.subr.bf16.mxu0 %v7654_v54  ;;  %v7687_v51 = vld [vmem:[#allocation5 + $0x1384] ss:$12 sps:$4 sm:$0xff]   ;;  %v7688_v54 = vld [vmem:[#allocation5 + $0x1368] ss:$12 sps:$4 sm:$0xff]  }
 0x1ca   :  { %5163 = vmatprep.subr.bf16.mxu1 %v7657_v2  ;;  %v4870_v1 = vpop.f32.mrf.mxu1  ;;  %v7691_v62 = vld [vmem:[#allocation5 + $0x170] ss:$12 sps:$4 sm:$0xff]   ;;  %v7696_v49 = vld [vmem:[#allocation5 + $0x158] ss:$12 sps:$4 sm:$0xff]   ;;  %v7702_v12 = vld [vmem:[#allocation5 + $0x80] ss:$12 sps:$4 sm:$0xff]  }
 0x1cb   :  { %v7692_v2 = vld [vmem:[#allocation5 + $0xb0] ss:$12 sps:$4 sm:$0xff]   ;;  %v7698_v56 = vld [vmem:[#allocation5 + $0x1338] ss:$12 sps:$4 sm:$0xff]   ;;  %v7703_v1 = vld [vmem:[#allocation5 + $0x1320] ss:$12 sps:$4 sm:$0xff]  }
 0x1cc   :  { %5123 = vmatpush1.bf16.msra.mxu0 %v7652_v37  ;;  %v7695_v37 = vld [vmem:[#allocation5 + $0x1354] ss:$12 sps:$4 sm:$0xff]  }
 0x1cd   :  { %5164 = vmatpush1.bf16.msra.mxu1 %v7655_v7  ;;  %5124 = vmatprep.subr.bf16.mxu0 %v7660_v14  ;;  %v7697_v7 = vld [vmem:[#allocation5 + $0x98] ss:$12 sps:$4 sm:$0xff]  }
 0x1ce   :  { %5165 = vmatprep.subr.bf16.mxu1 %v7663_v16  ;;  %v7705_v14 = vld [vmem:[#allocation5 + $0x1324] ss:$12 sps:$4 sm:$0xff]   ;;  %v7706_v16 = vld [vmem:[#allocation5 + $0x128] ss:$12 sps:$4 sm:$0xff]  }
 0x1d0   :  { %5125 = vmatpush1.bf16.msra.mxu0 %v7658_v18  ;;  %v7707_v18 = vld [vmem:[#allocation5 + $0x68] ss:$12 sps:$4 sm:$0xff]  }
 0x1d1   :  { %5166 = vmatpush1.bf16.msra.mxu1 %v7661_v20  ;;  %5126 = vmatprep.subr.bf16.mxu0 %v7666_v22  ;;  %v7710_v20 = vld [vmem:[#allocation5 + $0x130c] ss:$12 sps:$4 sm:$0xff]   ;;  %v7711_v22 = vld [vmem:[#allocation5 + $0x110] ss:$12 sps:$4 sm:$0xff]  }
 0x1d2   :  { %5167 = vmatprep.subr.bf16.mxu1 %v7669_v5  ;;  %v7708_v5 = vld [vmem:[#allocation5 + $0x1308] ss:$12 sps:$4 sm:$0xff]  }
 0x1d4   :  { %5127 = vmatpush1.bf16.msra.mxu0 %v7664_v25  ;;  %v7712_v25 = vld [vmem:[#allocation5 + $0x50] ss:$12 sps:$4 sm:$0xff]  }
 0x1d5   :  { %5168 = vmatpush1.bf16.msra.mxu1 %v7667_v26  ;;  %5128 = vmatprep.subr.bf16.mxu0 %v7672_v29  ;;  %v7716_v26 = vld [vmem:[#allocation5 + $0xf8] ss:$12 sps:$4 sm:$0xff]   ;;  %v7713_v29 = vld [vmem:[#allocation5 + $0x12f0] ss:$12 sps:$4 sm:$0xff]  }
 0x1d6   :  { %5169 = vmatprep.subr.bf16.mxu1 %v7675_v46  ;;  %v7717_v46 = vld [vmem:[#allocation5 + $0x38] ss:$12 sps:$4 sm:$0xff]  }
 0x1d8   :  { %5129 = vmatpush1.bf16.msra.mxu0 %v7670_v9  ;;  %v7720_v9 = vld [vmem:[#allocation5 + $0x12dc] ss:$12 sps:$4 sm:$0xff]  }
 0x1d9   :  { %5170 = vmatpush1.bf16.msra.mxu1 %v7673_v39  ;;  %5130 = vmatprep.subr.bf16.mxu0 %v7678_v40  ;;  %v7721_v39 = vld [vmem:[#allocation5 + $0xe0] ss:$12 sps:$4 sm:$0xff]   ;;  %v7718_v40 = vld [vmem:[#allocation5 + $0x12d8] ss:$12 sps:$4 sm:$0xff]  }
 0x1da   :  { %5171 = vmatprep.subr.bf16.mxu1 %v7681_v43  ;;  %v7722_v43 = vld [vmem:[#allocation5 + $0x20] ss:$12 sps:$4 sm:$0xff]  }
 0x1dc   :  { %5131 = vmatpush1.bf16.msra.mxu0 %v7676_v15  ;;  %v7725_v15 = vld [vmem:[#allocation5 + $0x12c4] ss:$12 sps:$4 sm:$0xff]  }
 0x1dd   :  { %5172 = vmatpush1.bf16.msra.mxu1 %v7679_v48  ;;  %5132 = vmatprep.subr.bf16.mxu0 %v7684_v50  ;;  %v7726_v48 = vld [vmem:[#allocation5 + $0xc8] ss:$12 sps:$4 sm:$0xff]   ;;  %v7723_v50 = vld [vmem:[#allocation5 + $0x12c0] ss:$12 sps:$4 sm:$0xff]  }
 0x1de   :  { %5173 = vmatprep.subr.bf16.mxu1 %v7687_v51  ;;  %v7727_v51 = vld [vmem:[#allocation5 + $0x8] ss:$12 sps:$4 sm:$0xff]  }
 0x1e0   :  { %5133 = vmatpush1.bf16.msra.mxu0 %v7682_v52  ;;  %v7728_v52 = vld [vmem:[#allocation5 + $0x2f0] ss:$12 sps:$4 sm:$0xff]  }
 0x1e1   :  { %5174 = vmatpush1.bf16.msra.mxu1 %v7685_v58  ;;  %5134 = vmatprep.subr.bf16.mxu0 %v7690_v61  ;;  %v7729_v58 = vld [vmem:[#allocation5 + $0x470] ss:$12 sps:$4 sm:$0xff]  }
 0x1e2   :  { %6645 = vmatprep.subr.bf16.mxu1 %v7691_v62  ;;  %v7730_v61 = vld [vmem:[#allocation5 + $0x230] ss:$12 sps:$4 sm:$0xff]  }
 0x1e3   :  { %v7731_v62 = vld [vmem:[#allocation5 + $0x3b0] ss:$12 sps:$4 sm:$0xff]  }
 0x1e4   :  { %5192 = vmatmul.mubr.bf16.vlgmr.msra.gmra.mxu1 %v8313_v3  ;;  %5135 = vmatpush2.bf16.msra.mxu0 %v7688_v54  ;;  %v7732_v54 = vld [vmem:[#allocation5 + $0x2d8] ss:$12 sps:$4 sm:$0xff]  }
 0x1e5   :  { %6646 = vmatpush3.bf16.msra.mxu1 %v7692_v2  ;;  %5136 = vmatprep.subr.bf16.mxu0 %v7695_v37  ;;  %v7733_v2 = vld [vmem:[#allocation5 + $0x458] ss:$12 sps:$4 sm:$0xff]  }
 0x1e6   :  { %6647 = vmatprep.subr.bf16.mxu1 %v7696_v49  ;;  %5232 = vmatprep.mubr.bf16.mxu1 %v8134_v60  ;;  %v7715_v60 = vld [vmem:[#allocation5 + $0x12f4] ss:$12 sps:$4 sm:$0xff]   ;;  %v7734_v37 = vld [vmem:[#allocation5 + $0x218] ss:$12 sps:$4 sm:$0xff]  }
 0x1e7   :  { %v7735_v49 = vld [vmem:[#allocation5 + $0x398] ss:$12 sps:$4 sm:$0xff]  }
 0x1e8   :  { %5137 = vmatpush2.bf16.msra.mxu0 %v7693_v35 }
 0x1e9   :  { %6648 = vmatpush3.bf16.msra.mxu1 %v7697_v7  ;;  %5138 = vmatprep.subr.bf16.mxu0 %v7700_v8 }
 0x1ea   :  { %6649 = vmatprep.subr.bf16.mxu1 %v7701_v10 }
 0x1ec   :  { %5139 = vmatpush2.bf16.msra.mxu0 %v7698_v56 }
 0x1ed   :  { %6650 = vmatpush3.bf16.msra.mxu1 %v7702_v12  ;;  %5140 = vmatprep.subr.bf16.mxu0 %v7705_v14  ;;  %v7736_v12 = vld [vmem:[#allocation5 + $0x2c0] ss:$12 sps:$4 sm:$0xff]  }
 0x1ee   :  { %6651 = vmatprep.subr.bf16.mxu1 %v7706_v16  ;;  %v7737_v14 = vld [vmem:[#allocation5 + $0x440] ss:$12 sps:$4 sm:$0xff]  }
 0x1f0   :  { %5141 = vmatpush2.bf16.msra.mxu0 %v7703_v1 }
 0x1f1   :  { %6652 = vmatpush3.bf16.msra.mxu1 %v7707_v18  ;;  %5142 = vmatprep.subr.bf16.mxu0 %v7710_v20  ;;  %v7738_v18 = vld [vmem:[#allocation5 + $0x200] ss:$12 sps:$4 sm:$0xff]  }
 0x1f2   :  { %6653 = vmatprep.subr.bf16.mxu1 %v7711_v22  ;;  %v7739_v20 = vld [vmem:[#allocation5 + $0x380] ss:$12 sps:$4 sm:$0xff]  }
 0x1f4   :  { %5143 = vmatpush2.bf16.msra.mxu0 %v7708_v5 }
 0x1f5   :  { %6654 = vmatpush3.bf16.msra.mxu1 %v7712_v25  ;;  %5144 = vmatprep.subr.bf16.mxu0 %v7715_v60  ;;  %v7740_v25 = vld [vmem:[#allocation5 + $0x2a8] ss:$12 sps:$4 sm:$0xff]  }
 0x1f6   :  { %6655 = vmatprep.subr.bf16.mxu1 %v7716_v26  ;;  %v7741_v60 = vld [vmem:[#allocation5 + $0x428] ss:$12 sps:$4 sm:$0xff]  }
 0x1f7   :  { %v7742_v26 = vld [vmem:[#allocation5 + $0x1e8] ss:$12 sps:$4 sm:$0xff]  }
 0x1f8   :  { %5145 = vmatpush2.bf16.msra.mxu0 %v7713_v29  ;;  %v7743_v29 = vld [vmem:[#allocation5 + $0x368] ss:$12 sps:$4 sm:$0xff]  }
 0x1f9   :  { %6656 = vmatpush3.bf16.msra.mxu1 %v7717_v46  ;;  %5146 = vmatprep.subr.bf16.mxu0 %v7720_v9  ;;  %v7746_v46 = vld [vmem:[#allocation5 + $0x1d0] ss:$12 sps:$4 sm:$0xff]  }
 0x1fa   :  { %6657 = vmatprep.subr.bf16.mxu1 %v7721_v39  ;;  %v7747_v9 = vld [vmem:[#allocation5 + $0x350] ss:$12 sps:$4 sm:$0xff]   ;;  %v7748_v39 = vld [vmem:[#allocation5 + $0x278] ss:$12 sps:$4 sm:$0xff]  }
 0x1fc   :  { %5147 = vmatpush2.bf16.msra.mxu0 %v7718_v40  ;;  %v7749_v40 = vld [vmem:[#allocation5 + $0x3f8] ss:$12 sps:$4 sm:$0xff]  }
 0x1fd   :  { %6658 = vmatpush3.bf16.msra.mxu1 %v7722_v43  ;;  %5148 = vmatprep.subr.bf16.mxu0 %v7725_v15  ;;  %v7750_v43 = vld [vmem:[#allocation5 + $0x1b8] ss:$12 sps:$4 sm:$0xff]  }
 0x1fe   :  { %6659 = vmatprep.subr.bf16.mxu1 %v7726_v48  ;;  %v7751_v15 = vld [vmem:[#allocation5 + $0x338] ss:$12 sps:$4 sm:$0xff]   ;;  %v7752_v48 = vld [vmem:[#allocation5 + $0x260] ss:$12 sps:$4 sm:$0xff]  }
 0x200   :  { %5149 = vmatpush2.bf16.msra.mxu0 %v7723_v50  ;;  %v7753_v50 = vld [vmem:[#allocation5 + $0x3e0] ss:$12 sps:$4 sm:$0xff]  }
 0x201   :  { %6660 = vmatpush3.bf16.msra.mxu1 %v7727_v51  ;;  %6667 = vmatprep.subr.bf16.mxu0 %v7728_v52  ;;  %v7754_v51 = vld [vmem:[#allocation5 + $0x1a0] ss:$12 sps:$4 sm:$0xff]  }
 0x202   :  { %6689 = vmatprep.subr.bf16.mxu1 %v7729_v58  ;;  %v7755_v52 = vld [vmem:[#allocation5 + $0x320] ss:$12 sps:$4 sm:$0xff]   ;;  %v7756_v58 = vld [vmem:[#allocation5 + $0x248] ss:$12 sps:$4 sm:$0xff]  }
 0x203   :  { %v4906_v35 = vpop.f32.mrf.mxu0  ;;  %5151 = vmatmul.mubr.bf16.vlgmr.msra.gmra.mxu0 %v8309_v55 }
 0x204   :  { %5233 = vmatmul.mubr.bf16.vlgmr.msra.gmra.mxu1 %v8148_v13  ;;  %v4947_v7 = vpop.f32.mrf.mxu1  ;;  %v4907_v8 = vadd.f32 %v4906_v35, %v8302_v4  ;;  %6668 = vmatpush3.bf16.msra.mxu0 %v7730_v61  ;;  %v7757_v61 = vld [vmem:[#allocation5 + $0x3c8] ss:$12 sps:$4 sm:$0xff]   ;;  %v7763_v35 = vld [vmem:[#allocation5 + $0x6b0] ss:$12 sps:$4 sm:$0xff]  }
 0x205   :  { %6690 = vmatpush3.bf16.msra.mxu1 %v7731_v62  ;;  %v4908_v10 = vpop.f32.mrf.mxu0  ;;  %6669 = vmatprep.subr.bf16.mxu0 %v7732_v54  ;;  %v7758_v62 = vld [vmem:[#allocation5 + $0x188] ss:$12 sps:$4 sm:$0xff]  }
 0x206   :  { %v4949_v56 = vpop.f32.mrf.mxu1  ;;  %6691 = vmatprep.subr.bf16.mxu1 %v7733_v2  ;;  %v4909_v16 = vadd.f32 %v4908_v10, %v8305_v11  ;;  %v8321_v1 = vadd.f32 %v4947_v7, %v4907_v8  ;;  %5272 = vmatprep.mubr.bf16.mxu0 %v8138_v0  ;;  %v7744_v0 = vld [vmem:[#allocation5 + $0x290] ss:$12 sps:$4 sm:$0xff]   ;;  %v7759_v54 = vld [vmem:[#allocation5 + $0x308] ss:$12 sps:$4 sm:$0xff]   ;;  %v7764_v7 = vld [vmem:[#allocation5 + $0x5d8] ss:$12 sps:$4 sm:$0xff]  }
 0x207   :  { %5312 = vmatprep.mubr.bf16.mxu1 %v8151_v17  ;;  %v4910_v13 = vpop.f32.mrf.mxu0  ;;  %v7745_v17 = vld [vmem:[#allocation5 + $0x410] ss:$12 sps:$4 sm:$0xff]   ;;  %v7765_v8 = vld [vmem:[#allocation5 + $0x758] ss:$12 sps:$4 sm:$0xff]  }
 0x208   :  { %v4951_v4 = vpop.f32.mrf.mxu1  ;;  %v8325_v22 = vadd.f32 %v4949_v56, %v4909_v16  ;;  %6670 = vmatpush3.bf16.msra.mxu0 %v7734_v37  ;;  %v7760_v2 = vld [vmem:[#allocation5 + $0x5f0] ss:$12 sps:$4 sm:$0xff]   ;;  %v7766_v10 = vld [vmem:[#allocation5 + $0x518] ss:$12 sps:$4 sm:$0xff]   ;;  %v7770_v16 = vld [vmem:[#allocation5 + $0x500] ss:$12 sps:$4 sm:$0xff]  }
 0x209   :  { %6692 = vmatpush3.bf16.msra.mxu1 %v7735_v49  ;;  %v4911_v5 = vpop.f32.mrf.mxu0  ;;  %6671 = vmatprep.subr.bf16.mxu0 %v7736_v12  ;;  %v7761_v37 = vld [vmem:[#allocation5 + $0x770] ss:$12 sps:$4 sm:$0xff]   ;;  %v7767_v56 = vld [vmem:[#allocation5 + $0x698] ss:$12 sps:$4 sm:$0xff]   ;;  %v7768_v12 = vld [vmem:[#allocation5 + $0x5c0] ss:$12 sps:$4 sm:$0xff]  }
 0x20a   :  { %6693 = vmatprep.subr.bf16.mxu1 %v7737_v14  ;;  %v4952_v11 = vpop.f32.mrf.mxu1  ;;  %v7762_v49 = vld [vmem:[#allocation5 + $0x530] ss:$12 sps:$4 sm:$0xff]   ;;  %v7769_v14 = vld [vmem:[#allocation5 + $0x740] ss:$12 sps:$4 sm:$0xff]   ;;  %v7775_v13 = vld [vmem:[#allocation5 + $0x668] ss:$12 sps:$4 sm:$0xff]  }
 0x20b   :  { %v7776_v4 = vld [vmem:[#allocation5 + $0x590] ss:$12 sps:$4 sm:$0xff]   ;;  %v7782_v11 = vld [vmem:[#allocation5 + $0x4b8] ss:$12 sps:$4 sm:$0xff]  }
 0x20c   :  { %6672 = vmatpush3.bf16.msra.mxu0 %v7738_v18  ;;  %v7771_v18 = vld [vmem:[#allocation5 + $0x680] ss:$12 sps:$4 sm:$0xff]   ;;  %v7777_v5 = vld [vmem:[#allocation5 + $0x710] ss:$12 sps:$4 sm:$0xff]  }
 0x20d   :  { %6694 = vmatpush3.bf16.msra.mxu1 %v7739_v20  ;;  %6673 = vmatprep.subr.bf16.mxu0 %v7740_v25  ;;  %v7773_v20 = vld [vmem:[#allocation5 + $0x728] ss:$12 sps:$4 sm:$0xff]   ;;  %v7778_v25 = vld [vmem:[#allocation5 + $0x4d0] ss:$12 sps:$4 sm:$0xff]  }
 0x20e   :  { %6695 = vmatprep.subr.bf16.mxu1 %v7741_v60  ;;  %v7781_v60 = vld [vmem:[#allocation5 + $0x6f8] ss:$12 sps:$4 sm:$0xff]  }
 0x210   :  { %6674 = vmatpush3.bf16.msra.mxu0 %v7742_v26  ;;  %v7783_v26 = vld [vmem:[#allocation5 + $0x638] ss:$12 sps:$4 sm:$0xff]  }
 0x211   :  { %6696 = vmatpush3.bf16.msra.mxu1 %v7743_v29  ;;  %6675 = vmatprep.subr.bf16.mxu0 %v7744_v0  ;;  %v7784_v29 = vld [vmem:[#allocation5 + $0x560] ss:$12 sps:$4 sm:$0xff]  }
 0x212   :  { %6697 = vmatprep.subr.bf16.mxu1 %v7745_v17  ;;  %v7785_v0 = vld [vmem:[#allocation5 + $0x6e0] ss:$12 sps:$4 sm:$0xff]  }
 0x213   :  { %v7786_v17 = vld [vmem:[#allocation5 + $0x4a0] ss:$12 sps:$4 sm:$0xff]  }
 0x214   :  { %6676 = vmatpush3.bf16.msra.mxu0 %v7746_v46  ;;  %v7787_v46 = vld [vmem:[#allocation5 + $0x620] ss:$12 sps:$4 sm:$0xff]  }
 0x215   :  { %6698 = vmatpush3.bf16.msra.mxu1 %v7747_v9  ;;  %6677 = vmatprep.subr.bf16.mxu0 %v7748_v39  ;;  %v7788_v9 = vld [vmem:[#allocation5 + $0x548] ss:$12 sps:$4 sm:$0xff]  }
 0x216   :  { %6699 = vmatprep.subr.bf16.mxu1 %v7749_v40  ;;  %v7789_v39 = vld [vmem:[#allocation5 + $0x6c8] ss:$12 sps:$4 sm:$0xff]  }
 0x217   :  { %v7790_v40 = vld [vmem:[#allocation5 + $0x488] ss:$12 sps:$4 sm:$0xff]  }
 0x218   :  { %6678 = vmatpush3.bf16.msra.mxu0 %v7750_v43  ;;  %v7791_v43 = vld [vmem:[#allocation5 + $0x608] ss:$12 sps:$4 sm:$0xff]  }
 0x219   :  { %6700 = vmatpush3.bf16.msra.mxu1 %v7751_v15  ;;  %6679 = vmatprep.subr.bf16.mxu0 %v7752_v48  ;;  %v7792_v15 = vld [vmem:[#allocation5 + $0x8f0] ss:$12 sps:$4 sm:$0xff]  }
 0x21a   :  { %6701 = vmatprep.subr.bf16.mxu1 %v7753_v50  ;;  %v7793_v48 = vld [vmem:[#allocation5 + $0xa70] ss:$12 sps:$4 sm:$0xff]  }
 0x21b   :  { %v7794_v50 = vld [vmem:[#allocation5 + $0x830] ss:$12 sps:$4 sm:$0xff]  }
 0x21c   :  { %6680 = vmatpush3.bf16.msra.mxu0 %v7754_v51  ;;  %v7795_v51 = vld [vmem:[#allocation5 + $0x9b0] ss:$12 sps:$4 sm:$0xff]  }
 0x21d   :  { %6702 = vmatpush3.bf16.msra.mxu1 %v7755_v52  ;;  %6681 = vmatprep.subr.bf16.mxu0 %v7756_v58  ;;  %v7796_v52 = vld [vmem:[#allocation5 + $0x8d8] ss:$12 sps:$4 sm:$0xff]  }
 0x21e   :  { %6703 = vmatprep.subr.bf16.mxu1 %v7757_v61  ;;  %v7797_v58 = vld [vmem:[#allocation5 + $0xa58] ss:$12 sps:$4 sm:$0xff]  }
 0x220   :  { %6682 = vmatpush3.bf16.msra.mxu0 %v7758_v62 }
 0x221   :  { %6704 = vmatpush3.bf16.msra.mxu1 %v7759_v54  ;;  %6711 = vmatprep.subr.bf16.mxu0 %v7760_v2  ;;  %v7798_v2 = vld [vmem:[#allocation5 + $0x818] ss:$12 sps:$4 sm:$0xff]  }
 0x222   :  { %6733 = vmatprep.subr.bf16.mxu1 %v7761_v37  ;;  %v7799_v37 = vld [vmem:[#allocation5 + $0x998] ss:$12 sps:$4 sm:$0xff]  }
 0x223   :  { %5273 = vmatmul.mubr.bf16.vlgmr.msra.gmra.mxu0 %v8155_v19  ;;  %v7772_v19 = vld [vmem:[#allocation5 + $0x5a8] ss:$12 sps:$4 sm:$0xff]  }
 0x224   :  { %5313 = vmatmul.mubr.bf16.vlgmr.msra.gmra.mxu1 %v8167_v27  ;;  %6712 = vmatpush3.bf16.msra.mxu0 %v7762_v49  ;;  %v7774_v27 = vld [vmem:[#allocation5 + $0x4e8] ss:$12 sps:$4 sm:$0xff]  }
 0x225   :  { %6734 = vmatpush3.bf16.msra.mxu1 %v7763_v35  ;;  %6713 = vmatprep.subr.bf16.mxu0 %v7764_v7  ;;  %v7800_v7 = vld [vmem:[#allocation5 + $0x8c0] ss:$12 sps:$4 sm:$0xff]  }
 0x226   :  { %6735 = vmatprep.subr.bf16.mxu1 %v7765_v8  ;;  %5352 = vmatprep.mubr.bf16.mxu0 %v8159_v23  ;;  %v7779_v23 = vld [vmem:[#allocation5 + $0x650] ss:$12 sps:$4 sm:$0xff]   ;;  %v7801_v8 = vld [vmem:[#allocation5 + $0xa40] ss:$12 sps:$4 sm:$0xff]  }
 0x227   :  { %5392 = vmatprep.mubr.bf16.mxu1 %v8184_v44  ;;  %v7780_v44 = vld [vmem:[#allocation5 + $0x578] ss:$12 sps:$4 sm:$0xff]  }
 0x228   :  { %6714 = vmatpush3.bf16.msra.mxu0 %v7766_v10 }
 0x229   :  { %6736 = vmatpush3.bf16.msra.mxu1 %v7767_v56  ;;  %6715 = vmatprep.subr.bf16.mxu0 %v7768_v12  ;;  %v7802_v12 = vld [vmem:[#allocation5 + $0x800] ss:$12 sps:$4 sm:$0xff]  }
 0x22a   :  { %6737 = vmatprep.subr.bf16.mxu1 %v7769_v14  ;;  %v7803_v14 = vld [vmem:[#allocation5 + $0x980] ss:$12 sps:$4 sm:$0xff]  }
 0x22c   :  { %6716 = vmatpush3.bf16.msra.mxu0 %v7770_v16 }
 0x22d   :  { %6738 = vmatpush3.bf16.msra.mxu1 %v7771_v18  ;;  %6717 = vmatprep.subr.bf16.mxu0 %v7772_v19  ;;  %v7804_v18 = vld [vmem:[#allocation5 + $0x8a8] ss:$12 sps:$4 sm:$0xff]  }
 0x22e   :  { %6739 = vmatprep.subr.bf16.mxu1 %v7773_v20  ;;  %v7805_v19 = vld [vmem:[#allocation5 + $0xa28] ss:$12 sps:$4 sm:$0xff]  }
 0x22f   :  { %v7806_v20 = vld [vmem:[#allocation5 + $0x7e8] ss:$12 sps:$4 sm:$0xff]  }
 0x230   :  { %6718 = vmatpush3.bf16.msra.mxu0 %v7774_v27  ;;  %v7809_v27 = vld [vmem:[#allocation5 + $0xa10] ss:$12 sps:$4 sm:$0xff]  }
 0x231   :  { %6740 = vmatpush3.bf16.msra.mxu1 %v7775_v13  ;;  %6719 = vmatprep.subr.bf16.mxu0 %v7776_v4  ;;  %v7810_v13 = vld [vmem:[#allocation5 + $0x7d0] ss:$12 sps:$4 sm:$0xff]  }
 0x232   :  { %6741 = vmatprep.subr.bf16.mxu1 %v7777_v5  ;;  %v7811_v4 = vld [vmem:[#allocation5 + $0x950] ss:$12 sps:$4 sm:$0xff]   ;;  %v7812_v5 = vld [vmem:[#allocation5 + $0x878] ss:$12 sps:$4 sm:$0xff]  }
 0x234   :  { %6720 = vmatpush3.bf16.msra.mxu0 %v7778_v25  ;;  %v7813_v25 = vld [vmem:[#allocation5 + $0x9f8] ss:$12 sps:$4 sm:$0xff]  }
 0x235   :  { %6742 = vmatpush3.bf16.msra.mxu1 %v7779_v23  ;;  %6721 = vmatprep.subr.bf16.mxu0 %v7780_v44  ;;  %v7814_v23 = vld [vmem:[#allocation5 + $0x7b8] ss:$12 sps:$4 sm:$0xff]  }
 0x236   :  { %6743 = vmatprep.subr.bf16.mxu1 %v7781_v60  ;;  %v7815_v44 = vld [vmem:[#allocation5 + $0x938] ss:$12 sps:$4 sm:$0xff]   ;;  %v7816_v60 = vld [vmem:[#allocation5 + $0x860] ss:$12 sps:$4 sm:$0xff]  }
 0x238   :  { %6722 = vmatpush3.bf16.msra.mxu0 %v7782_v11  ;;  %v7817_v11 = vld [vmem:[#allocation5 + $0x9e0] ss:$12 sps:$4 sm:$0xff]  }
 0x239   :  { %6744 = vmatpush3.bf16.msra.mxu1 %v7783_v26  ;;  %6723 = vmatprep.subr.bf16.mxu0 %v7784_v29  ;;  %v7818_v26 = vld [vmem:[#allocation5 + $0x7a0] ss:$12 sps:$4 sm:$0xff]  }
 0x23a   :  { %6745 = vmatprep.subr.bf16.mxu1 %v7785_v0  ;;  %v7819_v29 = vld [vmem:[#allocation5 + $0x920] ss:$12 sps:$4 sm:$0xff]   ;;  %v7820_v0 = vld [vmem:[#allocation5 + $0x848] ss:$12 sps:$4 sm:$0xff]  }
 0x23c   :  { %6724 = vmatpush3.bf16.msra.mxu0 %v7786_v17  ;;  %v7821_v17 = vld [vmem:[#allocation5 + $0x9c8] ss:$12 sps:$4 sm:$0xff]  }
 0x23d   :  { %6746 = vmatpush3.bf16.msra.mxu1 %v7787_v46  ;;  %6725 = vmatprep.subr.bf16.mxu0 %v7788_v9  ;;  %v7822_v46 = vld [vmem:[#allocation5 + $0x788] ss:$12 sps:$4 sm:$0xff]  }
 0x23e   :  { %6747 = vmatprep.subr.bf16.mxu1 %v7789_v39  ;;  %v7823_v9 = vld [vmem:[#allocation5 + $0x908] ss:$12 sps:$4 sm:$0xff]   ;;  %v7824_v39 = vld [vmem:[#allocation5 + $0xbf0] ss:$12 sps:$4 sm:$0xff]  }
 0x240   :  { %6726 = vmatpush3.bf16.msra.mxu0 %v7790_v40  ;;  %v7825_v40 = vld [vmem:[#allocation5 + $0xd70] ss:$12 sps:$4 sm:$0xff]  }
 0x241   :  { %6748 = vmatpush3.bf16.msra.mxu1 %v7791_v43  ;;  %6755 = vmatprep.subr.bf16.mxu0 %v7792_v15  ;;  %v7826_v43 = vld [vmem:[#allocation5 + $0xb30] ss:$12 sps:$4 sm:$0xff]  }
 0x242   :  { %6777 = vmatprep.subr.bf16.mxu1 %v7793_v48  ;;  %v7827_v15 = vld [vmem:[#allocation5 + $0xcb0] ss:$12 sps:$4 sm:$0xff]   ;;  %v7828_v48 = vld [vmem:[#allocation5 + $0xbd8] ss:$12 sps:$4 sm:$0xff]  }
 0x243   :  { %v4988_v61 = vpop.f32.mrf.mxu0  ;;  %5353 = vmatmul.mubr.bf16.vlgmr.msra.gmra.mxu0 %v8171_v32 }
 0x244   :  { %5393 = vmatmul.mubr.bf16.vlgmr.msra.gmra.mxu1 %v8201_v53  ;;  %v5029_v62 = vpop.f32.mrf.mxu1  ;;  %v4989_v54 = vadd.f32 %v4988_v61, %v8321_v1  ;;  %6756 = vmatpush3.bf16.msra.mxu0 %v7794_v50  ;;  %v7829_v50 = vld [vmem:[#allocation5 + $0xd58] ss:$12 sps:$4 sm:$0xff]   ;;  %v7833_v61 = vld [vmem:[#allocation5 + $0xd40] ss:$12 sps:$4 sm:$0xff]  }
 0x245   :  { %6778 = vmatpush3.bf16.msra.mxu1 %v7795_v51  ;;  %v4990_v49 = vpop.f32.mrf.mxu0  ;;  %6757 = vmatprep.subr.bf16.mxu0 %v7796_v52  ;;  %v7830_v51 = vld [vmem:[#allocation5 + $0xb18] ss:$12 sps:$4 sm:$0xff]  }
 0x246   :  { %v5031_v35 = vpop.f32.mrf.mxu1  ;;  %6779 = vmatprep.subr.bf16.mxu1 %v7797_v58  ;;  %v4991_v10 = vadd.f32 %v4990_v49, %v8325_v22  ;;  %v8335_v56 = vadd.f32 %v5029_v62, %v4989_v54  ;;  %5432 = vmatprep.mubr.bf16.mxu0 %v8189_v45  ;;  %v7807_v45 = vld [vmem:[#allocation5 + $0x968] ss:$12 sps:$4 sm:$0xff]   ;;  %v7831_v52 = vld [vmem:[#allocation5 + $0xc98] ss:$12 sps:$4 sm:$0xff]   ;;  %v7832_v58 = vld [vmem:[#allocation5 + $0xbc0] ss:$12 sps:$4 sm:$0xff]  }
 0x247   :  { %5472 = vmatprep.mubr.bf16.mxu1 %v8204_v57  ;;  %v4992_v32 = vpop.f32.mrf.mxu0  ;;  %v7808_v57 = vld [vmem:[#allocation5 + $0x890] ss:$12 sps:$4 sm:$0xff]   ;;  %v7834_v62 = vld [vmem:[#allocation5 + $0xb00] ss:$12 sps:$4 sm:$0xff]  }
 0x248   :  { %v5033_v53 = vpop.f32.mrf.mxu1  ;;  %v8339_v1 = vadd.f32 %v5031_v35, %v4991_v10  ;;  %6758 = vmatpush3.bf16.msra.mxu0 %v7798_v2  ;;  %v7835_v54 = vld [vmem:[#allocation5 + $0xc80] ss:$12 sps:$4 sm:$0xff]   ;;  %v7838_v2 = vld [vmem:[#allocation5 + $0xae8] ss:$12 sps:$4 sm:$0xff]   ;;  %v7840_v49 = vld [vmem:[#allocation5 + $0xb90] ss:$12 sps:$4 sm:$0xff]  }
 0x249   :  { %6780 = vmatpush3.bf16.msra.mxu1 %v7799_v37  ;;  %v4993_v16 = vpop.f32.mrf.mxu0  ;;  %6759 = vmatprep.subr.bf16.mxu0 %v7800_v7  ;;  %v7839_v37 = vld [vmem:[#allocation5 + $0xc68] ss:$12 sps:$4 sm:$0xff]   ;;  %v7841_v35 = vld [vmem:[#allocation5 + $0xd10] ss:$12 sps:$4 sm:$0xff]   ;;  %v7844_v7 = vld [vmem:[#allocation5 + $0xb78] ss:$12 sps:$4 sm:$0xff]  }
 0x24a   :  { %6781 = vmatprep.subr.bf16.mxu1 %v7801_v8  ;;  %v5034_v22 = vpop.f32.mrf.mxu1  ;;  %v7845_v8 = vld [vmem:[#allocation5 + $0xcf8] ss:$12 sps:$4 sm:$0xff]   ;;  %v7848_v53 = vld [vmem:[#allocation5 + $0xb60] ss:$12 sps:$4 sm:$0xff]  }
 0x24b   :  { %v7846_v10 = vld [vmem:[#allocation5 + $0xab8] ss:$12 sps:$4 sm:$0xff]   ;;  %v7851_v16 = vld [vmem:[#allocation5 + $0xc20] ss:$12 sps:$4 sm:$0xff]   ;;  %v7854_v22 = vld [vmem:[#allocation5 + $0xa88] ss:$12 sps:$4 sm:$0xff]  }
 0x24c   :  { %6760 = vmatpush3.bf16.msra.mxu0 %v7802_v12  ;;  %v7847_v32 = vld [vmem:[#allocation5 + $0xc38] ss:$12 sps:$4 sm:$0xff]   ;;  %v7849_v12 = vld [vmem:[#allocation5 + $0xce0] ss:$12 sps:$4 sm:$0xff]  }
 0x24d   :  { %6782 = vmatpush3.bf16.msra.mxu1 %v7803_v14  ;;  %6761 = vmatprep.subr.bf16.mxu0 %v7804_v18  ;;  %v7850_v14 = vld [vmem:[#allocation5 + $0xaa0] ss:$12 sps:$4 sm:$0xff]   ;;  %v7852_v18 = vld [vmem:[#allocation5 + $0xb48] ss:$12 sps:$4 sm:$0xff]  }
 0x24e   :  { %6783 = vmatprep.subr.bf16.mxu1 %v7805_v19  ;;  %v7853_v19 = vld [vmem:[#allocation5 + $0xcc8] ss:$12 sps:$4 sm:$0xff]  }
 0x250   :  { %6762 = vmatpush3.bf16.msra.mxu0 %v7806_v20  ;;  %v7855_v20 = vld [vmem:[#allocation5 + $0xc08] ss:$12 sps:$4 sm:$0xff]  }
 0x251   :  { %6784 = vmatpush3.bf16.msra.mxu1 %v7807_v45  ;;  %6763 = vmatprep.subr.bf16.mxu0 %v7808_v57  ;;  %v7856_v45 = vld [vmem:[#allocation5 + $0xef0] ss:$12 sps:$4 sm:$0xff]  }
 0x252   :  { %6785 = vmatprep.subr.bf16.mxu1 %v7809_v27  ;;  %v7857_v57 = vld [vmem:[#allocation5 + $0x1070] ss:$12 sps:$4 sm:$0xff]  }
 0x253   :  { %v7858_v27 = vld [vmem:[#allocation5 + $0xe30] ss:$12 sps:$4 sm:$0xff]  }
 0x254   :  { %6764 = vmatpush3.bf16.msra.mxu0 %v7810_v13  ;;  %v7859_v13 = vld [vmem:[#allocation5 + $0xfb0] ss:$12 sps:$4 sm:$0xff]  }
 0x255   :  { %6786 = vmatpush3.bf16.msra.mxu1 %v7811_v4  ;;  %6765 = vmatprep.subr.bf16.mxu0 %v7812_v5  ;;  %v7860_v4 = vld [vmem:[#allocation5 + $0xed8] ss:$12 sps:$4 sm:$0xff]  }
 0x256   :  { %6787 = vmatprep.subr.bf16.mxu1 %v7813_v25  ;;  %v7861_v5 = vld [vmem:[#allocation5 + $0x1058] ss:$12 sps:$4 sm:$0xff]  }
 0x258   :  { %6766 = vmatpush3.bf16.msra.mxu0 %v7814_v23 }
 0x259   :  { %6788 = vmatpush3.bf16.msra.mxu1 %v7815_v44  ;;  %6767 = vmatprep.subr.bf16.mxu0 %v7816_v60  ;;  %v7862_v60 = vld [vmem:[#allocation5 + $0xe18] ss:$12 sps:$4 sm:$0xff]  }
 0x25a   :  { %6789 = vmatprep.subr.bf16.mxu1 %v7817_v11  ;;  %v7863_v11 = vld [vmem:[#allocation5 + $0xf98] ss:$12 sps:$4 sm:$0xff]  }
 0x25c   :  { %6768 = vmatpush3.bf16.msra.mxu0 %v7818_v26 }
 0x25d   :  { %6790 = vmatpush3.bf16.msra.mxu1 %v7819_v29  ;;  %6769 = vmatprep.subr.bf16.mxu0 %v7820_v0  ;;  %v7864_v0 = vld [vmem:[#allocation5 + $0xec0] ss:$12 sps:$4 sm:$0xff]  }
 0x25e   :  { %6791 = vmatprep.subr.bf16.mxu1 %v7821_v17  ;;  %v7865_v17 = vld [vmem:[#allocation5 + $0x1040] ss:$12 sps:$4 sm:$0xff]  }
 0x260   :  { %6770 = vmatpush3.bf16.msra.mxu0 %v7822_v46 }
 0x261   :  { %6792 = vmatpush3.bf16.msra.mxu1 %v7823_v9  ;;  %6799 = vmatprep.subr.bf16.mxu0 %v7824_v39  ;;  %v7867_v9 = vld [vmem:[#allocation5 + $0xf80] ss:$12 sps:$4 sm:$0xff]  }
 0x262   :  { %6821 = vmatprep.subr.bf16.mxu1 %v7825_v40  ;;  %v7868_v40 = vld [vmem:[#allocation5 + $0xea8] ss:$12 sps:$4 sm:$0xff]  }
 0x263   :  { %5433 = vmatmul.mubr.bf16.vlgmr.msra.gmra.mxu0 %v8208_v59  ;;  %v7836_v59 = vld [vmem:[#allocation5 + $0xba8] ss:$12 sps:$4 sm:$0xff]  }
 0x264   :  { %5473 = vmatmul.mubr.bf16.vlgmr.msra.gmra.mxu1 %v8228_v21  ;;  %6800 = vmatpush3.bf16.msra.mxu0 %v7826_v43  ;;  %v7837_v21 = vld [vmem:[#allocation5 + $0xd28] ss:$12 sps:$4 sm:$0xff]  }
 0x265   :  { %6822 = vmatpush3.bf16.msra.mxu1 %v7827_v15  ;;  %6801 = vmatprep.subr.bf16.mxu0 %v7828_v48  ;;  %v7869_v43 = vld [vmem:[#allocation5 + $0x1028] ss:$12 sps:$4 sm:$0xff]  }
 0x266   :  { %6823 = vmatprep.subr.bf16.mxu1 %v7829_v50  ;;  %5512 = vmatprep.mubr.bf16.mxu0 %v8212_v63  ;;  %v7842_v63 = vld [vmem:[#allocation5 + $0xad0] ss:$12 sps:$4 sm:$0xff]   ;;  %v7870_v48 = vld [vmem:[#allocation5 + $0xde8] ss:$12 sps:$4 sm:$0xff]  }
 0x267   :  { %5552 = vmatprep.mubr.bf16.mxu1 %v8233_v28  ;;  %v7843_v28 = vld [vmem:[#allocation5 + $0xc50] ss:$12 sps:$4 sm:$0xff]   ;;  %v7871_v50 = vld [vmem:[#allocation5 + $0xf68] ss:$12 sps:$4 sm:$0xff]  }
 0x268   :  { %6802 = vmatpush3.bf16.msra.mxu0 %v7830_v51  ;;  %v7874_v51 = vld [vmem:[#allocation5 + $0xdd0] ss:$12 sps:$4 sm:$0xff]  }
 0x269   :  { %6824 = vmatpush3.bf16.msra.mxu1 %v7831_v52  ;;  %6803 = vmatprep.subr.bf16.mxu0 %v7832_v58  ;;  %v7875_v52 = vld [vmem:[#allocation5 + $0xf50] ss:$12 sps:$4 sm:$0xff]   ;;  %v7876_v58 = vld [vmem:[#allocation5 + $0xe78] ss:$12 sps:$4 sm:$0xff]  }
 0x26a   :  { %6825 = vmatprep.subr.bf16.mxu1 %v7833_v61  ;;  %v7877_v61 = vld [vmem:[#allocation5 + $0xff8] ss:$12 sps:$4 sm:$0xff]  }
 0x26c   :  { %6804 = vmatpush3.bf16.msra.mxu0 %v7834_v62  ;;  %v7878_v62 = vld [vmem:[#allocation5 + $0xdb8] ss:$12 sps:$4 sm:$0xff]  }
 0x26d   :  { %6826 = vmatpush3.bf16.msra.mxu1 %v7835_v54  ;;  %6805 = vmatprep.subr.bf16.mxu0 %v7836_v59  ;;  %v7879_v54 = vld [vmem:[#allocation5 + $0xf38] ss:$12 sps:$4 sm:$0xff]   ;;  %v7880_v59 = vld [vmem:[#allocation5 + $0xe60] ss:$12 sps:$4 sm:$0xff]  }
 0x26e   :  { %6827 = vmatprep.subr.bf16.mxu1 %v7837_v21  ;;  %v7881_v21 = vld [vmem:[#allocation5 + $0xfe0] ss:$12 sps:$4 sm:$0xff]  }
 0x270   :  { %6806 = vmatpush3.bf16.msra.mxu0 %v7838_v2  ;;  %v7882_v2 = vld [vmem:[#allocation5 + $0xda0] ss:$12 sps:$4 sm:$0xff]  }
 0x271   :  { %6828 = vmatpush3.bf16.msra.mxu1 %v7839_v37  ;;  %6807 = vmatprep.subr.bf16.mxu0 %v7840_v49  ;;  %v7883_v37 = vld [vmem:[#allocation5 + $0xf20] ss:$12 sps:$4 sm:$0xff]   ;;  %v7884_v49 = vld [vmem:[#allocation5 + $0xe48] ss:$12 sps:$4 sm:$0xff]  }
 0x272   :  { %6829 = vmatprep.subr.bf16.mxu1 %v7841_v35  ;;  %v7885_v35 = vld [vmem:[#allocation5 + $0xfc8] ss:$12 sps:$4 sm:$0xff]  }
 0x274   :  { %6808 = vmatpush3.bf16.msra.mxu0 %v7842_v63  ;;  %v7886_v63 = vld [vmem:[#allocation5 + $0xd88] ss:$12 sps:$4 sm:$0xff]  }
 0x275   :  { %6830 = vmatpush3.bf16.msra.mxu1 %v7843_v28  ;;  %6809 = vmatprep.subr.bf16.mxu0 %v7844_v7  ;;  %v7887_v28 = vld [vmem:[#allocation5 + $0xf08] ss:$12 sps:$4 sm:$0xff]   ;;  %v7888_v7 = vld [vmem:[#allocation5 + $0x11f0] ss:$12 sps:$4 sm:$0xff]  }
 0x276   :  { %6831 = vmatprep.subr.bf16.mxu1 %v7845_v8  ;;  %v7889_v8 = vld [vmem:[#allocation5 + $0x1370] ss:$12 sps:$4 sm:$0xff]  }
 0x278   :  { %6810 = vmatpush3.bf16.msra.mxu0 %v7846_v10  ;;  %v7890_v10 = vld [vmem:[#allocation5 + $0x1130] ss:$12 sps:$4 sm:$0xff]  }
 0x279   :  { %6832 = vmatpush3.bf16.msra.mxu1 %v7847_v32  ;;  %6811 = vmatprep.subr.bf16.mxu0 %v7848_v53  ;;  %v7891_v32 = vld [vmem:[#allocation5 + $0x12b0] ss:$12 sps:$4 sm:$0xff]   ;;  %v7892_v53 = vld [vmem:[#allocation5 + $0x11d8] ss:$12 sps:$4 sm:$0xff]  }
 0x27a   :  { %6833 = vmatprep.subr.bf16.mxu1 %v7849_v12  ;;  %v7893_v12 = vld [vmem:[#allocation5 + $0x1358] ss:$12 sps:$4 sm:$0xff]  }
 0x27c   :  { %6812 = vmatpush3.bf16.msra.mxu0 %v7850_v14 }
 0x27d   :  { %6834 = vmatpush3.bf16.msra.mxu1 %v7851_v16  ;;  %6813 = vmatprep.subr.bf16.mxu0 %v7852_v18  ;;  %v7894_v16 = vld [vmem:[#allocation5 + $0x1118] ss:$12 sps:$4 sm:$0xff]  }
 0x27e   :  { %6835 = vmatprep.subr.bf16.mxu1 %v7853_v19  ;;  %v7895_v18 = vld [vmem:[#allocation5 + $0x1298] ss:$12 sps:$4 sm:$0xff]   ;;  %v7896_v19 = vld [vmem:[#allocation5 + $0x11c0] ss:$12 sps:$4 sm:$0xff]  }
 0x280   :  { %6814 = vmatpush3.bf16.msra.mxu0 %v7854_v22  ;;  %v7897_v22 = vld [vmem:[#allocation5 + $0x1340] ss:$12 sps:$4 sm:$0xff]  }
 0x281   :  { %6836 = vmatpush3.bf16.msra.mxu1 %v7855_v20  ;;  %6843 = vmatprep.subr.bf16.mxu0 %v7856_v45 }
 0x282   :  { %6865 = vmatprep.subr.bf16.mxu1 %v7857_v57  ;;  %v7900_v57 = vld [vmem:[#allocation5 + $0x11a8] ss:$12 sps:$4 sm:$0xff]  }
 0x283   :  { %v5070_v25 = vpop.f32.mrf.mxu0  ;;  %5513 = vmatmul.mubr.bf16.vlgmr.msra.gmra.mxu0 %v8237_v31 }
 0x284   :  { %5553 = vmatmul.mubr.bf16.vlgmr.msra.gmra.mxu1 %v8260_v24  ;;  %v5111_v23 = vpop.f32.mrf.mxu1  ;;  %v5071_v44 = vadd.f32 %v5070_v25, %v8335_v56  ;;  %6844 = vmatpush3.bf16.msra.mxu0 %v7858_v27  ;;  %v7866_v56 = vld [vmem:[#allocation5 + $0xe00] ss:$12 sps:$4 sm:$0xff]   ;;  %v7901_v27 = vld [vmem:[#allocation5 + $0x1328] ss:$12 sps:$4 sm:$0xff]   ;;  %v7904_v25 = vld [vmem:[#allocation5 + $0x1190] ss:$12 sps:$4 sm:$0xff]  }
 0x285   :  { %6866 = vmatpush3.bf16.msra.mxu1 %v7859_v13  ;;  %v8348_v26 = vpop.f32.mrf.mxu0  ;;  %6845 = vmatprep.subr.bf16.mxu0 %v7860_v4  ;;  %v7902_v4 = vld [vmem:[#allocation5 + $0x10e8] ss:$12 sps:$4 sm:$0xff]  }
 0x286   :  { %v8350_v29 = vpop.f32.mrf.mxu1  ;;  %6867 = vmatprep.subr.bf16.mxu1 %v7861_v5  ;;  %v8352_v46 = vadd.f32 %v5111_v23, %v5071_v44  ;;  %5592 = vmatprep.mubr.bf16.mxu0 %v8241_v38  ;;  %v7872_v38 = vld [vmem:[#allocation5 + $0xe90] ss:$12 sps:$4 sm:$0xff]   ;;  %v7903_v5 = vld [vmem:[#allocation5 + $0x1268] ss:$12 sps:$4 sm:$0xff]   ;;  %v7908_v44 = vld [vmem:[#allocation5 + $0x1178] ss:$12 sps:$4 sm:$0xff]  }
 0x287   :  { %5632 = vmatprep.mubr.bf16.mxu1 %v8263_v33  ;;  %v5074_v31 = vpop.f32.mrf.mxu0  ;;  %v7873_v33 = vld [vmem:[#allocation5 + $0x1010] ss:$12 sps:$4 sm:$0xff]  }
 0x288   :  { %v5115_v24 = vpop.f32.mrf.mxu1  ;;  %6846 = vmatpush3.bf16.msra.mxu0 %v7862_v60  ;;  %v7907_v23 = vld [vmem:[#allocation5 + $0x1250] ss:$12 sps:$4 sm:$0xff]   ;;  %v7909_v60 = vld [vmem:[#allocation5 + $0x12f8] ss:$12 sps:$4 sm:$0xff]   ;;  %v7913_v31 = vld [vmem:[#allocation5 + $0x12e0] ss:$12 sps:$4 sm:$0xff]  }
 0x289   :  { %6868 = vmatpush3.bf16.msra.mxu1 %v7863_v11  ;;  %v5075_v39 = vpop.f32.mrf.mxu0  ;;  %6847 = vmatprep.subr.bf16.mxu0 %v7864_v0  ;;  %v7910_v11 = vld [vmem:[#allocation5 + $0x10b8] ss:$12 sps:$4 sm:$0xff]   ;;  %v7914_v24 = vld [vmem:[#allocation5 + $0x10a0] ss:$12 sps:$4 sm:$0xff]  }
 0x28a   :  { %6869 = vmatprep.subr.bf16.mxu1 %v7865_v17  ;;  %v5116_v15 = vpop.f32.mrf.mxu1  ;;  %v7911_v0 = vld [vmem:[#allocation5 + $0x1238] ss:$12 sps:$4 sm:$0xff]   ;;  %v7912_v17 = vld [vmem:[#allocation5 + $0x1160] ss:$12 sps:$4 sm:$0xff]   ;;  %v7917_v39 = vld [vmem:[#allocation5 + $0x12c8] ss:$12 sps:$4 sm:$0xff]  }
 0x28b   :  { %v5794_v15 = vld [vmem:[#allocation8 + $0xf8] sm:$0xff] }
 0x28c   :  { %6848 = vmatpush3.bf16.msra.mxu0 %v7866_v56  ;;  %v7915_v56 = vld [vmem:[#allocation5 + $0x1220] ss:$12 sps:$4 sm:$0xff]  }
 0x28d   :  { %6870 = vmatpush3.bf16.msra.mxu1 %v7867_v9  ;;  %6849 = vmatprep.subr.bf16.mxu0 %v7868_v40  ;;  %v7916_v9 = vld [vmem:[#allocation5 + $0x1148] ss:$12 sps:$4 sm:$0xff]  }
 0x28e   :  { %6871 = vmatprep.subr.bf16.mxu1 %v7869_v43  ;;  %v7918_v40 = vld [vmem:[#allocation5 + $0x1088] ss:$12 sps:$4 sm:$0xff]  }
 0x28f   :  { %v7919_v43 = vld [vmem:[#allocation5 + $0x1208] ss:$12 sps:$4 sm:$0xff]  }
 0x290   :  { %6850 = vmatpush3.bf16.msra.mxu0 %v7870_v48  ;;  %v5073_v48 = vadd.f32 %v8348_v26, %v8339_v1  ;;  %v5792_v1 = vld [vmem:[#allocation8 + $0xe8] sm:$0xff]  ;;  %v7921_v26 = vld [vmem:[#allocation5 + $0x1418] ss:$12 sps:$4 sm:$0xff]  }
 0x291   :  { %6872 = vmatpush3.bf16.msra.mxu1 %v7871_v50  ;;  %6851 = vmatprep.subr.bf16.mxu0 %v7872_v38  ;;  %v7920_v50 = vld [vmem:[#allocation5 + $0x1430] ss:$12 sps:$4 sm:$0xff]   ;;  %v8078_v38 = vmov 0.0  }
 0x292   :  { %6873 = vmatprep.subr.bf16.mxu1 %v7873_v33  ;;  %v5778_v33 = vld [vmem:[#allocation8 + $0x78] sm:$0xff] }
 0x294   :  { %6852 = vmatpush3.bf16.msra.mxu0 %v7874_v51  ;;  %v5793_v51 = vld [vmem:[#allocation8 + $0xf0] sm:$0xff] }
 0x295   :  { %6874 = vmatpush3.bf16.msra.mxu1 %v7875_v52  ;;  %6853 = vmatprep.subr.bf16.mxu0 %v7876_v58  ;;  %v5777_v58 = vld [vmem:[#allocation8 + $0x70] sm:$0xff] }
 0x296   :  { %6875 = vmatprep.subr.bf16.mxu1 %v7877_v61 }
 0x298   :  { %6854 = vmatpush3.bf16.msra.mxu0 %v7878_v62  ;;  %v5114_v62 = vadd.f32 %v8350_v29, %v5073_v48  ;;  %v5775_v29 = vld [vmem:[#allocation8 + $0x60] sm:$0xff] }
 0x299   :  { %6876 = vmatpush3.bf16.msra.mxu1 %v7879_v54  ;;  %6855 = vmatprep.subr.bf16.mxu0 %v7880_v59  ;;  %v5776_v59 = vld [vmem:[#allocation8 + $0x68] sm:$0xff] }
 0x29a   :  { %6877 = vmatprep.subr.bf16.mxu1 %v7881_v21 }
 0x29c   :  { %6856 = vmatpush3.bf16.msra.mxu0 %v7882_v2 }
 0x29d   :  { %6878 = vmatpush3.bf16.msra.mxu1 %v7883_v37  ;;  %6857 = vmatprep.subr.bf16.mxu0 %v7884_v49  ;;  %v5791_v37 = vld [vmem:[#allocation8 + $0xe0] sm:$0xff] }
 0x29e   :  { %6879 = vmatprep.subr.bf16.mxu1 %v7885_v35 }
 0x2a0   :  { %6858 = vmatpush3.bf16.msra.mxu0 %v7886_v63  ;;  %v5790_v63 = vld [vmem:[#allocation8 + $0xd8] sm:$0xff] }
 0x2a1   :  { %6880 = vmatpush3.bf16.msra.mxu1 %v7887_v28  ;;  %6887 = vmatprep.subr.bf16.mxu0 %v7888_v7  ;;  %v7922_v28 = vld [vmem:[#allocation5 + $0x1400] ss:$12 sps:$4 sm:$0xff]  }
 0x2a2   :  { %6909 = vmatprep.subr.bf16.mxu1 %v7889_v8  ;;  %v5774_v8 = vld [vmem:[#allocation8 + $0x58] sm:$0xff] }
 0x2a3   :  { %5593 = vmatmul.mubr.bf16.vlgmr.msra.gmra.mxu0 %v8267_v6  ;;  %v7898_v6 = vld [vmem:[#allocation5 + $0x1100] ss:$12 sps:$4 sm:$0xff]  }
 0x2a4   :  { %5633 = vmatmul.mubr.bf16.vlgmr.msra.gmra.mxu1 %v8285_v30  ;;  %v8358_v14 = vpop.f32.mrf.mxu1  ;;  %6888 = vmatpush3.bf16.msra.mxu0 %v7890_v10  ;;  %v7899_v30 = vld [vmem:[#allocation5 + $0x1280] ss:$12 sps:$4 sm:$0xff]  }
 0x2a5   :  { %6910 = vmatpush3.bf16.msra.mxu1 %v7891_v32  ;;  %6889 = vmatprep.subr.bf16.mxu0 %v7892_v53  ;;  %v5789_v32 = vld [vmem:[#allocation8 + $0xd0] sm:$0xff] }
 0x2a6   :  { %6911 = vmatprep.subr.bf16.mxu1 %v7893_v12  ;;  %v8360_v20 = vpop.f32.mrf.mxu1  ;;  %5672 = vmatprep.mubr.bf16.mxu0 %v8271_v41  ;;  %v7905_v41 = vld [vmem:[#allocation5 + $0x1310] ss:$12 sps:$4 sm:$0xff]   ;;  %v5773_v53 = vld [vmem:[#allocation8 + $0x50] sm:$0xff] }
 0x2a7   :  { %5712 = vmatprep.mubr.bf16.mxu1 %v8296_v34  ;;  %v7906_v34 = vld [vmem:[#allocation5 + $0x10d0] ss:$12 sps:$4 sm:$0xff]  }
 0x2a8   :  { %v5197_v45 = vpop.f32.mrf.mxu1  ;;  %6890 = vmatpush3.bf16.msra.mxu0 %v7894_v16  ;;  %v5788_v12 = vld [vmem:[#allocation8 + $0xc8] sm:$0xff]  ;;  %v7923_v16 = vld [vmem:[#allocation5 + $0x13e8] ss:$12 sps:$4 sm:$0xff]  }
 0x2a9   :  { %6912 = vmatpush3.bf16.msra.mxu1 %v7895_v18  ;;  %6891 = vmatprep.subr.bf16.mxu0 %v7896_v19  ;;  %v5772_v19 = vld [vmem:[#allocation8 + $0x48] sm:$0xff]  ;;  %v5786_v45 = vld [vmem:[#allocation8 + $0xb8] sm:$0xff] }
 0x2aa   :  { %6913 = vmatprep.subr.bf16.mxu1 %v7897_v22  ;;  %v5198_v13 = vpop.f32.mrf.mxu1  ;;  %v5787_v22 = vld [vmem:[#allocation8 + $0xc0] sm:$0xff] }
 0x2ab   :  { %v5784_v13 = vld [vmem:[#allocation8 + $0xa8] sm:$0xff] }
 0x2ac   :  { %6892 = vmatpush3.bf16.msra.mxu0 %v7898_v6  ;;  %v7924_v6 = vld [vmem:[#allocation5 + $0x13d0] ss:$12 sps:$4 sm:$0xff]  }
 0x2ad   :  { %6914 = vmatpush3.bf16.msra.mxu1 %v7899_v30  ;;  %6893 = vmatprep.subr.bf16.mxu0 %v7900_v57  ;;  %v5770_v57 = vld [vmem:[#allocation8 + $0x38] sm:$0xff] }
 0x2ae   :  { %6915 = vmatprep.subr.bf16.mxu1 %v7901_v27  ;;  %v5769_v27 = vld [vmem:[#allocation8 + $0x30] sm:$0xff] }
 0x2b0   :  { %6894 = vmatpush3.bf16.msra.mxu0 %v7902_v4  ;;  %v7925_v4 = vld [vmem:[#allocation5 + $0x13b8] ss:$12 sps:$4 sm:$0xff]  }
 0x2b1   :  { %6916 = vmatpush3.bf16.msra.mxu1 %v7903_v5  ;;  %6895 = vmatprep.subr.bf16.mxu0 %v7904_v25  ;;  %v5768_v5 = vld [vmem:[#allocation8 + $0x28] sm:$0xff]  ;;  %v5783_v25 = vld [vmem:[#allocation8 + $0xa0] sm:$0xff] }
 0x2b2   :  { %6917 = vmatprep.subr.bf16.mxu1 %v7905_v41  ;;  %v5767_v41 = vld [vmem:[#allocation8 + $0x20] sm:$0xff] }
 0x2b4   :  { %6896 = vmatpush3.bf16.msra.mxu0 %v7906_v34  ;;  %v5782_v34 = vld [vmem:[#allocation8 + $0x98] sm:$0xff] }
 0x2b5   :  { %6918 = vmatpush3.bf16.msra.mxu1 %v7907_v23  ;;  %6897 = vmatprep.subr.bf16.mxu0 %v7908_v44  ;;  %v7926_v23 = vld [vmem:[#allocation5 + $0x13a0] ss:$12 sps:$4 sm:$0xff]  }
 0x2b6   :  { %6919 = vmatprep.subr.bf16.mxu1 %v7909_v60  ;;  %v5766_v44 = vld [vmem:[#allocation8 + $0x18] sm:$0xff]  ;;  %v5781_v60 = vld [vmem:[#allocation8 + $0x90] sm:$0xff] }
 0x2b8   :  { %6898 = vmatpush3.bf16.msra.mxu0 %v7910_v11  ;;  %v5765_v11 = vld [vmem:[#allocation8 + $0x10] sm:$0xff] }
 0x2b9   :  { %6920 = vmatpush3.bf16.msra.mxu1 %v7911_v0  ;;  %6899 = vmatprep.subr.bf16.mxu0 %v7912_v17  ;;  %v5780_v0 = vld [vmem:[#allocation8 + $0x88] sm:$0xff]  ;;  %v7927_v17 = vld [vmem:[#allocation5 + $0x1388] ss:$12 sps:$4 sm:$0xff]  }
 0x2ba   :  { %6921 = vmatprep.subr.bf16.mxu1 %v7913_v31  ;;  %v5764_v31 = vld [vmem:[#allocation8 + $0x8] sm:$0xff] }
 0x2bc   :  { %6900 = vmatpush3.bf16.msra.mxu0 %v7914_v24  ;;  %v964_v24 = vsub.s32 2, %v8127_v42 }
 0x2bd   :  { %6922 = vmatpush3.bf16.msra.mxu1 %v7915_v56  ;;  %6901 = vmatprep.subr.bf16.mxu0 %v7916_v9  ;;  %v5779_v56 = vld [vmem:[#allocation8 + $0x80] sm:$0xff] }
 0x2be   :  { %6923 = vmatprep.subr.bf16.mxu1 %v7917_v39  ;;  %v5763_v9 = vld [vmem:[#allocation8] sm:$0xff] }
 0x2c0   :  { %6902 = vmatpush3.bf16.msra.mxu0 %v7918_v40  ;;  %v7938_v40 = vld [vmem:[#allocation7] sm:$0x7] }
 0x2c1   :  { %6924 = vmatpush3.bf16.msra.mxu1 %v7919_v43  ;;  %6992 = vmatprep.subr.bf16.mxu0 %v8078_v38  ;;  %v965_v43 = vrot.slane %v7938_v40, %v964_v24 }
 0x2c2   :  { %6940 = vmatprep.subr.mxu1 %v5794_v15 }
 0x2c3   :  { %v5152_v52 = vpop.f32.mrf.mxu0  ;;  %5673 = vmatmul.mubr.bf16.vlgmr.msra.gmra.mxu0 %v8293_v47 }
 0x2c4   :  { %5713 = vmatmul.mubr.bf16.vlgmr.msra.gmra.mxu1 %v8309_v55  ;;  %v6661_v61 = vpop.f32.mrf.mxu1  ;;  %6993 = vmatpush3.bf16.msra.mxu0 %v7920_v50  ;;  %v5153_v18 = vadd.f32 %v5152_v52, %v8352_v46  ;;  %v5785_v46 = vld [vmem:[#allocation8 + $0xb0] sm:$0xff] }
 0x2c5   :  { %6941 = vmatpush3.msra.mxu1 %v5778_v33  ;;  %v5154_v54 = vpop.f32.mrf.mxu0  ;;  %6994 = vmatprep.subr.bf16.mxu0 %v8078_v38 }
 0x2c6   :  { %6942 = vmatprep.subr.mxu1 %v5793_v51  ;;  %v6662_v21 = vpop.f32.mrf.mxu1  ;;  %v5155_v2 = vadd.f32 %v5154_v54, %v5114_v62  ;;  %7008 = vmatprep.mubr.msk.bf16.mxu0 %vm8079_vm0, %v8078_v38  ;;  %v5194_v30 = vadd.f32 %v8358_v14, %v5153_v18 }
 0x2c7   :  { %6943 = vmatpush3.msra.mxu1 %v5777_v58  ;;  %v8371_v47 = vadd.f32 %v6662_v21, %v6661_v61  ;;  %v5156_v55 = vpop.f32.mrf.mxu0 }
 0x2c8   :  { %6944 = vmatprep.subr.mxu1 %v5792_v1  ;;  %v6664_v49 = vpop.f32.mrf.mxu1  ;;  %v5196_v35 = vadd.f32 %v8360_v20, %v5155_v2  ;;  %6995 = vmatpush3.bf16.msra.mxu0 %v7921_v26  ;;  %v5771_v20 = vld [vmem:[#allocation8 + $0x40] sm:$0xff] }
 0x2c9   :  { %6945 = vmatpush3.msra.mxu1 %v5776_v59  ;;  %v5157_v7 = vpop.f32.mrf.mxu0  ;;  %6996 = vmatprep.subr.bf16.mxu0 %v8078_v38  ;;  %v5235_v33 = vadd.f32 %v8371_v47, %v965_v43  ;;  %v5810_v47 = vld [vmem:[#allocation8 + $0x178] sm:$0xff] }
 0x2ca   :  { %6946 = vmatprep.subr.mxu1 %v5791_v37  ;;  %v6665_v10 = vpop.f32.mrf.mxu1  ;;  %7928 = vtanh.f32 %v5196_v35  ;;  %v5809_v7 = vld [vmem:[#allocation8 + $0x170] sm:$0xff] }
 0x2cb   :  { %6947 = vmatpush3.msra.mxu1 %v5775_v29  ;;  %7930 = vtanh.f32 %v5194_v30  ;;  %v5808_v10 = vld [vmem:[#allocation8 + $0x168] sm:$0xff] }
 0x2cc   :  { %6948 = vmatprep.subr.mxu1 %v5790_v63  ;;  %6997 = vmatpush3.bf16.msra.mxu0 %v7922_v28 }
 0x2cd   :  { %6949 = vmatpush3.msra.mxu1 %v5774_v8  ;;  %6998 = vmatprep.subr.bf16.mxu0 %v8078_v38 }
 0x2ce   :  { %6950 = vmatprep.subr.mxu1 %v5789_v32  ;;  %v5807_v32 = vld [vmem:[#allocation8 + $0x160] sm:$0xff] }
 0x2cf   :  { %6951 = vmatpush3.msra.mxu1 %v5773_v53  ;;  %v5806_v53 = vld [vmem:[#allocation8 + $0x158] sm:$0xff] }
 0x2d0   :  { %6952 = vmatprep.subr.mxu1 %v5788_v12  ;;  %6999 = vmatpush3.bf16.msra.mxu0 %v7923_v16  ;;  %v5805_v12 = vld [vmem:[#allocation8 + $0x150] sm:$0xff]  ;;  %v5804_v16 = vld [vmem:[#allocation8 + $0x148] sm:$0xff] }
 0x2d1   :  { %6953 = vmatpush3.msra.mxu1 %v5772_v19  ;;  %7000 = vmatprep.subr.bf16.mxu0 %v8078_v38 }
 0x2d2   :  { %6954 = vmatprep.subr.mxu1 %v5787_v22  ;;  %v5803_v22 = vld [vmem:[#allocation8 + $0x140] sm:$0xff] }
 0x2d3   :  { %6955 = vmatpush3.msra.mxu1 %v5771_v20 }
 0x2d4   :  { %6956 = vmatprep.subr.mxu1 %v5786_v45  ;;  %7001 = vmatpush3.bf16.msra.mxu0 %v7924_v6  ;;  %v5802_v6 = vld [vmem:[#allocation8 + $0x138] sm:$0xff] }
 0x2d5   :  { %6957 = vmatpush3.msra.mxu1 %v5770_v57  ;;  %7002 = vmatprep.subr.bf16.mxu0 %v8078_v38 }
 0x2d6   :  { %6958 = vmatprep.subr.mxu1 %v5785_v46 }
 0x2d7   :  { %6959 = vmatpush3.msra.mxu1 %v5769_v27  ;;  %v7929_v14 = vpop.eup %7928 }
 0x2d8   :  { %6960 = vmatprep.subr.mxu1 %v5784_v13  ;;  %7003 = vmatpush3.bf16.msra.mxu0 %v7925_v4  ;;  %v7931_v39 = vpop.eup %7930  ;;  %v5801_v13 = vld [vmem:[#allocation8 + $0x130] sm:$0xff] }
 0x2d9   :  { %6961 = vmatpush3.msra.mxu1 %v5768_v5  ;;  %5882 = vmatprep.mubr.f32.mxu1 %v7929_v14  ;;  %v5800_v14 = vld [vmem:[#allocation8 + $0x128] sm:$0xff] }
 0x2da   :  { %6962 = vmatprep.subr.mxu1 %v5783_v25  ;;  %7004 = vmatprep.subr.bf16.mxu0 %v8078_v38 }
 0x2db   :  { %6963 = vmatpush3.msra.mxu1 %v5767_v41  ;;  %v5799_v41 = vld [vmem:[#allocation8 + $0x120] sm:$0xff] }
 0x2dc   :  { %6964 = vmatprep.subr.mxu1 %v5782_v34  ;;  %7005 = vmatpush3.bf16.msra.mxu0 %v7926_v23  ;;  %v5798_v23 = vld [vmem:[#allocation8 + $0x118] sm:$0xff] }
 0x2dd   :  { %6965 = vmatpush3.msra.mxu1 %v5766_v44  ;;  %7006 = vmatprep.subr.bf16.mxu0 %v8078_v38  ;;  %v5797_v44 = vld [vmem:[#allocation8 + $0x110] sm:$0xff] }
 0x2de   :  { %6966 = vmatprep.subr.mxu1 %v5781_v60  ;;  %v5796_v60 = vld [vmem:[#allocation8 + $0x108] sm:$0xff] }
 0x2df   :  { %6967 = vmatpush3.msra.mxu1 %v5765_v11  ;;  %v5795_v11 = vld [vmem:[#allocation8 + $0x100] sm:$0xff] }
 0x2e0   :  { %6968 = vmatprep.subr.mxu1 %v5780_v0  ;;  %7007 = vmatpush3.bf16.msra.mxu0 %v7927_v17 }
 0x2e1   :  { %6969 = vmatpush3.msra.mxu1 %v5764_v31  ;;  %7012 = vmatprep.subr.mxu0 %v8078_v38 }
 0x2e2   :  { %6970 = vmatprep.subr.mxu1 %v5779_v56 }
 0x2e3   :  { %6971 = vmatpush3.msra.mxu1 %v5763_v9  ;;  %v6683_v15 = vpop.f32.mrf.mxu0  ;;  %7009 = vmatmul.mubr.bf16.vlgmr.msra.gmra.mxu0 %v8313_v3 }
 0x2e4   :  { %5883 = vmatmul.mubr.f32.vlgmr.msra.gmra.mxu1 %v7931_v39  ;;  %v6705_v48 = vpop.f32.mrf.mxu1  ;;  %7044 = vmatprep.mubr.msk.f32.mxu0 %vm8079_vm0, %v8078_v38 }
 0x2e5   :  { %v6684_v42 = vpop.f32.mrf.mxu0  ;;  %7013 = vmatpush3.msra.mxu0 %v5810_v47 }
 0x2e6   :  { %v6706_v50 = vpop.f32.mrf.mxu1  ;;  %v6685_v51 = vadd.f32 %v6684_v42, %v6683_v15  ;;  %7014 = vmatprep.subr.mxu0 %v8078_v38 }
 0x2e7   :  { %v6707_v52 = vadd.f32 %v6706_v50, %v6705_v48  ;;  %v6686_v58 = vpop.f32.mrf.mxu0  ;;  %7015 = vmatpush3.msra.mxu0 %v5809_v7 }
 0x2e8   :  { %v6708_v61 = vpop.f32.mrf.mxu1  ;;  %v5275_v62 = vadd.f32 %v6685_v51, %v5235_v33  ;;  %7016 = vmatprep.subr.mxu0 %v8078_v38 }
 0x2e9   :  { %v6687_v1 = vpop.f32.mrf.mxu0  ;;  %7017 = vmatpush3.msra.mxu0 %v5808_v10 }
 0x2ea   :  { %v6709_v26 = vpop.f32.mrf.mxu1  ;;  %v5315_v54 = vadd.f32 %v6707_v52, %v5275_v62  ;;  %7018 = vmatprep.subr.mxu0 %v8078_v38 }
 0x2eb   :  { %7019 = vmatpush3.msra.mxu0 %v5807_v32 }
 0x2ec   :  { %7020 = vmatprep.subr.mxu0 %v8078_v38 }
 0x2ed   :  { %7021 = vmatpush3.msra.mxu0 %v5806_v53 }
 0x2ee   :  { %7022 = vmatprep.subr.mxu0 %v8078_v38 }
 0x2ef   :  { %7023 = vmatpush3.msra.mxu0 %v5805_v12 }
 0x2f0   :  { %7024 = vmatprep.subr.mxu0 %v8078_v38 }
 0x2f1   :  { %7025 = vmatpush3.msra.mxu0 %v5804_v16 }
 0x2f2   :  { %7026 = vmatprep.subr.mxu0 %v8078_v38 }
 0x2f3   :  { %7027 = vmatpush3.msra.mxu0 %v5803_v22 }
 0x2f4   :  { %7028 = vmatprep.subr.mxu0 %v8078_v38 }
 0x2f5   :  { %7029 = vmatpush3.msra.mxu0 %v5802_v6 }
 0x2f6   :  { %7030 = vmatprep.subr.mxu0 %v8078_v38 }
 0x2f7   :  { %7031 = vmatpush3.msra.mxu0 %v5801_v13 }
 0x2f8   :  { %7032 = vmatprep.subr.mxu0 %v8078_v38 }
 0x2f9   :  { %7033 = vmatpush3.msra.mxu0 %v5800_v14 }
 0x2fa   :  { %7034 = vmatprep.subr.mxu0 %v8078_v38 }
 0x2fb   :  { %7035 = vmatpush3.msra.mxu0 %v5799_v41 }
 0x2fc   :  { %7036 = vmatprep.subr.mxu0 %v8078_v38 }
 0x2fd   :  { %7037 = vmatpush3.msra.mxu0 %v5798_v23 }
 0x2fe   :  { %7038 = vmatprep.subr.mxu0 %v8078_v38 }
 0x2ff   :  { %7039 = vmatpush3.msra.mxu0 %v5797_v44 }
 0x300   :  { %7040 = vmatprep.subr.mxu0 %v8078_v38 }
 0x301   :  { %7041 = vmatpush3.msra.mxu0 %v5796_v60 }
 0x302   :  { %7042 = vmatprep.subr.mxu0 %v8078_v38 }
 0x303   :  { %v6727_v59 = vpop.f32.mrf.mxu0  ;;  %7043 = vmatpush3.msra.mxu0 %v5795_v11 }
 0x304   :  { %v6749_v21 = vpop.f32.mrf.mxu1 }
 0x305   :  { %v6728_v3 = vpop.f32.mrf.mxu0 }
 0x306   :  { %v6750_v2 = vpop.f32.mrf.mxu1  ;;  %v6729_v37 = vadd.f32 %v6728_v3, %v6727_v59 }
 0x307   :  { %v6751_v55 = vadd.f32 %v6750_v2, %v6749_v21  ;;  %v6730_v29 = vpop.f32.mrf.mxu0 }
 0x308   :  { %v6752_v49 = vpop.f32.mrf.mxu1  ;;  %v5355_v35 = vadd.f32 %v6729_v37, %v5315_v54 }
 0x309   :  { %v6731_v63 = vpop.f32.mrf.mxu0 }
 0x30a   :  { %v6753_v28 = vpop.f32.mrf.mxu1  ;;  %v5395_v8 = vadd.f32 %v6751_v55, %v5355_v35 }
 0x323   :  { %v6771_v18 = vpop.f32.mrf.mxu0 }
 0x324   :  { %v6793_v19 = vpop.f32.mrf.mxu1 }
 0x325   :  { %v6772_v20 = vpop.f32.mrf.mxu0 }
 0x326   :  { %v6794_v45 = vpop.f32.mrf.mxu1  ;;  %v6773_v30 = vadd.f32 %v6772_v20, %v6771_v18  ;;  %v6644_v20 = vld [vmem:[#allocation10] ss:$0 sm:$0xff] }
 0x327   :  { %v6795_v57 = vadd.f32 %v6794_v45, %v6793_v19  ;;  %v6774_v46 = vpop.f32.mrf.mxu0  ;;  %v5959_v45 = vand.u32 127, %v954_v36 }
 0x328   :  { %v6796_v27 = vpop.f32.mrf.mxu1  ;;  %v5435_v4 = vadd.f32 %v6773_v30, %v5395_v8 }
 0x329   :  { %v6775_v5 = vpop.f32.mrf.mxu0  ;;  %vm5960_vm1 = vcmp.lt.s32.totalorder %v5959_v45, 10 }
 0x32a   :  { %v6797_v25 = vpop.f32.mrf.mxu1  ;;  %v5475_v34 = vadd.f32 %v6795_v57, %v5435_v4 }
 0x343   :  { %v6815_v0 = vpop.f32.mrf.mxu0 }
 0x344   :  { %v6837_v17 = vpop.f32.mrf.mxu1 }
 0x345   :  { %v6816_v31 = vpop.f32.mrf.mxu0 }
 0x346   :  { %v6838_v24 = vpop.f32.mrf.mxu1  ;;  %v6817_v56 = vadd.f32 %v6816_v31, %v6815_v0 }
 0x347   :  { %v6839_v9 = vadd.f32 %v6838_v24, %v6837_v17  ;;  %v6818_v39 = vpop.f32.mrf.mxu0 }
 0x348   :  { %v6840_v40 = vpop.f32.mrf.mxu1  ;;  %v5515_v43 = vadd.f32 %v6817_v56, %v5475_v34 }
 0x349   :  { %v6819_v15 = vpop.f32.mrf.mxu0 }
 0x34a   :  { %v6841_v48 = vpop.f32.mrf.mxu1  ;;  %v5555_v42 = vadd.f32 %v6839_v9, %v5515_v43 }
 0x363   :  { %v6859_v50 = vpop.f32.mrf.mxu0 }
 0x364   :  { %v6881_v33 = vpop.f32.mrf.mxu1 }
 0x365   :  { %v6860_v51 = vpop.f32.mrf.mxu0 }
 0x366   :  { %v6882_v52 = vpop.f32.mrf.mxu1  ;;  %v6861_v55 = vadd.f32 %v6860_v51, %v6859_v50 }
 0x367   :  { %v6862_v58 = vpop.f32.mrf.mxu0  ;;  %v6883_v49 = vadd.f32 %v6882_v52, %v6881_v33 }
 0x368   :  { %v6884_v61 = vpop.f32.mrf.mxu1  ;;  %v5595_v29 = vadd.f32 %v6861_v55, %v5555_v42 }
 0x369   :  { %v6863_v38 = vpop.f32.mrf.mxu0 }
 0x36a   :  { %v6885_v62 = vpop.f32.mrf.mxu1  ;;  %v5635_v63 = vadd.f32 %v6883_v49, %v5595_v29 }
 0x383   :  { %v6903_v1 = vpop.f32.mrf.mxu0 }
 0x384   :  { %v6925_v26 = vpop.f32.mrf.mxu1 }
 0x385   :  { %v6904_v54 = vpop.f32.mrf.mxu0 }
 0x386   :  { %v6926_v59 = vpop.f32.mrf.mxu1  ;;  %v6905_v35 = vadd.f32 %v6904_v54, %v6903_v1 }
 0x387   :  { %v6906_v21 = vpop.f32.mrf.mxu0  ;;  %v6927_v47 = vadd.f32 %v6926_v59, %v6925_v26 }
 0x388   :  { %v6928_v3 = vpop.f32.mrf.mxu1  ;;  %v5675_v28 = vadd.f32 %v6905_v35, %v5635_v63 }
 0x389   :  { %v6907_v2 = vpop.f32.mrf.mxu0 }
 0x38a   :  { %v6929_v37 = vpop.f32.mrf.mxu1  ;;  %v5715_v7 = vadd.f32 %v6927_v47, %v5675_v28 }
 0x3a3   :  { %v5754_v8 = vpop.f32.mrf.mxu0 }
 0x3a4   :  { %v5755_v10 = vadd.f32 %v5754_v8, %v5715_v7  ;;  %v6972_v18 = vpop.f32.mrf.mxu1 }
 0x3a5   :  { %v7010_v32 = vpop.f32.mrf.mxu0 }
 0x3a6   :  { %7932 = vtanh.f32 %v5755_v10  ;;  %v6973_v19 = vpop.f32.mrf.mxu1 }
 0x3a7   :  { %v5757_v53 = vpop.f32.mrf.mxu0  ;;  %v6974_v22 = vadd.f32 %v6973_v19, %v6972_v18 }
 0x3a9   :  { %v7011_v12 = vpop.f32.mrf.mxu0  ;;  %v5885_v6 = vadd.f32 %v6974_v22, %v6644_v20 }
 0x3b3   :  { %v7933_v16 = vpop.eup %7932 }
 0x3b4   :  { %7045 = vmatmul.mubr.f32.vlgmr.msra.gmra.mxu0 %v7933_v16 }
 0x474   :  { %v5954_v30 = vpop.f32.mrf.mxu0 }
 0x475   :  { %v5955_v57 = vadd.f32 %v5954_v30, %v5885_v6 }
 0x476   :  { %v7046_v46 = vpop.f32.mrf.mxu0 }
 0x477   :  { %v5961_v27 = vsel %vm5960_vm1, %v5955_v57, -inf }
 0x478   :  { %v5963_v13 = vsel %vm5962_vm2, %v5961_v27, -inf }
 0x479   :  { %5964 = vmax.xlane.f32.xlu0 %v5963_v13 }
 0x502   :  { %v5965_v4 = vpop.xlane.xlu0 %5964 }
 0x503   :  { %v5966_v5 = vsub.f32 %v5955_v57, %v5965_v4 }
 0x505   :  { %v5967_v25 = vmul.f32 1.442695, %v5966_v5 }
 0x507   :  { %7934 = vpow2.f32 %v5967_v25 }
 0x514   :  { %v7935_v14 = vpop.eup %7934 }
 0x515   :  { %v5969_v41 = vsel %vm5960_vm1, %v7935_v14, 0.0 }
 0x516   :  { %v5970_v34 = vsel %vm5962_vm2, %v5969_v41, 0.0 }
 0x517   :  { %5971 = vadd.xlane.f32.xlu0 %v5970_v34 }
 0x5a0   :  { %v5972_v36 = vpop.xlane.xlu0 %5971 }
 0x5a1   :  { %7936 = vlog2.f32 %v5972_v36 }
 0x5ae   :  { %v7937_v23 = vpop.eup %7936 }
 0x5af   :  { %v5974_v44 = vmul.f32 0.6931472, %v7937_v23 }
 0x5b1   :  { %v5975_v60 = vsub.f32 %v5966_v5, %v5974_v44 }
 0x5b3   :  { %v5976_v11 = vsel %vm5960_vm1, %v5975_v60, 0.0 }
 0x5b4   :  { %5977 = vst [vmem:[#allocation11] sm:$0x3] %v5976_v11 }
 0x5b5   :  { %8050 = shalt.err (!%p8047_p1)
}
 0x5b6   :  { %5987 = dma.vmem_to_hbm [thread:$0]  %s5985_s4, 32, %s8417_s5, [#allocation4]  }
 0x5b7   :  { %8065 = dma.done.wait [#allocation4], 32  }
 0x5b8   :  { %8066 = vsyncadd [#allocation4], 4294967264 }
 0x5b9   :  { %5991 = vsyncpa [#allocation3], 1 }
 0x5ba   :  { %5992 = vsyncpa [#allocation6], 1 }
 0x5bb   :  { %5993 = vsyncpa [#allocation9], 1 }
 0x5bc   :  { %5994 = vsyncpa [#allocation4], 1 }

</bundles_post_ra>
